<compile_context>
chip_gen: v7x
topology: tpu7x:2x2x1
jax: 0.10.0
libtpu: 0.0.40
codegen_flags: <defaults>
</compile_context>

<pallas_src>
import functools

import jax
import jax.numpy as jnp
import numpy as np
from jax import lax
from jax.experimental import pallas as pl
from jax.experimental.pallas import tpu as pltpu

FACTORS = [1, 1, 1, 1, 1 / 2, 1 / 4, 1 / 8]
LEAKY_SLOPE = 0.2
LANE = 128
SUBLANE = 8


def _round_up(x, m):
    return (x + m - 1) // m * m


def _leaky(x):
    return jnp.where(x >= 0, x, LEAKY_SLOPE * x)


# ----------------------------------------------------------------------------
# Fused kernel (one image per grid step):
#   y  = leaky(x @ Wrgb + brgb)                      (1x1 from-RGB)
#   y  = leaky(conv3x3_valid(y, W1) + b1)            (ConvBlock conv1)
#   y  = leaky(conv3x3_valid(y, W2) + b2)            (ConvBlock conv2)
# Everything is kept flattened channels-last on the original (H*W) grid; rows
# that cannot be valid outputs carry junk that never feeds valid rows.
# ----------------------------------------------------------------------------
def _disc_block_kernel(x_ref, wrgb_ref, brgb_ref, w1_ref, b1_ref, w2_ref,
                       b2_ref, o_ref, buf_ref, *, img_w, hwp, pad_rows, cp):
    # Zero the sublane-padding rows once per image (the dy-slices below read
    # into them for junk output rows only; keep them finite/deterministic).
    buf_ref[pl.ds(hwp, pad_rows), :] = jnp.zeros((pad_rows, 3 * cp),
                                                 buf_ref.dtype)

    # ---- from-RGB: 1x1 WSConv + leaky (scale folded into W at prep time) ----
    y = jnp.dot(x_ref[0], wrgb_ref[...], preferred_element_type=jnp.float32)
    y = _leaky(y + brgb_ref[...])                       # (hwp, cp) f32

    # ---- 3x3 VALID WSConv + leaky on the flattened (H*W) grid ----
    # The activation and its two dx-rolled copies are packed lane-dense into
    # one VMEM buffer so each dy tap is a single *aligned* sublane view and
    # the 3 dx taps form one concatenated-K (K = 3*cp) matmul per dy.
    def conv3x3(y_f32, w_ref, b_ref):
        yb0 = y_f32.astype(buf_ref.dtype)
        yb1 = pltpu.roll(y_f32, shift=hwp - 1, axis=0).astype(buf_ref.dtype)
        yb2 = pltpu.roll(y_f32, shift=hwp - 2, axis=0).astype(buf_ref.dtype)
        buf_ref[pl.ds(0, hwp), pl.ds(0, cp)] = yb0
        buf_ref[pl.ds(0, hwp), pl.ds(cp, cp)] = yb1
        buf_ref[pl.ds(0, hwp), pl.ds(2 * cp, cp)] = yb2
        acc = None
        for dy in range(3):
            lhs = buf_ref[pl.ds(dy * img_w, hwp), :]    # aligned view (W%8==0)
            part = jnp.dot(lhs, w_ref[dy],
                           preferred_element_type=jnp.float32)
            acc = part if acc is None else acc + part
        return _leaky(acc + b_ref[...])                 # f32 epilogue

    y = conv3x3(y, w1_ref, b1_ref)
    y = conv3x3(y, w2_ref, b2_ref)

    # Store only the rows that can hold valid outputs (lane dense, 128-wide).
    out_rows = o_ref.shape[1]
    o_ref[0] = y[:out_rows, :].astype(o_ref.dtype)


def _build_fused_call(n, hwp, img_w, cinp, cp, out_rows, flops, bytes_accessed):
    pad_rows = _round_up(2 * img_w, SUBLANE)
    kern = functools.partial(_disc_block_kernel, img_w=img_w, hwp=hwp,
                             pad_rows=pad_rows, cp=cp)
    grid_spec = pltpu.PrefetchScalarGridSpec(
        num_scalar_prefetch=0,
        grid=(n,),
        in_specs=[
            pl.BlockSpec((1, hwp, cinp), lambda i: (i, 0, 0)),    # x
            pl.BlockSpec((cinp, cp), lambda i: (0, 0)),           # Wrgb
            pl.BlockSpec((1, cp), lambda i: (0, 0)),              # brgb
            pl.BlockSpec((3, 3 * cp, cp), lambda i: (0, 0, 0)),   # W1
            pl.BlockSpec((1, cp), lambda i: (0, 0)),              # b1
            pl.BlockSpec((3, 3 * cp, cp), lambda i: (0, 0, 0)),   # W2
            pl.BlockSpec((1, cp), lambda i: (0, 0)),              # b2
        ],
        out_specs=pl.BlockSpec((1, out_rows, cp), lambda i: (i, 0, 0)),
        scratch_shapes=[pltpu.VMEM((hwp + pad_rows, 3 * cp), jnp.bfloat16)],
    )
    return pl.pallas_call(
        kern,
        out_shape=jax.ShapeDtypeStruct((n, out_rows, cp), jnp.float32),
        grid_spec=grid_spec,
        compiler_params=pltpu.CompilerParams(
            dimension_semantics=("parallel",),      # images across v7x cores
            vmem_limit_bytes=32 * 1024 * 1024),
        cost_estimate=pl.CostEstimate(flops=int(flops), transcendentals=0,
                                      bytes_accessed=int(bytes_accessed)),
    )


# ----------------------------------------------------------------------------
# Parameter init (matches WSConv2D.__init__ shapes / scaling) + kernel prep
# ----------------------------------------------------------------------------
def init_wsconv(key, in_c, out_c, k, gain=2):
    w = jax.random.normal(key, (k, k, in_c, out_c), jnp.float32)  # nn.init.normal_
    b = jnp.zeros((out_c,), jnp.float32)                          # nn.init.zeros_
    scale = (gain / (in_c * k * k)) ** 0.5
    return {"w": w, "b": b, "scale": scale, "k": k, "in_c": in_c, "out_c": out_c}


def _prep_1x1(p, cin_pad, cout_pad, dtype=jnp.bfloat16):
    w = (p["w"] * p["scale"]).reshape(p["in_c"], p["out_c"])
    w = jnp.pad(w, ((0, cin_pad - p["in_c"]), (0, cout_pad - p["out_c"])))
    b = jnp.pad(p["b"], (0, cout_pad - p["out_c"])).reshape(1, cout_pad)
    return w.astype(dtype), b.astype(jnp.float32)


def _prep_3x3(p, cin_pad, cout_pad, dtype=jnp.bfloat16):
    # (3,3,cin,cout) -> (dy, dx*cin_pad + cin, cout): the 3 dx taps stacked
    # along K, matching the lane-concatenated in-kernel buffer layout.
    w = p["w"] * p["scale"]
    w = jnp.pad(w, ((0, 0), (0, 0), (0, cin_pad - p["in_c"]),
                    (0, cout_pad - p["out_c"])))
    w = w.reshape(3, 3 * cin_pad, cout_pad)
    b = jnp.pad(p["b"], (0, cout_pad - p["out_c"])).reshape(1, cout_pad)
    return w.astype(dtype), b.astype(jnp.float32)


# ----------------------------------------------------------------------------
# Discriminator (critic)
# ----------------------------------------------------------------------------
class Discriminator:
    def __init__(self, z_dim, num_channels, img_channels, key):
        del z_dim  # unused by the reference __init__ as well
        self.img_channels = img_channels
        self.progressive_blocks = []
        self.rgb_layers = []
        self._prepped = []
        keys = jax.random.split(key, 3 * (len(FACTORS) - 1))
        ki = 0
        for i in range(len(FACTORS) - 1, 0, -1):
            conv_in_c = int(num_channels * FACTORS[i])
            conv_out_c = int(num_channels * FACTORS[i - 1])
            # ConvBlock(in, out, use_pixel_norm=False): conv2 also takes
            # `in_channels`, exactly mirroring the reference wiring.
            block = {"conv1": init_wsconv(keys[ki], conv_in_c, conv_out_c, 3),
                     "conv2": init_wsconv(keys[ki + 1], conv_in_c, conv_out_c, 3)}
            rgb = init_wsconv(keys[ki + 2], img_channels, conv_in_c, 1)
            self.progressive_blocks.append(block)
            self.rgb_layers.append(rgb)

            # Kernel-ready parameters: scale folded in, lane padded, bf16.
            cinp = _round_up(img_channels, SUBLANE)
            cp = _round_up(max(rgb["out_c"], conv_in_c, conv_out_c), LANE)
            wrgb, brgb = _prep_1x1(rgb, cinp, cp)
            w1, b1 = _prep_3x3(block["conv1"], cp, cp)
            w2, b2 = _prep_3x3(block["conv2"], cp, cp)
            self._prepped.append({"cinp": cinp, "cp": cp,
                                  "wrgb": wrgb, "brgb": brgb,
                                  "w1": w1, "b1": b1, "w2": w2, "b2": b2,
                                  "cout": block["conv2"]["out_c"]})
            ki += 3

    def forward(self, x_nchw, step):
        blk = self.progressive_blocks[step]
        # conv2 is wired with in_channels (as in the reference), so only steps
        # with conv_in == conv_out are actually runnable (true for step == 5).
        assert blk["conv1"]["out_c"] == blk["conv2"]["in_c"]

        pp = self._prepped[step]
        n, c, h, w_img = x_nchw.shape
        assert c == self.img_channels and h >= 5 and w_img >= 5
        hw = h * w_img
        hwp = _round_up(hw, SUBLANE)

        # Roll-wraparound safety margin (review request): the deepest input
        # row ever needed by a valid output is exactly hw - 1; the dx-rolled
        # copies only wrap at rows >= hwp - 2, which are never read for valid
        # outputs as long as hwp >= hw.
        p3 = (h - 5) * w_img + (w_img - 5)          # last valid final row
        p2 = p3 + 2 * w_img + 2                     # last conv1 row needed
        assert p2 + 2 * w_img + 2 <= hw - 1
        assert hw <= hwp

        cinp, cp = pp["cinp"], pp["cp"]
        # One NCHW -> flattened channels-last transform + channel pad + bf16.
        x = jnp.transpose(x_nchw, (0, 2, 3, 1)).reshape(n, hw, c)
        x = jnp.pad(x, ((0, 0), (0, hwp - hw), (0, cinp - c)))
        x = x.astype(jnp.bfloat16)

        ho, wo = h - 4, w_img - 4                    # two 3x3 VALID convs
        out_rows = _round_up(ho * w_img, SUBLANE)
        flops = 2 * n * hwp * cp * (cinp + 2 * 9 * cp)
        bytes_accessed = (x.size * 2 + pp["wrgb"].size * 2
                          + 2 * pp["w1"].size * 2 + 3 * cp * 4
                          + n * out_rows * cp * 4)
        call = _build_fused_call(n, hwp, w_img, cinp, cp, out_rows,
                                 flops, bytes_accessed)
        y = call(x, pp["wrgb"], pp["brgb"], pp["w1"], pp["b1"],
                 pp["w2"], pp["b2"])

        # Tail: one fused slice/reshape/transpose on the (already trimmed,
        # lane-dense) kernel output to produce NCHW.
        cout = pp["cout"]
        y = y[:, :ho * w_img, :].reshape(n, ho, w_img, cp)[:, :, :wo, :cout]
        return jnp.transpose(y, (0, 3, 1, 2))


# ----------------------------------------------------------------------------
# Pure-JAX f32 reference (lax.conv) for correctness checking
# ----------------------------------------------------------------------------
def _wsconv_ref(x_nchw, p, apply_leaky=True):
    w_oihw = jnp.transpose(p["w"], (3, 2, 0, 1))
    y = lax.conv_general_dilated(x_nchw * p["scale"], w_oihw, (1, 1), "VALID",
                                 dimension_numbers=("NCHW", "OIHW", "NCHW"))
    y = y + p["b"][None, :, None, None]
    if apply_leaky:
        y = jnp.where(y >= 0, y, LEAKY_SLOPE * y)
    return y


def _forward_ref(disc, x, step):
    x = _wsconv_ref(x, disc.rgb_layers[step])
    x = _wsconv_ref(x, disc.progressive_blocks[step]["conv1"])
    x = _wsconv_ref(x, disc.progressive_blocks[step]["conv2"])
    return x


if __name__ == "__main__":
    key = jax.random.PRNGKey(0)
    k_param, k_x = jax.random.split(key)

    z_dim, num_channels, img_channels = 32, 16, 3
    disc = Discriminator(z_dim, num_channels, img_channels, k_param)

    # small NCHW input (PyTorch convention)
    x = jax.random.normal(k_x, (2, img_channels, 16, 16), jnp.float32)

    # step 5 corresponds to i=1 (conv_in == conv_out == num_channels), the
    # highest-resolution block, whose ConvBlock channel wiring is consistent.
    step = 5
    fwd = jax.jit(functools.partial(disc.forward, step=step))
    out = jax.block_until_ready(fwd(x))

    ref = jax.block_until_ready(_forward_ref(disc, x, step))
    assert out.shape == (2, num_channels, 12, 12), out.shape

    # bf16 MXU operands (weights + activations) with f32 accumulate/epilogue:
    # tolerance sized for bf16 rounding through three chained conv layers
    # (estimated abs-error std ~4e-3 on outputs of std ~1.5).
    out_np, ref_np = np.asarray(out), np.asarray(ref)
    assert float(np.abs(out_np - ref_np).mean()) < 1e-2
    np.testing.assert_allclose(out_np, ref_np, rtol=2e-2, atol=5e-2)

    print("KERNEL_OK")
</pallas_src>

<mosaic_0001>
module attributes {stable_mosaic.version = 11 : i64} {
  func.func @_disc_block_kernel(%arg0: i32, %arg1: memref<1x256x8xbf16, #tpu.memory_space<vmem>>, %arg2: memref<8x128xbf16, #tpu.memory_space<vmem>>, %arg3: memref<1x128xf32, #tpu.memory_space<vmem>>, %arg4: memref<3x384x128xbf16, #tpu.memory_space<vmem>>, %arg5: memref<1x128xf32, #tpu.memory_space<vmem>>, %arg6: memref<3x384x128xbf16, #tpu.memory_space<vmem>>, %arg7: memref<1x128xf32, #tpu.memory_space<vmem>>, %arg8: memref<1x192x128xf32, #tpu.memory_space<vmem>>, %arg9: memref<288x384xbf16, #tpu.memory_space<vmem>>) attributes {dimension_semantics = [#tpu.dimension_semantics<parallel>], iteration_bounds = array<i64: 2>, scalar_prefetch = 0 : i64, scratch_operands = 1 : i64, tpu.core_type = #tpu.core_type<tc>, window_params = [{transform_indices = @transform_0, window_bounds = array<i64: 1, 256, 8>}, {pipeline_mode = #tpu.pipeline_mode<synchronous>, transform_indices = @transform_1, window_bounds = array<i64: 8, 128>}, {pipeline_mode = #tpu.pipeline_mode<synchronous>, transform_indices = @transform_2, window_bounds = array<i64: 1, 128>}, {pipeline_mode = #tpu.pipeline_mode<synchronous>, transform_indices = @transform_3, window_bounds = array<i64: 3, 384, 128>}, {pipeline_mode = #tpu.pipeline_mode<synchronous>, transform_indices = @transform_4, window_bounds = array<i64: 1, 128>}, {pipeline_mode = #tpu.pipeline_mode<synchronous>, transform_indices = @transform_5, window_bounds = array<i64: 3, 384, 128>}, {pipeline_mode = #tpu.pipeline_mode<synchronous>, transform_indices = @transform_6, window_bounds = array<i64: 1, 128>}, {transform_indices = @transform_7, window_bounds = array<i64: 1, 192, 128>}]} {
    %cst = arith.constant 0.000000e+00 : bf16
    %0 = vector.broadcast %cst : bf16 to vector<32x384xbf16>
    %c256 = arith.constant 256 : index
    %c0 = arith.constant 0 : index
    %1 = vector.load %arg9[%c256, %c0] : memref<288x384xbf16, #tpu.memory_space<vmem>>, vector<32x384xbf16>
    tpu.vector_store %arg9[%c256, %c0], %0 {strides = array<i32>} : memref<288x384xbf16, #tpu.memory_space<vmem>>, vector<32x384xbf16>,
    %c0_0 = arith.constant 0 : index
    %c0_1 = arith.constant 0 : index
    %c0_2 = arith.constant 0 : index
    %2 = vector.load %arg1[%c0_0, %c0_1, %c0_2] : memref<1x256x8xbf16, #tpu.memory_space<vmem>>, vector<1x256x8xbf16>
    %3 = vector.shape_cast %2 : vector<1x256x8xbf16> to vector<256x8xbf16>
    %c0_3 = arith.constant 0 : index
    %c0_4 = arith.constant 0 : index
    %4 = vector.load %arg2[%c0_3, %c0_4] : memref<8x128xbf16, #tpu.memory_space<vmem>>, vector<8x128xbf16>
    %cst_5 = arith.constant dense<0.000000e+00> : vector<256x128xf32>
    %5 = tpu.matmul %3, %4, %cst_5 {dimension_numbers = #tpu.dot_dimension_numbers<[1], [0], [0], [1], [0, 0, 1, 1], [], []>} : vector<256x8xbf16>, vector<8x128xbf16>, vector<256x128xf32> -> vector<256x128xf32>
    %c0_6 = arith.constant 0 : index
    %c0_7 = arith.constant 0 : index
    %6 = vector.load %arg3[%c0_6, %c0_7] : memref<1x128xf32, #tpu.memory_space<vmem>>, vector<1x128xf32>
    %7 = vector.broadcast %6 : vector<1x128xf32> to vector<256x128xf32>
    %8 = arith.addf %5, %7 : vector<256x128xf32>
    %cst_8 = arith.constant 0.000000e+00 : f32
    %9 = vector.broadcast %cst_8 : f32 to vector<256x128xf32>
    %10 = arith.cmpf oge, %8, %9 : vector<256x128xf32>
    %cst_9 = arith.constant 2.000000e-01 : f32
    %11 = vector.broadcast %cst_9 : f32 to vector<256x128xf32>
    %12 = arith.mulf %11, %8 : vector<256x128xf32>
    %13 = arith.select %10, %8, %12 : vector<256x128xi1>, vector<256x128xf32>
    %14 = arith.truncf %13 : vector<256x128xf32> to vector<256x128xbf16>
    %c255_i32 = arith.constant 255 : i32
    %15 = tpu.dynamic_rotate %13 by %c255_i32 dim 0 : vector<256x128xf32>, i32 -> vector<256x128xf32>
    %16 = arith.truncf %15 : vector<256x128xf32> to vector<256x128xbf16>
    %c254_i32 = arith.constant 254 : i32
    %17 = tpu.dynamic_rotate %13 by %c254_i32 dim 0 : vector<256x128xf32>, i32 -> vector<256x128xf32>
    %18 = arith.truncf %17 : vector<256x128xf32> to vector<256x128xbf16>
    %c0_10 = arith.constant 0 : index
    %c0_11 = arith.constant 0 : index
    %19 = vector.load %arg9[%c0_10, %c0_11] : memref<288x384xbf16, #tpu.memory_space<vmem>>, vector<256x128xbf16>
    tpu.vector_store %arg9[%c0_10, %c0_11], %14 {strides = array<i32>} : memref<288x384xbf16, #tpu.memory_space<vmem>>, vector<256x128xbf16>,
    %c0_12 = arith.constant 0 : index
    %c128 = arith.constant 128 : index
    %20 = vector.load %arg9[%c0_12, %c128] : memref<288x384xbf16, #tpu.memory_space<vmem>>, vector<256x128xbf16>
    tpu.vector_store %arg9[%c0_12, %c128], %16 {strides = array<i32>} : memref<288x384xbf16, #tpu.memory_space<vmem>>, vector<256x128xbf16>,
    %c0_13 = arith.constant 0 : index
    %c256_14 = arith.constant 256 : index
    %21 = vector.load %arg9[%c0_13, %c256_14] : memref<288x384xbf16, #tpu.memory_space<vmem>>, vector<256x128xbf16>
    tpu.vector_store %arg9[%c0_13, %c256_14], %18 {strides = array<i32>} : memref<288x384xbf16, #tpu.memory_space<vmem>>, vector<256x128xbf16>,
    %c0_15 = arith.constant 0 : index
    %c0_16 = arith.constant 0 : index
    %22 = vector.load %arg9[%c0_15, %c0_16] : memref<288x384xbf16, #tpu.memory_space<vmem>>, vector<256x384xbf16>
    %c0_17 = arith.constant 0 : index
    %c0_18 = arith.constant 0 : index
    %c0_19 = arith.constant 0 : index
    %23 = vector.load %arg4[%c0_17, %c0_18, %c0_19] : memref<3x384x128xbf16, #tpu.memory_space<vmem>>, vector<1x384x128xbf16>
    %24 = vector.shape_cast %23 : vector<1x384x128xbf16> to vector<384x128xbf16>
    %cst_20 = arith.constant dense<0.000000e+00> : vector<256x128xf32>
    %25 = tpu.matmul %22, %24, %cst_20 {dimension_numbers = #tpu.dot_dimension_numbers<[1], [0], [0], [1], [0, 0, 1, 1], [], []>} : vector<256x384xbf16>, vector<384x128xbf16>, vector<256x128xf32> -> vector<256x128xf32>
    %c16 = arith.constant 16 : index
    %c0_21 = arith.constant 0 : index
    %26 = vector.load %arg9[%c16, %c0_21] : memref<288x384xbf16, #tpu.memory_space<vmem>>, vector<256x384xbf16>
    %c1 = arith.constant 1 : index
    %c0_22 = arith.constant 0 : index
    %c0_23 = arith.constant 0 : index
    %27 = vector.load %arg4[%c1, %c0_22, %c0_23] : memref<3x384x128xbf16, #tpu.memory_space<vmem>>, vector<1x384x128xbf16>
    %28 = vector.shape_cast %27 : vector<1x384x128xbf16> to vector<384x128xbf16>
    %cst_24 = arith.constant dense<0.000000e+00> : vector<256x128xf32>
    %29 = tpu.matmul %26, %28, %cst_24 {dimension_numbers = #tpu.dot_dimension_numbers<[1], [0], [0], [1], [0, 0, 1, 1], [], []>} : vector<256x384xbf16>, vector<384x128xbf16>, vector<256x128xf32> -> vector<256x128xf32>
    %30 = arith.addf %25, %29 : vector<256x128xf32>
    %c32 = arith.constant 32 : index
    %c0_25 = arith.constant 0 : index
    %31 = vector.load %arg9[%c32, %c0_25] : memref<288x384xbf16, #tpu.memory_space<vmem>>, vector<256x384xbf16>
    %c2 = arith.constant 2 : index
    %c0_26 = arith.constant 0 : index
    %c0_27 = arith.constant 0 : index
    %32 = vector.load %arg4[%c2, %c0_26, %c0_27] : memref<3x384x128xbf16, #tpu.memory_space<vmem>>, vector<1x384x128xbf16>
    %33 = vector.shape_cast %32 : vector<1x384x128xbf16> to vector<384x128xbf16>
    %cst_28 = arith.constant dense<0.000000e+00> : vector<256x128xf32>
    %34 = tpu.matmul %31, %33, %cst_28 {dimension_numbers = #tpu.dot_dimension_numbers<[1], [0], [0], [1], [0, 0, 1, 1], [], []>} : vector<256x384xbf16>, vector<384x128xbf16>, vector<256x128xf32> -> vector<256x128xf32>
    %35 = arith.addf %30, %34 : vector<256x128xf32>
    %c0_29 = arith.constant 0 : index
    %c0_30 = arith.constant 0 : index
    %36 = vector.load %arg5[%c0_29, %c0_30] : memref<1x128xf32, #tpu.memory_space<vmem>>, vector<1x128xf32>
    %37 = vector.broadcast %36 : vector<1x128xf32> to vector<256x128xf32>
    %38 = arith.addf %35, %37 : vector<256x128xf32>
    %cst_31 = arith.constant 0.000000e+00 : f32
    %39 = vector.broadcast %cst_31 : f32 to vector<256x128xf32>
    %40 = arith.cmpf oge, %38, %39 : vector<256x128xf32>
    %cst_32 = arith.constant 2.000000e-01 : f32
    %41 = vector.broadcast %cst_32 : f32 to vector<256x128xf32>
    %42 = arith.mulf %41, %38 : vector<256x128xf32>
    %43 = arith.select %40, %38, %42 : vector<256x128xi1>, vector<256x128xf32>
    %44 = arith.truncf %43 : vector<256x128xf32> to vector<256x128xbf16>
    %c255_i32_33 = arith.constant 255 : i32
    %45 = tpu.dynamic_rotate %43 by %c255_i32_33 dim 0 : vector<256x128xf32>, i32 -> vector<256x128xf32>
    %46 = arith.truncf %45 : vector<256x128xf32> to vector<256x128xbf16>
    %c254_i32_34 = arith.constant 254 : i32
    %47 = tpu.dynamic_rotate %43 by %c254_i32_34 dim 0 : vector<256x128xf32>, i32 -> vector<256x128xf32>
    %48 = arith.truncf %47 : vector<256x128xf32> to vector<256x128xbf16>
    %c0_35 = arith.constant 0 : index
    %c0_36 = arith.constant 0 : index
    %49 = vector.load %arg9[%c0_35, %c0_36] : memref<288x384xbf16, #tpu.memory_space<vmem>>, vector<256x128xbf16>
    tpu.vector_store %arg9[%c0_35, %c0_36], %44 {strides = array<i32>} : memref<288x384xbf16, #tpu.memory_space<vmem>>, vector<256x128xbf16>,
    %c0_37 = arith.constant 0 : index
    %c128_38 = arith.constant 128 : index
    %50 = vector.load %arg9[%c0_37, %c128_38] : memref<288x384xbf16, #tpu.memory_space<vmem>>, vector<256x128xbf16>
    tpu.vector_store %arg9[%c0_37, %c128_38], %46 {strides = array<i32>} : memref<288x384xbf16, #tpu.memory_space<vmem>>, vector<256x128xbf16>,
    %c0_39 = arith.constant 0 : index
    %c256_40 = arith.constant 256 : index
    %51 = vector.load %arg9[%c0_39, %c256_40] : memref<288x384xbf16, #tpu.memory_space<vmem>>, vector<256x128xbf16>
    tpu.vector_store %arg9[%c0_39, %c256_40], %48 {strides = array<i32>} : memref<288x384xbf16, #tpu.memory_space<vmem>>, vector<256x128xbf16>,
    %c0_41 = arith.constant 0 : index
    %c0_42 = arith.constant 0 : index
    %52 = vector.load %arg9[%c0_41, %c0_42] : memref<288x384xbf16, #tpu.memory_space<vmem>>, vector<256x384xbf16>
    %c0_43 = arith.constant 0 : index
    %c0_44 = arith.constant 0 : index
    %c0_45 = arith.constant 0 : index
    %53 = vector.load %arg6[%c0_43, %c0_44, %c0_45] : memref<3x384x128xbf16, #tpu.memory_space<vmem>>, vector<1x384x128xbf16>
    %54 = vector.shape_cast %53 : vector<1x384x128xbf16> to vector<384x128xbf16>
    %cst_46 = arith.constant dense<0.000000e+00> : vector<256x128xf32>
    %55 = tpu.matmul %52, %54, %cst_46 {dimension_numbers = #tpu.dot_dimension_numbers<[1], [0], [0], [1], [0, 0, 1, 1], [], []>} : vector<256x384xbf16>, vector<384x128xbf16>, vector<256x128xf32> -> vector<256x128xf32>
    %c16_47 = arith.constant 16 : index
    %c0_48 = arith.constant 0 : index
    %56 = vector.load %arg9[%c16_47, %c0_48] : memref<288x384xbf16, #tpu.memory_space<vmem>>, vector<256x384xbf16>
    %c1_49 = arith.constant 1 : index
    %c0_50 = arith.constant 0 : index
    %c0_51 = arith.constant 0 : index
    %57 = vector.load %arg6[%c1_49, %c0_50, %c0_51] : memref<3x384x128xbf16, #tpu.memory_space<vmem>>, vector<1x384x128xbf16>
    %58 = vector.shape_cast %57 : vector<1x384x128xbf16> to vector<384x128xbf16>
    %cst_52 = arith.constant dense<0.000000e+00> : vector<256x128xf32>
    %59 = tpu.matmul %56, %58, %cst_52 {dimension_numbers = #tpu.dot_dimension_numbers<[1], [0], [0], [1], [0, 0, 1, 1], [], []>} : vector<256x384xbf16>, vector<384x128xbf16>, vector<256x128xf32> -> vector<256x128xf32>
    %60 = arith.addf %55, %59 : vector<256x128xf32>
    %c32_53 = arith.constant 32 : index
    %c0_54 = arith.constant 0 : index
    %61 = vector.load %arg9[%c32_53, %c0_54] : memref<288x384xbf16, #tpu.memory_space<vmem>>, vector<256x384xbf16>
    %c2_55 = arith.constant 2 : index
    %c0_56 = arith.constant 0 : index
    %c0_57 = arith.constant 0 : index
    %62 = vector.load %arg6[%c2_55, %c0_56, %c0_57] : memref<3x384x128xbf16, #tpu.memory_space<vmem>>, vector<1x384x128xbf16>
    %63 = vector.shape_cast %62 : vector<1x384x128xbf16> to vector<384x128xbf16>
    %cst_58 = arith.constant dense<0.000000e+00> : vector<256x128xf32>
    %64 = tpu.matmul %61, %63, %cst_58 {dimension_numbers = #tpu.dot_dimension_numbers<[1], [0], [0], [1], [0, 0, 1, 1], [], []>} : vector<256x384xbf16>, vector<384x128xbf16>, vector<256x128xf32> -> vector<256x128xf32>
    %65 = arith.addf %60, %64 : vector<256x128xf32>
    %c0_59 = arith.constant 0 : index
    %c0_60 = arith.constant 0 : index
    %66 = vector.load %arg7[%c0_59, %c0_60] : memref<1x128xf32, #tpu.memory_space<vmem>>, vector<1x128xf32>
    %67 = vector.broadcast %66 : vector<1x128xf32> to vector<256x128xf32>
    %68 = arith.addf %65, %67 : vector<256x128xf32>
    %cst_61 = arith.constant 0.000000e+00 : f32
    %69 = vector.broadcast %cst_61 : f32 to vector<256x128xf32>
    %70 = arith.cmpf oge, %68, %69 : vector<256x128xf32>
    %cst_62 = arith.constant 2.000000e-01 : f32
    %71 = vector.broadcast %cst_62 : f32 to vector<256x128xf32>
    %72 = arith.mulf %71, %68 : vector<256x128xf32>
    %73 = arith.select %70, %68, %72 : vector<256x128xi1>, vector<256x128xf32>
    %74 = vector.extract_strided_slice %73 {offsets = [0, 0], sizes = [192, 128], strides = [1, 1]} : vector<256x128xf32> to vector<192x128xf32>
    %c0_63 = arith.constant 0 : index
    %c0_64 = arith.constant 0 : index
    %c0_65 = arith.constant 0 : index
    %75 = vector.load %arg8[%c0_63, %c0_64, %c0_65] : memref<1x192x128xf32, #tpu.memory_space<vmem>>, vector<1x192x128xf32>
    %76 = vector.shape_cast %75 : vector<1x192x128xf32> to vector<192x128xf32>
    %77 = vector.shape_cast %74 : vector<192x128xf32> to vector<1x192x128xf32>
    tpu.vector_store %arg8[%c0_63, %c0_64, %c0_65], %77 {strides = array<i32>} : memref<1x192x128xf32, #tpu.memory_space<vmem>>, vector<1x192x128xf32>,
    return
  }
  func.func @transform_0(%arg0: i32) -> (i32, i32, i32) {
    %c0_i32 = arith.constant 0 : i32
    %c0_i32_0 = arith.constant 0 : i32
    %c0_i32_1 = arith.constant 0 : i32
    return %arg0, %c0_i32, %c0_i32_0 : i32, i32, i32
  }
  func.func @transform_1(%arg0: i32) -> (i32, i32) {
    %c0_i32 = arith.constant 0 : i32
    %c0_i32_0 = arith.constant 0 : i32
    %c0_i32_1 = arith.constant 0 : i32
    return %c0_i32, %c0_i32_0 : i32, i32
  }
  func.func @transform_2(%arg0: i32) -> (i32, i32) {
    %c0_i32 = arith.constant 0 : i32
    %c0_i32_0 = arith.constant 0 : i32
    %c0_i32_1 = arith.constant 0 : i32
    return %c0_i32, %c0_i32_0 : i32, i32
  }
  func.func @transform_3(%arg0: i32) -> (i32, i32, i32) {
    %c0_i32 = arith.constant 0 : i32
    %c0_i32_0 = arith.constant 0 : i32
    %c0_i32_1 = arith.constant 0 : i32
    %c0_i32_2 = arith.constant 0 : i32
    return %c0_i32, %c0_i32_0, %c0_i32_1 : i32, i32, i32
  }
  func.func @transform_4(%arg0: i32) -> (i32, i32) {
    %c0_i32 = arith.constant 0 : i32
    %c0_i32_0 = arith.constant 0 : i32
    %c0_i32_1 = arith.constant 0 : i32
    return %c0_i32, %c0_i32_0 : i32, i32
  }
  func.func @transform_5(%arg0: i32) -> (i32, i32, i32) {
    %c0_i32 = arith.constant 0 : i32
    %c0_i32_0 = arith.constant 0 : i32
    %c0_i32_1 = arith.constant 0 : i32
    %c0_i32_2 = arith.constant 0 : i32
    return %c0_i32, %c0_i32_0, %c0_i32_1 : i32, i32, i32
  }
  func.func @transform_6(%arg0: i32) -> (i32, i32) {
    %c0_i32 = arith.constant 0 : i32
    %c0_i32_0 = arith.constant 0 : i32
    %c0_i32_1 = arith.constant 0 : i32
    return %c0_i32, %c0_i32_0 : i32, i32
  }
  func.func @transform_7(%arg0: i32) -> (i32, i32, i32) {
    %c0_i32 = arith.constant 0 : i32
    %c0_i32_0 = arith.constant 0 : i32
    %c0_i32_1 = arith.constant 0 : i32
    return %arg0, %c0_i32, %c0_i32_0 : i32, i32, i32
  }
}

</mosaic_0001>

<bundles_post_ra>
// kernel: forward.1
= control target key start
LH: loop header
LB: loop body
LE: loop exit
PB: predicated region body
PF: predicated region fallthrough
CT: control target
= control target key end

     0   :  { %12 = vsyncpa [#allocation4], 0  ;;  %s6814_s24 = smov 0   ;;  %s8798_s0 = inlined_call_operand.vmem [shape: bf16[2,256,8], index: 0, kind: input, shape index: {}]   ;;  %s8799_s1 = inlined_call_operand.vmem [shape: bf16[8,128], index: 1, kind: input, shape index: {}]   ;;  %s8800_s2 = inlined_call_operand.vmem [shape: f32[1,128], index: 2, kind: input, shape index: {}, may-alias: {2,4,6}]   ;;  %s8801_s3 = inlined_call_operand.hbm [shape: bf16[3,384,128], index: 3, kind: input, shape index: {}]   ;;  %s8802_s4 = inlined_call_operand.vmem [shape: f32[1,128], index: 4, kind: input, shape index: {}, may-alias: {2,4,6}]   ;;  %s8803_s5 = inlined_call_operand.vmem [shape: bf16[3,384,128], index: 5, kind: input, shape index: {}]   ;;  %s8804_s6 = inlined_call_operand.vmem [shape: f32[1,128], index: 6, kind: input, shape index: {}, may-alias: {2,4,6}]   ;;  %s8805_s7 = inlined_call_operand.vmem [shape: f32[2,192,128], index: 7, kind: output, shape index: {}]  }
   0x1 LB: > { %s6820_s25 = sadd.s32 4294967295, %s6768_s24   ;;  %p4808_p0 = scmp.ge.s32.totalorder %s6768_s24, 1  ;;  %s6768_s24 = sphi %s6814_s24, %s18_s24  }
   0x2   : > { %p201_p1 = scmp.lt.s32.totalorder %s6768_s24, 3  ;;  %s6770_s26 = smov [#allocation3]  }
   0x3   : > { %s219_s27 = sshll.u32 %s6770_s26, 4  ;;  %p8806_p3 = scmp.eq.s32.totalorder %s6820_s25, 0  ;;  %s220_s27 = int_to_ptr.vmem [resolvable:$true] %s219_s27 }
   0x4   : > { %p6824_p2 = pnand %p4808_p0, %p201_p1  ;;  %s6730_s9 = scalar_lea.hbm %s8801_s3, 9216 }
   0x5   : > { %p6731_p6 = scmp.ne.s32.totalorder %s8801_s3, %s6730_s9  ;;  %p6737_p10 = scmp.lt.u32.totalorder %s6730_s9, %s8801_s3 }
   0x6   : > { %s8838_s28 = scalar_select %p6824_p2, 1, 0 }
   0x7   : > { %p6551_p4 = pneg %p6824_p2 }
   0x9   : > { %p6833_p5 = pnand %p8806_p3, %p6551_p4 }
   0xb   : > { %p6732_p7 = pneg %p6833_p5 }
   0xd   : > { %p6733_p8 = pnand %p6732_p7, %p6731_p6 }
   0xf   : > { %p6734_p9 = pneg %p6733_p8 }
  0x11   : > { %p6739_p11 = pnand %p6737_p10, %p6734_p9 }
  0x13   : > { %6742 = shalt.err (!%p6739_p11)
}
  0x14   : > { %s6743_s14 = scalar_lea.vmem %s220_s27, 9216  ;;  %p6751_p1 = scmp.lt.s32.totalorder %s220_s27, %s220_s27 }
  0x15   : > { %p6744_p12 = scmp.ne.s32.totalorder %s220_s27, %s6743_s14  ;;  %p6752_p4 = scmp.lt.s32.totalorder %s6743_s14, %s6743_s14 }
  0x17   : > { %p6746_p13 = pnand %p6744_p12, %p6732_p7  ;;  %p6753_p3 = por %p6752_p4, %p6751_p1 }
  0x19   : > { %p6747_p0 = pneg %p6746_p13 }
  0x1b   : > { %p6754_p2 = pnand %p6753_p3, %p6747_p0 }
  0x1d   : > { %6757 = shalt.err (!%p6754_p2)
}
  0x1e   : > { %s6771_s15 = smov 64   ;;  %s6772_s16 = smov 4  }
  0x1f   : > { %6554 = dma.hbm_to_vmem [thread:$0]  (!%p6833_p5), %s8801_s3, 9216, %s220_s27, [#allocation4], %s6771_s15, %s6771_s15, %s6772_s16  }
  0x20   : > { %p8840_p6 = scmp.ne.s32.totalorder %s8838_s28, 0 }
  0x22   : > { %252 = sbr.rel (%p8840_p6) target bundleno = 1320 (0x528), region = 48 }
  0x29   : > { %p8841_p8 = scmp.eq.s32.totalorder %s6820_s25, 0 }
  0x2b   : > { %6763 = dma.done.wait (%p8841_p8), [#allocation4], 9216   ;;  %p8842_p7 = pmov %p8841_p8 }
  0x2c   : > { %p284_p2 = scmp.lt.s32.totalorder %s6820_s25, 1  ;;  %vm470_vm0 = vcmask 1043456   ;;  %vm421_vm1 = vcmask 64512   ;;  %v333_v0 = vld [vmem:[%s8799_s1] sm:$0xf]  ;;  %v6588_v12 = vld [vmem:[#allocation3 + $0x108] sm:$0xff]   ;;  %v779_v44 = vlaneseq }
  0x2d   : > { %6765 = vsyncadd (%p8842_p7), [#allocation4], 4294958080  ;;  %6545 = vmatprep.subr.msk.bf16.mxu0 %vm470_vm0, %v333_v0  ;;  %v472_v1 = vsel %vm470_vm0, %v333_v0, 0  ;;  %v6585_v9 = vld [vmem:[#allocation3 + $0x100] sm:$0xff]   ;;  %v6589_v13 = vld [vmem:[#allocation3 + $0xc8] sm:$0xff]  }
  0x2e   : > { %s8932_s25 = smov (!%p284_p2, %s6820_s25), 1  ;;  %5928 = vmatpush3.bf16.msra.mxu0 %v472_v1  ;;  %v6586_v10 = vld [vmem:[#allocation3 + $0xc0] sm:$0xff]   ;;  %5111 = vmatprep.subr.bf16.mxu1 %v6585_v9  ;;  %v6590_v14 = vld [vmem:[#allocation3 + $0x148] sm:$0xff]   ;;  %v6591_v16 = vld [vmem:[#allocation3 + $0x110] sm:$0xff]   ;;  %v6911_v50 = vshrl.u32 %v779_v44, 7 }
  0x2f   : > { %s5093_s19 = sshll.u32 %s8932_s25, 7  ;;  %v6587_v11 = vld [vmem:[#allocation3 + $0x140] sm:$0xff]   ;;  %5112 = vmatpush3.bf16.msra.mxu1 %v6586_v10  ;;  %v6592_v18 = vld [vmem:[#allocation3 + $0xd0] sm:$0xff]   ;;  %v6594_v27 = vld [vmem:[#allocation3 + $0x118] sm:$0xff]   ;;  %s6546_s9 = smul.u32 192, %s8932_s25 }
  0x30   : > { %s6867_s22 = scalar_lea.vmem %s8798_s0, %s5093_s19  ;;  %5961 = vmatprep.subr.bf16.mxu0 %v6587_v11  ;;  %5113 = vmatprep.subr.bf16.mxu1 %v6588_v12  ;;  %v6593_v19 = vld [vmem:[#allocation3 + $0x150] sm:$0xff]   ;;  %v6595_v28 = vld [vmem:[#allocation3 + $0xd8] sm:$0xff]   ;;  %v6597_v30 = vld [vmem:[#allocation3 + $0x120] sm:$0xff]   ;;  %vm862_vm6 = vcmp.lt.s32.totalorder %v6911_v50, 6  ;;  %vm781_vm7 = vcmp.lt.s32.totalorder %v6911_v50, 7 }
  0x31   : > { %v6569_v2 = vld [vmem:[%s6867_s22] sm:$0xff]   ;;  %v6570_v3 = vld [vmem:[%s6867_s22 + $0x8] sm:$0xff]   ;;  %v6571_v4 = vld [vmem:[%s6867_s22 + $0x10] sm:$0xff]   ;;  %s8727_s12 = scalar_lea.vmem %s8805_s7, %s6546_s9 }
  0x32   : > { %5929 = vmatprep.mubr.msk.bf16.mxu0 %vm421_vm1, %v6569_v2  ;;  %v6572_v5 = vld [vmem:[%s6867_s22 + $0x18] sm:$0xff]   ;;  %v6573_v6 = vld [vmem:[%s6867_s22 + $0x20] sm:$0xff]   ;;  %v6574_v7 = vld [vmem:[%s6867_s22 + $0x28] sm:$0xff]  }
  0x33   : > { %5930 = vmatmul.mubr.msk.bf16.vlgmr.msra.gmra.mrb[0].mxu0 %vm421_vm1, %v6570_v3  ;;  %v6575_v8 = vld [vmem:[%s6867_s22 + $0x30] sm:$0xff]   ;;  %v6576_v15 = vld [vmem:[%s6867_s22 + $0x38] sm:$0xff]   ;;  %v6577_v17 = vld [vmem:[%s6867_s22 + $0x40] sm:$0xff]   ;;  %5114 = vmatpush3.bf16.msra.mxu1 %v6589_v13 }
  0x34   : > { %5933 = vmatprep.mubr.msk.bf16.mxu0 %vm421_vm1, %v6571_v4  ;;  %5962 = vmatpush3.bf16.msra.mxu0 %v6587_v11  ;;  %v6578_v20 = vld [vmem:[%s6867_s22 + $0x48] sm:$0xff]   ;;  %v6579_v21 = vld [vmem:[%s6867_s22 + $0x50] sm:$0xff]   ;;  %v6580_v22 = vld [vmem:[%s6867_s22 + $0x58] sm:$0xff]  }
  0x35   : > { %5963 = vmatprep.subr.bf16.mxu0 %v6590_v14  ;;  %5115 = vmatprep.subr.bf16.mxu1 %v6591_v16  ;;  %v6581_v23 = vld [vmem:[%s6867_s22 + $0x60] sm:$0xff]   ;;  %v6582_v24 = vld [vmem:[%s6867_s22 + $0x68] sm:$0xff]   ;;  %v6583_v25 = vld [vmem:[%s6867_s22 + $0x70] sm:$0xff]  }
  0x36   : > { %v6584_v26 = vld [vmem:[%s6867_s22 + $0x78] sm:$0xff]   ;;  %v6598_v31 = vld [vmem:[#allocation3 + $0xe0] sm:$0xff]   ;;  %v6600_v33 = vld [vmem:[#allocation3 + $0x128] sm:$0xff]  }
  0x37   : > { %5116 = vmatpush3.bf16.msra.mxu1 %v6592_v18  ;;  %v6596_v29 = vld [vmem:[#allocation3 + $0x158] sm:$0xff]   ;;  %v6599_v32 = vld [vmem:[#allocation3 + $0x160] sm:$0xff]   ;;  %v6601_v34 = vld [vmem:[#allocation3 + $0xe8] sm:$0xff]  }
  0x38   : > { %5964 = vmatpush3.bf16.msra.mxu0 %v6590_v14  ;;  %5117 = vmatprep.subr.bf16.mxu1 %v6594_v27  ;;  %v6602_v35 = vld [vmem:[#allocation3 + $0x168] sm:$0xff]   ;;  %v6603_v36 = vld [vmem:[#allocation3 + $0x130] sm:$0xff]   ;;  %v6606_v39 = vld [vmem:[#allocation3 + $0x138] sm:$0xff]  }
  0x39   : > { %5965 = vmatprep.subr.bf16.mxu0 %v6593_v19  ;;  %v6604_v37 = vld [vmem:[#allocation3 + $0xf0] sm:$0xff]   ;;  %v6607_v40 = vld [vmem:[#allocation3 + $0xf8] sm:$0xff]   ;;  %v6609_v42 = vld [vmem:[#allocation3 + $0x40] sm:$0xff]  }
  0x3a   : > { %v6605_v38 = vld [vmem:[#allocation3 + $0x170] sm:$0xff]   ;;  %v6608_v41 = vld [vmem:[#allocation3 + $0x178] sm:$0xff]   ;;  %v6907_v43 = vld [vmem:[%s8800_s2] ss:$0 sm:$0xff] }
  0x3b   : > { %5934 = vmatmul.mubr.msk.bf16.gmra.mrb[4].mxu0 %vm421_vm1, %v6572_v5  ;;  %5118 = vmatpush3.bf16.msra.mxu1 %v6595_v28  ;;  %v6702_v50 = vld [vmem:[%s8803_s5 + $0x180] sm:$0xff]  }
  0x3c   : > { %5937 = vmatprep.mubr.msk.bf16.mxu0 %vm421_vm1, %v6573_v6  ;;  %5966 = vmatpush3.bf16.msra.mxu0 %v6593_v19 }
  0x3d   : > { %5967 = vmatprep.subr.bf16.mxu0 %v6596_v29  ;;  %5119 = vmatprep.subr.bf16.mxu1 %v6597_v30 }
  0x3f   : > { %5120 = vmatpush3.bf16.msra.mxu1 %v6598_v31 }
  0x40   : > { %5968 = vmatpush3.bf16.msra.mxu0 %v6596_v29  ;;  %5121 = vmatprep.subr.bf16.mxu1 %v6600_v33 }
  0x41   : > { %5969 = vmatprep.subr.bf16.mxu0 %v6599_v32 }
  0x43   : > { %5938 = vmatmul.mubr.msk.bf16.gmra.mrb[8].mxu0 %vm421_vm1, %v6574_v7  ;;  %5122 = vmatpush3.bf16.msra.mxu1 %v6601_v34 }
  0x44   : > { %5941 = vmatprep.mubr.msk.bf16.mxu0 %vm421_vm1, %v6575_v8  ;;  %5970 = vmatpush3.bf16.msra.mxu0 %v6599_v32 }
  0x45   : > { %5971 = vmatprep.subr.bf16.mxu0 %v6602_v35  ;;  %5123 = vmatprep.subr.bf16.mxu1 %v6603_v36 }
  0x47   : > { %5124 = vmatpush3.bf16.msra.mxu1 %v6604_v37 }
  0x48   : > { %5972 = vmatpush3.bf16.msra.mxu0 %v6602_v35  ;;  %5125 = vmatprep.subr.bf16.mxu1 %v6606_v39 }
  0x49   : > { %5973 = vmatprep.subr.bf16.mxu0 %v6605_v38 }
  0x4b   : > { %5942 = vmatmul.mubr.msk.bf16.gmra.mrb[12].mxu0 %vm421_vm1, %v6576_v15  ;;  %5126 = vmatpush3.bf16.msra.mxu1 %v6607_v40 }
  0x4c   : > { %5945 = vmatprep.mubr.msk.bf16.mxu0 %vm421_vm1, %v6577_v17  ;;  %5974 = vmatpush3.bf16.msra.mxu0 %v6605_v38 }
  0x4d   : > { %5975 = vmatprep.subr.bf16.mxu0 %v6608_v41  ;;  %6249 = vmatprep.subr.bf16.mxu1 %v6609_v42 }
  0x50   : > { %5976 = vmatpush3.bf16.msra.mxu0 %v6608_v41 }
  0x51   : > { %5247 = vmatprep.subr.bf16.mxu0 %v6609_v42 }
  0x53   : > { %5946 = vmatmul.mubr.msk.bf16.gmra.mrb[16].mxu0 %vm421_vm1, %v6578_v20 }
  0x54   : > { %5949 = vmatprep.mubr.msk.bf16.mxu0 %vm421_vm1, %v6579_v21 }
  0x5b   : > { %5950 = vmatmul.mubr.msk.bf16.gmra.mrb[20].mxu0 %vm421_vm1, %v6580_v22 }
  0x5c   : > { %5953 = vmatprep.mubr.msk.bf16.mxu0 %vm421_vm1, %v6581_v23 }
  0x63   : > { %5954 = vmatmul.mubr.msk.bf16.gmra.mrb[24].mxu0 %vm421_vm1, %v6582_v24 }
  0x64   : > { %5957 = vmatprep.mubr.msk.bf16.mxu0 %vm421_vm1, %v6583_v25 }
  0x6b   : > { %5958 = vmatmul.mubr.msk.bf16.gmra.mrb[28].mxu0 %vm421_vm1, %v6584_v26 }
 0x106   : > { %v5931_v45 = vpop.f32.mrb[0].mxu0 }
 0x107   : > { %v517_v46 = vadd.f32 %v5931_v45, %v6907_v43  ;;  %v508_v47 = vpop.f32.mrb[1].mxu0 }
 0x108   : > { %v509_v48 = vadd.f32 %v6907_v43, %v508_v47  ;;  %v5932_v49 = vpop.f32.mrb[2].mxu0 }
 0x109   : > { %vm637_vm2 = vcmp.ge.f32.partialorder %v517_v46, 0.0  ;;  %v669_v51 = vmul.f32 0.2, %v517_v46  ;;  %v520_v52 = vadd.f32 %v5932_v49, %v6907_v43  ;;  %v511_v53 = vpop.f32.mrb[3].mxu0 }
 0x10a   : > { %vm635_vm3 = vcmp.ge.f32.partialorder %v509_v48, 0.0  ;;  %v667_v54 = vmul.f32 0.2, %v509_v48  ;;  %v512_v55 = vadd.f32 %v6907_v43, %v511_v53 }
 0x10b   : > { %v701_v56 = vsel %vm637_vm2, %v517_v46, %v669_v51  ;;  %vm638_vm4 = vcmp.ge.f32.partialorder %v520_v52, 0.0  ;;  %v670_v57 = vmul.f32 0.2, %v520_v52 }
 0x10c   : > { %v6915_v58 = vsel %vm635_vm3, %v509_v48, %v667_v54  ;;  %vm636_vm5 = vcmp.ge.f32.partialorder %v512_v55, 0.0  ;;  %v668_v59 = vmul.f32 0.2, %v512_v55  ;;  %v832_v60 = vrot.slane %v701_v56, 2  ;;  %v6610_v54 = vld [vmem:[#allocation3] sm:$0xff]  }
 0x10d   : > { %v702_v61 = vsel %vm638_vm4, %v520_v52, %v670_v57  ;;  %v749_v62 = vrot.slane %v701_v56, 1  ;;  %v8809_v4 = vrot.slane %v6915_v58, 1 }
 0x10e   : > { %v833_v63 = vrot.slane %v702_v61, 2  ;;  %v6919_v0 = vsel %vm636_vm5, %v512_v55, %v668_v59  ;;  %v5935_v1 = vpop.f32.mrb[4].mxu0  ;;  %v750_v2 = vrot.slane %v702_v61, 1  ;;  %v6921_v3 = vpack.c.bf16 %v702_v61, %v701_v56  ;;  %v6611_v59 = vld [vmem:[#allocation3 + $0x48] sm:$0xff]  }
 0x10f   : > { %v748_v6 = vrot.slane %v6919_v0, 1  ;;  %v533_v7 = vadd.f32 %v5935_v1, %v6907_v43  ;;  %v524_v8 = vpop.f32.mrb[5].mxu0  ;;  %v8808_v9 = vrot.slane %v6919_v0, 2 }
 0x110   : > { %v525_v10 = vadd.f32 %v6907_v43, %v524_v8  ;;  %v5936_v11 = vpop.f32.mrb[6].mxu0  ;;  %v810_v12 = vsel %vm781_vm7, %v749_v62, %v750_v2  ;;  %v891_v13 = vsel %vm862_vm6, %v832_v60, %v833_v63 }
 0x111   : > { %vm641_vm8 = vcmp.ge.f32.partialorder %v533_v7, 0.0  ;;  %v673_v14 = vmul.f32 0.2, %v533_v7  ;;  %v536_v15 = vadd.f32 %v5936_v11, %v6907_v43  ;;  %v527_v16 = vpop.f32.mrb[7].mxu0  ;;  %v6937_v17 = vsel %vm781_vm7, %v748_v6, %v749_v62 }
 0x112   : > { %vm639_vm9 = vcmp.ge.f32.partialorder %v525_v10, 0.0  ;;  %v671_v18 = vmul.f32 0.2, %v525_v10  ;;  %v528_v19 = vadd.f32 %v6907_v43, %v527_v16  ;;  %v6944_v20 = vsel %vm781_vm7, %v8809_v4, %v748_v6 }
 0x113   : > { %v6946_v21 = vsel %vm641_vm8, %v533_v7, %v673_v14  ;;  %vm642_vm10 = vcmp.ge.f32.partialorder %v536_v15, 0.0  ;;  %v674_v22 = vmul.f32 0.2, %v536_v15  ;;  %v6967_v34 = vsel %vm862_vm6, %v8808_v9, %v832_v60 }
 0x114   : > { %v6951_v25 = vsel %vm639_vm9, %v525_v10, %v671_v18  ;;  %vm640_vm11 = vcmp.ge.f32.partialorder %v528_v19, 0.0  ;;  %v672_v28 = vmul.f32 0.2, %v528_v19  ;;  %v753_v30 = vrot.slane %v6946_v21, 1 }
 0x115   : > { %v834_v26 = vrot.slane %v6951_v25, 2  ;;  %v6954_v27 = vsel %vm642_vm10, %v536_v15, %v674_v22  ;;  %v751_v29 = vrot.slane %v6951_v25, 1  ;;  %v836_v31 = vrot.slane %v6946_v21, 2 }
 0x116   : > { %v5939_v32 = vpop.f32.mrb[8].mxu0  ;;  %v6961_v33 = vpack.c.bf16 %v6954_v27, %v6946_v21  ;;  %v704_v35 = vsel %vm640_vm11, %v528_v19, %v672_v28  ;;  %v754_v60 = vrot.slane %v6954_v27, 1  ;;  %v837_v61 = vrot.slane %v6954_v27, 2 }
 0x117   : > { %v549_v36 = vadd.f32 %v5939_v32, %v6907_v43  ;;  %v540_v37 = vpop.f32.mrb[9].mxu0  ;;  %v809_v38 = vsel %vm781_vm7, %v750_v2, %v751_v29  ;;  %v890_v39 = vsel %vm862_vm6, %v833_v63, %v834_v26  ;;  %v752_v40 = vrot.slane %v704_v35, 1  ;;  %v6613_v32 = vld [vmem:[#allocation3 + $0x50] sm:$0xff]  }
 0x118   : > { %v835_v41 = vrot.slane %v704_v35, 2  ;;  %v541_v42 = vadd.f32 %v6907_v43, %v540_v37  ;;  %v5940_v44 = vpop.f32.mrb[10].mxu0  ;;  %v6975_v45 = vpack.c.bf16 %v809_v38, %v810_v12  ;;  %v6978_v49 = vpack.c.bf16 %v890_v39, %v891_v13  ;;  %v6612_v13 = vld [vmem:[#allocation3 + $0x8] sm:$0xff]  }
 0x119   : > { %vm645_vm12 = vcmp.ge.f32.partialorder %v549_v36, 0.0  ;;  %v677_v46 = vmul.f32 0.2, %v549_v36  ;;  %v552_v47 = vadd.f32 %v5940_v44, %v6907_v43  ;;  %v543_v48 = vpop.f32.mrb[11].mxu0  ;;  %v807_v63 = vsel %vm781_vm7, %v752_v40, %v753_v30 }
 0x11a   : > { %v888_v51 = vsel %vm862_vm6, %v835_v41, %v836_v31  ;;  %v889_v52 = vsel %vm862_vm6, %v834_v26, %v835_v41  ;;  %vm643_vm13 = vcmp.ge.f32.partialorder %v541_v42, 0.0  ;;  %v675_v53 = vmul.f32 0.2, %v541_v42  ;;  %1283 = vmatprep.mubr.bf16.mxu1 %v6975_v45  ;;  %5977 = vmatprep.mubr.bf16.mxu0 %v6978_v49 }
 0x11b   : > { %v6985_v55 = vsel %vm645_vm12, %v549_v36, %v677_v46  ;;  %vm646_vm14 = vcmp.ge.f32.partialorder %v552_v47, 0.0  ;;  %v678_v56 = vmul.f32 0.2, %v552_v47  ;;  %v544_v57 = vadd.f32 %v6907_v43, %v543_v48  ;;  %1284 = vmatmul.mubr.bf16.vlgmr.msra.gmra.mrb[0].mxu1 %v6921_v3 }
 0x11c   : > { %v6992_v62 = vsel %vm643_vm13, %v541_v42, %v675_v53  ;;  %6257 = vmatpush3.bf16.msra.mxu1 %v6610_v54  ;;  %v757_v1 = vrot.slane %v6985_v55, 1  ;;  %v840_v2 = vrot.slane %v6985_v55, 2  ;;  %v808_v11 = vsel %vm781_vm7, %v751_v29, %v752_v40 }
 0x11d   : > { %v838_v6 = vrot.slane %v6992_v62, 2  ;;  %vm644_vm15 = vcmp.ge.f32.partialorder %v544_v57, 0.0  ;;  %6250 = vmatprep.subr.bf16.mxu1 %v6611_v59  ;;  %v755_v7 = vrot.slane %v6992_v62, 1  ;;  %v7003_v8 = vsel %vm646_vm14, %v552_v47, %v678_v56  ;;  %v6615_v47 = vld [vmem:[#allocation3 + $0x58] sm:$0xff]  }
 0x11e   : > { %v676_v10 = vmul.f32 0.2, %v544_v57  ;;  %v5943_v12 = vpop.f32.mrb[12].mxu0  ;;  %v7007_v14 = vpack.c.bf16 %v807_v63, %v808_v11  ;;  %v7009_v15 = vpack.c.bf16 %v888_v51, %v889_v52  ;;  %v887_v28 = vsel %vm862_vm6, %v836_v31, %v837_v61 }
 0x11f   : > { %v565_v16 = vadd.f32 %v5943_v12, %v6907_v43  ;;  %v556_v18 = vpop.f32.mrb[13].mxu0  ;;  %v886_v19 = vsel %vm862_vm6, %v837_v61, %v838_v6  ;;  %v7020_v29 = vpack.c.bf16 %v704_v35, %v6951_v25  ;;  %v758_v36 = vrot.slane %v7003_v8, 1  ;;  %v6614_v35 = vld [vmem:[#allocation3 + $0x10] sm:$0xff]   ;;  %v6616_v61 = vld [vmem:[#allocation3 + $0x18] sm:$0xff]  }
 0x120   : > { %v7014_v22 = vsel %vm644_vm15, %v544_v57, %v676_v10  ;;  %v557_v26 = vadd.f32 %v6907_v43, %v556_v18  ;;  %v5944_v27 = vpop.f32.mrb[14].mxu0  ;;  %6258 = vmatpush3.bf16.msra.mxu1 %v6612_v13  ;;  %1291 = vmatprep.mubr.bf16.mxu1 %v7007_v14  ;;  %v7030_v42 = vpack.c.bf16 %v886_v19, %v887_v28  ;;  %v841_v48 = vrot.slane %v7003_v8, 2  ;;  %v6617_v18 = vld [vmem:[#allocation3 + $0x60] sm:$0xff]  }
 0x121   : > { %v839_v37 = vrot.slane %v7014_v22, 2  ;;  %5978 = vmatmul.mubr.bf16.vlgmr.msra.gmra.mrb[32].mxu0 %v7009_v15  ;;  %vm649_vm0 = vcmp.ge.f32.partialorder %v565_v16, 0.0  ;;  %v681_v38 = vmul.f32 0.2, %v565_v16  ;;  %v559_v39 = vpop.f32.mrb[15].mxu0  ;;  %v568_v31 = vadd.f32 %v5944_v27, %v6907_v43  ;;  %6251 = vmatprep.subr.bf16.mxu1 %v6613_v32 }
 0x122   : > { %vm647_vm1 = vcmp.ge.f32.partialorder %v557_v26, 0.0  ;;  %v679_v40 = vmul.f32 0.2, %v557_v26  ;;  %v560_v25 = vadd.f32 %v6907_v43, %v559_v39  ;;  %5248 = vmatpush3.bf16.msra.mxu0 %v6610_v54  ;;  %v805_v44 = vsel %vm781_vm7, %v754_v60, %v755_v7  ;;  %5981 = vmatprep.mubr.bf16.mxu0 %v7030_v42 }
 0x123   : > { %v7028_v41 = vsel %vm649_vm0, %v565_v16, %v681_v38  ;;  %1292 = vmatmul.mubr.bf16.gmra.mrb[4].mxu1 %v7020_v29  ;;  %v806_v46 = vsel %vm781_vm7, %v753_v30, %v754_v60  ;;  %v756_v51 = vrot.slane %v7014_v22, 1  ;;  %5249 = vmatprep.subr.bf16.mxu0 %v6611_v59  ;;  %vm650_vm2 = vcmp.ge.f32.partialorder %v568_v31, 0.0 }
 0x124   : > { %v8810_v52 = vrot.slane %v7028_v41, 1  ;;  %v7045_v53 = vsel %vm647_vm1, %v557_v26, %v679_v40  ;;  %6259 = vmatpush3.bf16.msra.mxu1 %v6614_v35  ;;  %v682_v56 = vmul.f32 0.2, %v568_v31  ;;  %vm648_vm3 = vcmp.ge.f32.partialorder %v560_v25, 0.0 }
 0x125   : > { %v842_v54 = vrot.slane %v7045_v53, 2  ;;  %6252 = vmatprep.subr.bf16.mxu1 %v6615_v47  ;;  %v680_v21 = vmul.f32 0.2, %v560_v25  ;;  %v7049_v30 = vpack.c.bf16 %v805_v44, %v806_v46  ;;  %v884_v57 = vsel %vm862_vm6, %v839_v37, %v840_v2 }
 0x126   : > { %v885_v60 = vsel %vm862_vm6, %v838_v6, %v839_v37  ;;  %v5947_v59 = vpop.f32.mrb[16].mxu0  ;;  %5250 = vmatpush3.bf16.msra.mxu0 %v6612_v13  ;;  %v844_v63 = vrot.slane %v7028_v41, 2  ;;  %v759_v19 = vrot.slane %v7045_v53, 1  ;;  %v7067_v6 = vsel %vm650_vm2, %v568_v31, %v682_v56 }
 0x127   : > { %v7058_v10 = vpack.c.bf16 %v884_v57, %v885_v60  ;;  %v581_v11 = vadd.f32 %v5947_v59, %v6907_v43  ;;  %v572_v12 = vpop.f32.mrb[17].mxu0  ;;  %v882_v16 = vsel %vm862_vm6, %v841_v48, %v842_v54  ;;  %5251 = vmatprep.subr.bf16.mxu0 %v6613_v32  ;;  %v7070_v13 = vsel %vm648_vm3, %v560_v25, %v680_v21  ;;  %v6618_v25 = vld [vmem:[#allocation3 + $0x20] sm:$0xff]   ;;  %v6619_v21 = vld [vmem:[#allocation3 + $0x68] sm:$0xff]  }
 0x128   : > { %1299 = vmatprep.mubr.bf16.mxu1 %v7049_v30  ;;  %v573_v26 = vadd.f32 %v6907_v43, %v572_v12  ;;  %v5948_v27 = vpop.f32.mrb[18].mxu0  ;;  %6260 = vmatpush3.bf16.msra.mxu1 %v6616_v61  ;;  %v843_v37 = vrot.slane %v7070_v13, 2  ;;  %v883_v46 = vsel %vm862_vm6, %v840_v2, %v841_v48  ;;  %v803_v56 = vsel %vm781_vm7, %v756_v51, %v757_v1 }
 0x129   : > { %5982 = vmatmul.mubr.bf16.gmra.mrb[36].mxu0 %v7058_v10  ;;  %vm653_vm4 = vcmp.ge.f32.partialorder %v581_v11, 0.0  ;;  %v685_v32 = vmul.f32 0.2, %v581_v11  ;;  %v575_v38 = vpop.f32.mrb[19].mxu0  ;;  %6253 = vmatprep.subr.bf16.mxu1 %v6617_v18  ;;  %v584_v40 = vadd.f32 %v5948_v27, %v6907_v43  ;;  %v845_v57 = vrot.slane %v7067_v6, 2 }
 0x12a   : > { %vm651_vm5 = vcmp.ge.f32.partialorder %v573_v26, 0.0  ;;  %v683_v39 = vmul.f32 0.2, %v573_v26  ;;  %v576_v31 = vadd.f32 %v6907_v43, %v575_v38  ;;  %5252 = vmatpush3.bf16.msra.mxu0 %v6614_v35  ;;  %v804_v35 = vsel %vm781_vm7, %v755_v7, %v756_v51 }
 0x12b   : > { %v7079_v44 = vsel %vm653_vm4, %v581_v11, %v685_v32  ;;  %1300 = vmatmul.mubr.bf16.gmra.mrb[8].mxu1 %v6961_v33  ;;  %v760_v60 = vrot.slane %v7070_v13, 1  ;;  %5253 = vmatprep.subr.bf16.mxu0 %v6615_v47  ;;  %vm654_vm8 = vcmp.ge.f32.partialorder %v584_v40, 0.0  ;;  %v686_v11 = vmul.f32 0.2, %v584_v40 }
 0x12c   : > { %v7097_v2 = vsel %vm651_vm5, %v573_v26, %v683_v39  ;;  %6261 = vmatpush3.bf16.msra.mxu1 %v6618_v25  ;;  %vm652_vm9 = vcmp.ge.f32.partialorder %v576_v31, 0.0  ;;  %v684_v12 = vmul.f32 0.2, %v576_v31  ;;  %v7100_v27 = vpack.c.bf16 %v882_v16, %v883_v46  ;;  %v6620_v46 = vld [vmem:[#allocation3 + $0x28] sm:$0xff]  }
 0x12d   : > { %v846_v48 = vrot.slane %v7097_v2, 2  ;;  %6254 = vmatprep.subr.bf16.mxu1 %v6619_v21  ;;  %v7102_v7 = vpack.c.bf16 %v803_v56, %v804_v35  ;;  %v880_v51 = vsel %vm862_vm6, %v843_v37, %v844_v63  ;;  %v848_v47 = vrot.slane %v7079_v44, 2 }
 0x12e   : > { %8843 = vst [vmem:[#allocation6_spill] sm:$0xff] %v7100_v27  ;;  %v5951_v26 = vpop.f32.mrb[20].mxu0  ;;  %5254 = vmatpush3.bf16.msra.mxu0 %v6616_v61  ;;  %v881_v32 = vsel %vm862_vm6, %v842_v54, %v843_v37  ;;  %v7116_v39 = vpack.c.bf16 %v7014_v22, %v6992_v62  ;;  %v7120_v61 = vsel %vm654_vm8, %v584_v40, %v686_v11 }
 0x12f   : > { %v597_v38 = vadd.f32 %v5951_v26, %v6907_v43  ;;  %v588_v16 = vpop.f32.mrb[21].mxu0  ;;  %5255 = vmatprep.subr.bf16.mxu0 %v6617_v18  ;;  %v7123_v35 = vsel %vm652_vm9, %v576_v31, %v684_v12  ;;  %5985 = vmatprep.mubr.bf16.mxu0 %v7100_v27  ;;  %v7127_v54 = vpack.c.bf16 %v880_v51, %v881_v32  ;;  %v6621_v51 = vld [vmem:[#allocation3 + $0x70] sm:$0xff]   ;;  %v849_v32 = vrot.slane %v7120_v61, 2 }
 0x130   : > { %1307 = vmatprep.mubr.bf16.mxu1 %v7102_v7  ;;  %v5952_v37 = vpop.f32.mrb[22].mxu0  ;;  %v847_v22 = vrot.slane %v7123_v35, 2  ;;  %6262 = vmatpush3.bf16.msra.mxu1 %v6620_v46  ;;  %v589_v40 = vadd.f32 %v6907_v43, %v588_v16  ;;  %v878_v12 = vsel %vm862_vm6, %v845_v57, %v846_v48  ;;  %v879_v5 = vsel %vm862_vm6, %v844_v63, %v845_v57  ;;  %v6623_v57 = vld [vmem:[#allocation3 + $0x78] sm:$0xff]  }
 0x131   : > { %8844 = vst [vmem:[#allocation7_spill] sm:$0xff] %v7127_v54  ;;  %vm657_vm10 = vcmp.ge.f32.partialorder %v597_v38, 0.0  ;;  %v689_v18 = vmul.f32 0.2, %v597_v38  ;;  %v591_v26 = vpop.f32.mrb[23].mxu0  ;;  %5986 = vmatmul.mubr.bf16.gmra.mrb[40].mxu0 %v7127_v54  ;;  %v600_v31 = vadd.f32 %v5952_v37, %v6907_v43  ;;  %v801_v16 = vsel %vm781_vm7, %v758_v36, %v759_v19  ;;  %6255 = vmatprep.subr.bf16.mxu1 %v6621_v51 }
 0x132   : > { %v592_v11 = vadd.f32 %v6907_v43, %v591_v26  ;;  %v802_v37 = vsel %vm781_vm7, %v757_v1, %v758_v36  ;;  %v6622_v26 = vld [vmem:[#allocation3 + $0x30] sm:$0xff]   ;;  %vm655_vm11 = vcmp.ge.f32.partialorder %v589_v40, 0.0  ;;  %v687_v63 = vmul.f32 0.2, %v589_v40  ;;  %5256 = vmatpush3.bf16.msra.mxu0 %v6618_v25 }
 0x133   : > { %1308 = vmatmul.mubr.bf16.gmra.mrb[12].mxu1 %v7116_v39  ;;  %v7159_v9 = vsel %vm657_vm10, %v597_v38, %v689_v18  ;;  %vm658_vm12 = vcmp.ge.f32.partialorder %v600_v31, 0.0  ;;  %v690_v4 = vmul.f32 0.2, %v600_v31  ;;  %5257 = vmatprep.subr.bf16.mxu0 %v6619_v21  ;;  %v7163_v1 = vpack.c.bf16 %v878_v12, %v879_v5 }
 0x134   : > { %vm656_vm13 = vcmp.ge.f32.partialorder %v592_v11, 0.0  ;;  %v688_v62 = vmul.f32 0.2, %v592_v11  ;;  %6263 = vmatpush3.bf16.msra.mxu1 %v6622_v26  ;;  %v7161_v24 = vsel %vm655_vm11, %v589_v40, %v687_v63  ;;  %v7165_v36 = vpack.c.bf16 %v801_v16, %v802_v37  ;;  %v6624_v16 = vld [vmem:[#allocation3 + $0x38] sm:$0xff]  }
 0x135   : > { %8845 = vst [vmem:[#allocation8_spill] sm:$0xff] %v7163_v1  ;;  %v876_v38 = vsel %vm862_vm6, %v847_v22, %v848_v47  ;;  %6256 = vmatprep.subr.bf16.mxu1 %v6623_v57  ;;  %v850_v23 = vrot.slane %v7161_v24, 2  ;;  %v7173_v59 = vsel %vm658_vm12, %v600_v31, %v690_v4  ;;  %v8811_v5 = vrot.slane %v7159_v9, 2  ;;  %5989 = vmatprep.mubr.bf16.mxu0 %v7163_v1 }
 0x136   : > { %v5955_v25 = vpop.f32.mrb[24].mxu0  ;;  %v7175_v21 = vsel %vm656_vm13, %v592_v11, %v688_v62  ;;  %1315 = vmatprep.mubr.bf16.mxu1 %v7165_v36  ;;  %v877_v4 = vsel %vm862_vm6, %v846_v48, %v847_v22  ;;  %5258 = vmatpush3.bf16.msra.mxu0 %v6620_v46  ;;  %v7195_v56 = vpack.c.bf16 %v7003_v8, %v6985_v55  ;;  %v6633_v22 = vld [vmem:[#allocation3 + $0x1c0] sm:$0xff]   ;;  %v8850_v1 = vrot.slane %v7097_v2, 1 }
 0x137   : > { %v604_v40 = vpop.f32.mrb[25].mxu0  ;;  %v851_v37 = vrot.slane %v7175_v21, 2  ;;  %v613_v62 = vadd.f32 %v5955_v25, %v6907_v43  ;;  %v7190_v12 = vpack.c.bf16 %v876_v38, %v877_v4  ;;  %v874_v48 = vsel %vm862_vm6, %v849_v32, %v850_v23  ;;  %5259 = vmatprep.subr.bf16.mxu0 %v6621_v51  ;;  %v7237_v4 = vld [vmem:[#allocation3 + $0x80] sm:$0xff]  }
 0x138   : > { %v5956_v63 = vpop.f32.mrb[26].mxu0  ;;  %v605_v31 = vadd.f32 %v6907_v43, %v604_v40  ;;  %6264 = vmatpush3.bf16.msra.mxu1 %v6624_v16  ;;  %v875_v51 = vsel %vm862_vm6, %v848_v47, %v849_v32  ;;  %v799_v40 = vsel %vm781_vm7, %v760_v60, %v8810_v52 }
 0x139   : > { %v616_v11 = vadd.f32 %v5956_v63, %v6907_v43  ;;  %v607_v18 = vpop.f32.mrb[27].mxu0  ;;  %8846 = vst [vmem:[#allocation9_spill] sm:$0xff] %v7190_v12  ;;  %vm661_vm14 = vcmp.ge.f32.partialorder %v613_v62, 0.0  ;;  %v693_v25 = vmul.f32 0.2, %v613_v62  ;;  %5990 = vmatmul.mubr.bf16.gmra.mrb[44].mxu0 %v7190_v12  ;;  %v853_v63 = vrot.slane %v7173_v59, 2  ;;  %5383 = vmatprep.subr.bf16.mxu1 %v6633_v22 }
 0x13a   : > { %v608_v28 = vadd.f32 %v6907_v43, %v607_v18  ;;  %vm659_vm15 = vcmp.ge.f32.partialorder %v605_v31, 0.0  ;;  %v691_v46 = vmul.f32 0.2, %v605_v31  ;;  %5260 = vmatpush3.bf16.msra.mxu0 %v6622_v26  ;;  %v800_v26 = vsel %vm781_vm7, %v759_v19, %v760_v60 }
 0x13b   : > { %vm662_vm0 = vcmp.ge.f32.partialorder %v616_v11, 0.0  ;;  %v694_v38 = vmul.f32 0.2, %v616_v11  ;;  %1316 = vmatmul.mubr.bf16.gmra.mrb[16].mxu1 %v7195_v56  ;;  %v7203_v55 = vsel %vm661_vm14, %v613_v62, %v693_v25  ;;  %5261 = vmatprep.subr.bf16.mxu0 %v6623_v57  ;;  %v872_v19 = vsel %vm862_vm6, %v851_v37, %v8811_v5 }
 0x13c   : > { %vm660_vm1 = vcmp.ge.f32.partialorder %v608_v28, 0.0  ;;  %v692_v18 = vmul.f32 0.2, %v608_v28  ;;  %v7205_v8 = vsel %vm659_vm15, %v605_v31, %v691_v46  ;;  %v7229_v46 = vpack.c.bf16 %v874_v48, %v875_v51 }
 0x13d   : > { %v854_v31 = vrot.slane %v7205_v8, 2  ;;  %v7224_v47 = vsel %vm662_vm0, %v616_v11, %v694_v38  ;;  %v856_v57 = vrot.slane %v7203_v55, 2  ;;  %v7244_v38 = vpack.c.bf16 %v799_v40, %v800_v26 }
 0x13e   : > { %v5959_v25 = vpop.f32.mrb[28].mxu0  ;;  %v7227_v32 = vsel %vm660_vm1, %v608_v28, %v692_v18  ;;  %8847 = vst [vmem:[#allocation10_spill] sm:$0xff] %v7229_v46  ;;  %5993 = vmatprep.mubr.bf16.mxu0 %v7229_v46  ;;  %v873_v60 = vsel %vm862_vm6, %v850_v23, %v851_v37  ;;  %5262 = vmatpush3.bf16.msra.mxu0 %v6624_v16 }
 0x13f   : > { %v620_v62 = vpop.f32.mrb[29].mxu0  ;;  %v855_v28 = vrot.slane %v7227_v32, 2  ;;  %v629_v18 = vadd.f32 %v5959_v25, %v6907_v43  ;;  %v7253_v11 = vpack.c.bf16 %v872_v19, %v873_v60  ;;  %1323 = vmatprep.mubr.bf16.mxu1 %v7244_v38  ;;  %v7261_v5 = vpack.c.bf16 %v7070_v13, %v7045_v53  ;;  %6009 = vmatprep.subr.bf16.mxu0 %v7237_v4 }
 0x140   : > { %v5960_v48 = vpop.f32.mrb[30].mxu0  ;;  %v621_v22 = vadd.f32 %v6907_v43, %v620_v62  ;;  %v870_v23 = vsel %vm862_vm6, %v853_v63, %v854_v31  ;;  %v8849_v53 = vrot.slane %v7159_v9, 2  ;;  %v857_v25 = vrot.slane %v7224_v47, 2 }
 0x141   : > { %v623_v51 = vpop.f32.mrb[31].mxu0  ;;  %8848 = vst [vmem:[#allocation11_spill] sm:$0xff] %v7253_v11  ;;  %v632_v52 = vadd.f32 %v5960_v48, %v6907_v43  ;;  %vm665_vm2 = vcmp.ge.f32.partialorder %v629_v18, 0.0  ;;  %v697_v26 = vmul.f32 0.2, %v629_v18  ;;  %5994 = vmatmul.mubr.bf16.gmra.mrb[48].mxu0 %v7253_v11  ;;  %v772_v48 = vrot.slane %v7227_v32, 1 }
 0x142   : > { %v624_v40 = vadd.f32 %v6907_v43, %v623_v51  ;;  %vm663_vm3 = vcmp.ge.f32.partialorder %v621_v22, 0.0  ;;  %v695_v37 = vmul.f32 0.2, %v621_v22  ;;  %v871_v13 = vsel %vm862_vm6, %v8849_v53, %v853_v63 }
 0x143   : > { %vm666_vm4 = vcmp.ge.f32.partialorder %v632_v52, 0.0  ;;  %v698_v43 = vmul.f32 0.2, %v632_v52  ;;  %v7267_v16 = vsel %vm665_vm2, %v629_v18, %v697_v26  ;;  %1324 = vmatmul.mubr.bf16.gmra.mrb[20].mxu1 %v7261_v5  ;;  %v7281_v12 = vpack.c.bf16 %v870_v23, %v871_v13 }
 0x144   : > { %vm664_vm5 = vcmp.ge.f32.partialorder %v624_v40, 0.0  ;;  %v696_v62 = vmul.f32 0.2, %v624_v40  ;;  %v727_v19 = vsel %vm663_vm3, %v621_v22, %v695_v37  ;;  %v777_v51 = vrot.slane %v7267_v16, 1 }
 0x145   : > { %v7276_v60 = vsel %vm666_vm4, %v632_v52, %v698_v43  ;;  %v860_v18 = vrot.slane %v7267_v16, 2  ;;  %v858_v26 = vrot.slane %v727_v19, 2  ;;  %v8851_v63 = vrot.slane %v7067_v6, 1  ;;  %5997 = vmatprep.mubr.bf16.mxu0 %v7281_v12 }
 0x146   : > { %v861_v11 = vrot.slane %v7276_v60, 2  ;;  %v728_v46 = vsel %vm664_vm5, %v624_v40, %v696_v62  ;;  %v8853_v22 = vrot.slane %v7028_v41, 1  ;;  %v775_v43 = vrot.slane %v727_v19, 1 }
 0x147   : > { %v797_v53 = vsel %vm781_vm7, %v8851_v63, %v8850_v1  ;;  %v8852_v52 = vmov %v8851_v63  ;;  %v859_v54 = vrot.slane %v728_v46, 2  ;;  %v868_v40 = vsel %vm862_vm6, %v855_v28, %v856_v57 }
 0x148   : > { %v798_v37 = vsel %vm781_vm7, %v8853_v22, %v8852_v52  ;;  %v869_v23 = vsel %vm862_vm6, %v854_v31, %v855_v28  ;;  %v7304_v1 = vpack.c.bf16 %v7067_v6, %v7028_v41  ;;  %v866_v62 = vsel %vm862_vm6, %v857_v25, %v858_v26 }
 0x149   : > { %v7295_v27 = vpack.c.bf16 %v797_v53, %v798_v37  ;;  %v867_v13 = vsel %vm862_vm6, %v856_v57, %v857_v25  ;;  %v7311_v63 = vpack.c.bf16 %v868_v40, %v869_v23  ;;  %v8854_v52 = vrot.slane %v7079_v44, 1 }
 0x14a   : > { %v7313_v53 = vpack.c.bf16 %v866_v62, %v867_v13  ;;  %v8855_v31 = vrot.slane %v7123_v35, 1  ;;  %v8857_v28 = vrot.slane %v7097_v2, 1  ;;  %v864_v22 = vsel %vm862_vm6, %v859_v54, %v860_v18 }
 0x14b   : > { %1331 = vmatprep.mubr.bf16.mxu1 %v7295_v27  ;;  %v865_v37 = vsel %vm862_vm6, %v858_v26, %v859_v54  ;;  %v863_v40 = vsel %vm862_vm6, %v860_v18, %v861_v11  ;;  %v778_v23 = vrot.slane %v7276_v60, 1  ;;  %5998 = vmatmul.mubr.bf16.gmra.mrb[52].mxu0 %v7311_v63  ;;  %v8858_v13 = vrot.slane %v6915_v58, 2 }
 0x14c   : > { %v795_v41 = vsel %vm781_vm7, %v8855_v31, %v8854_v52  ;;  %v8856_v6 = vmov %v8855_v31  ;;  %1332 = vmatmul.mubr.bf16.gmra.mrb[24].mxu1 %v7304_v1  ;;  %v7338_v62 = vpack.c.bf16 %v864_v22, %v865_v37  ;;  %v7346_v31 = vpack.c.bf16 %v7123_v35, %v7097_v2  ;;  %6001 = vmatprep.mubr.bf16.mxu0 %v7313_v53 }
 0x14d   : > { %v796_v57 = vsel %vm781_vm7, %v8857_v28, %v8856_v6  ;;  %v894_v52 = vsel %vm862_vm6, %v861_v11, %v8858_v13  ;;  %v776_v54 = vrot.slane %v728_v46, 1  ;;  %v8859_v26 = vrot.slane %v7161_v24, 1 }
 0x14e   : > { %v7327_v25 = vpack.c.bf16 %v795_v41, %v796_v57  ;;  %v7350_v18 = vpack.c.bf16 %v894_v52, %v863_v40  ;;  %v8860_v41 = vrot.slane %v7120_v61, 1  ;;  %v8862_v28 = vrot.slane %v7079_v44, 1 }
 0x14f   : > { %v7368_v57 = vpack.c.bf16 %v7120_v61, %v7079_v44  ;;  %v8863_v22 = vrot.slane %v7159_v9, 1  ;;  %v8864_v37 = vrot.slane %v7175_v21, 1  ;;  %v8866_v52 = vmov %v8859_v26 }
 0x150   : > { %1339 = vmatprep.mubr.bf16.mxu1 %v7327_v25  ;;  %v793_v6 = vsel %vm781_vm7, %v8860_v41, %v8859_v26  ;;  %v8861_v11 = vmov %v8860_v41  ;;  %v7386_v44 = vpack.c.bf16 %v7175_v21, %v7161_v24  ;;  %v8867_v61 = vrot.slane %v7205_v8, 1 }
 0x151   : > { %v794_v2 = vsel %vm781_vm7, %v8862_v28, %v8861_v11  ;;  %v791_v40 = vsel %vm781_vm7, %v8864_v37, %v8863_v22  ;;  %v8865_v13 = vmov %v8864_v37  ;;  %v7404_v24 = vpack.c.bf16 %v7173_v59, %v7159_v9 }
 0x152   : > { %v7364_v35 = vpack.c.bf16 %v793_v6, %v794_v2  ;;  %v792_v26 = vsel %vm781_vm7, %v8866_v52, %v8865_v13  ;;  %v8868_v6 = vrot.slane %v7173_v59, 1  ;;  %v8870_v2 = vmov %v8863_v22 }
 0x153   : > { %v7382_v41 = vpack.c.bf16 %v791_v40, %v792_v26  ;;  %v8871_v21 = vrot.slane %v7203_v55, 1  ;;  %v8872_v13 = vmov %v8867_v61  ;;  %6002 = vmatmul.mubr.bf16.gmra.mrb[56].mxu0 %v7338_v62 }
 0x154   : > { %v789_v11 = vsel %vm781_vm7, %v8868_v6, %v8867_v61  ;;  %v8869_v28 = vmov %v8868_v6  ;;  %v788_v52 = vsel %vm781_vm7, %v8872_v13, %v772_v48  ;;  %v7418_v61 = vpack.c.bf16 %v7227_v32, %v7205_v8  ;;  %1340 = vmatmul.mubr.bf16.gmra.mrb[28].mxu1 %v7346_v31  ;;  %6005 = vmatprep.mubr.bf16.mxu0 %v7350_v18 }
 0x155   : > { %v790_v22 = vsel %vm781_vm7, %v8870_v2, %v8869_v28  ;;  %v787_v40 = vsel %vm781_vm7, %v772_v48, %v8871_v21  ;;  %v8873_v6 = vrot.slane %v7224_v47, 1  ;;  %v7434_v48 = vpack.c.bf16 %v7224_v47, %v7203_v55  ;;  %1347 = vmatprep.mubr.bf16.mxu1 %v7364_v35 }
 0x156   : > { %v7400_v37 = vpack.c.bf16 %v789_v11, %v790_v22  ;;  %v7414_v26 = vpack.c.bf16 %v787_v40, %v788_v52  ;;  %v8875_v11 = vmov %v8871_v21  ;;  %v783_v8 = vsel %vm781_vm7, %v776_v54, %v777_v51 }
 0x157   : > { %v785_v9 = vsel %vm781_vm7, %v8873_v6, %v775_v43  ;;  %v8874_v59 = vmov %v8873_v6  ;;  %v784_v32 = vsel %vm781_vm7, %v775_v43, %v776_v54  ;;  %v7442_v21 = vpack.c.bf16 %v728_v46, %v727_v19  ;;  %v6626_v6 = vld [vmem:[#allocation3 + $0x88] sm:$0xff]  }
 0x158   : > { %v786_v28 = vsel %vm781_vm7, %v8875_v11, %v8874_v59  ;;  %v7440_v22 = vpack.c.bf16 %v783_v8, %v784_v32  ;;  %v782_v40 = vsel %vm781_vm7, %v777_v51, %v778_v23  ;;  %v8876_v13 = vrot.slane %v6915_v58, 1  ;;  %v6635_v59 = vld [vmem:[#allocation3 + $0x1c8] sm:$0xff]   ;;  %v6643_v11 = vld [vmem:[#allocation3 + $0x218] sm:$0xff]   ;;  %v6639_v8 = vld [vmem:[#allocation3 + $0x190] sm:$0xff]  }
 0x159   : > { %v7430_v2 = vpack.c.bf16 %v785_v9, %v786_v28  ;;  %v8877_v47 = vrot.slane %v6919_v0, 2  ;;  %v8878_v43 = vrot.slane %v6915_v58, 2  ;;  %v7462_v19 = vpack.c.bf16 %v7276_v60, %v7267_v16  ;;  %v6641_v60 = vld [vmem:[#allocation3 + $0x210] sm:$0xff]   ;;  %v6634_v9 = vld [vmem:[#allocation3 + $0x180] sm:$0xff]  }
 0x15a   : > { %v813_v52 = vsel %vm781_vm7, %v778_v23, %v8876_v13  ;;  %v8824_v23 = vmov 0   ;;  %v8879_v54 = vpack.c.bf16 %v6937_v17, %v6944_v20  ;;  %v8880_v16 = vpack.c.bf16 %v6919_v0, %v6915_v58  ;;  %v6628_v17 = vld [vmem:[#allocation3 + $0x98] sm:$0xff]   ;;  %v6629_v58 = vld [vmem:[#allocation3 + $0xa0] sm:$0xff]   ;;  %v6630_v0 = vld [vmem:[#allocation3 + $0xa8] sm:$0xff]  }
 0x15b   : > { %v7452_v55 = vpack.c.bf16 %v813_v52, %v782_v40  ;;  %v893_v46 = vsel %vm862_vm6, %v8878_v43, %v8877_v47  ;;  %6006 = vmatmul.mubr.bf16.gmra.mrb[60].mxu0 %v8824_v23  ;;  %v6632_v20 = vld [vmem:[#allocation3 + $0xb8] sm:$0xff]   ;;  %v6638_v28 = vld [vmem:[#allocation3 + $0x1d0] sm:$0xff]   ;;  %v6645_v32 = vld [vmem:[#allocation3 + $0x220] sm:$0xff]  }
 0x15c   : > { %v895_v51 = vpack.c.bf16 %v6967_v34, %v893_v46  ;;  %1348 = vmatmul.mubr.bf16.gmra.mrb[32].mxu1 %v7368_v57  ;;  %1749 = vmatprep.mubr.bf16.mxu0 %v8879_v54  ;;  %v6627_v34 = vld [vmem:[#allocation3 + $0x90] sm:$0xff]   ;;  %v6642_v40 = vld [vmem:[#allocation3 + $0x1d8] sm:$0xff]   ;;  %v8881_v13 = vld [vmem:[#allocation6_spill] sm:$0xff] }
 0x15d   : > { %1355 = vmatprep.mubr.bf16.mxu1 %v7382_v41  ;;  %v6646_v52 = vld [vmem:[#allocation3 + $0x228] sm:$0xff]   ;;  %v6644_v43 = vld [vmem:[#allocation3 + $0x198] sm:$0xff]   ;;  %v6647_v46 = vld [vmem:[#allocation3 + $0x1e0] sm:$0xff]  }
 0x15e   : > { %v8882_v47 = vld [vmem:[#allocation7_spill] sm:$0xff]  ;;  %v6649_v54 = vld [vmem:[#allocation3 + $0x230] sm:$0xff]  }
 0x163   : > { %1750 = vmatmul.mubr.bf16.vlgmr.msra.gmra.mrb[64].mxu0 %v8880_v16  ;;  %v8883_v16 = vld [vmem:[#allocation8_spill] sm:$0xff] }
 0x164   : > { %1356 = vmatmul.mubr.bf16.gmra.mrb[36].mxu1 %v7386_v44  ;;  %1757 = vmatprep.mubr.bf16.mxu0 %v6975_v45  ;;  %v6637_v45 = vld [vmem:[#allocation3 + $0x200] sm:$0xff]  }
 0x165   : > { %1363 = vmatprep.mubr.bf16.mxu1 %v7400_v37  ;;  %6010 = vmatpush3.bf16.msra.mxu0 %v7237_v4  ;;  %v6640_v4 = vld [vmem:[#allocation3 + $0x208] sm:$0xff]  }
 0x166   : > { %6011 = vmatprep.subr.bf16.mxu0 %v6626_v6 }
 0x169   : > { %6012 = vmatpush3.bf16.msra.mxu0 %v6626_v6  ;;  %v6651_v6 = vld [vmem:[#allocation3 + $0x1e8] sm:$0xff]  }
 0x16a   : > { %6013 = vmatprep.subr.bf16.mxu0 %v6627_v34 }
 0x16b   : > { %1758 = vmatmul.mubr.bf16.gmra.mrb[68].mxu0 %v6921_v3  ;;  %v6631_v3 = vld [vmem:[#allocation3 + $0xb0] sm:$0xff]  }
 0x16c   : > { %1364 = vmatmul.mubr.bf16.gmra.mrb[40].mxu1 %v7404_v24  ;;  %1765 = vmatprep.mubr.bf16.mxu0 %v7007_v14 }
 0x16d   : > { %1371 = vmatprep.mubr.bf16.mxu1 %v7414_v26  ;;  %6014 = vmatpush3.bf16.msra.mxu0 %v6627_v34  ;;  %v6650_v34 = vld [vmem:[#allocation3 + $0x238] sm:$0xff]  }
 0x16e   : > { %6015 = vmatprep.subr.bf16.mxu0 %v6628_v17 }
 0x171   : > { %6016 = vmatpush3.bf16.msra.mxu0 %v6628_v17  ;;  %v8884_v17 = vld [vmem:[#allocation9_spill] sm:$0xff] }
 0x172   : > { %6017 = vmatprep.subr.bf16.mxu0 %v6629_v58 }
 0x173   : > { %1766 = vmatmul.mubr.bf16.gmra.mrb[72].mxu0 %v7020_v29 }
 0x174   : > { %1372 = vmatmul.mubr.bf16.gmra.mrb[44].mxu1 %v7418_v61  ;;  %1773 = vmatprep.mubr.bf16.mxu0 %v7049_v30 }
 0x175   : > { %1379 = vmatprep.mubr.bf16.mxu1 %v7430_v2  ;;  %6018 = vmatpush3.bf16.msra.mxu0 %v6629_v58  ;;  %v6652_v58 = vld [vmem:[#allocation3 + $0x1a8] sm:$0xff]  }
 0x176   : > { %6019 = vmatprep.subr.bf16.mxu0 %v6630_v0 }
 0x179   : > { %6020 = vmatpush3.bf16.msra.mxu0 %v6630_v0  ;;  %v6653_v0 = vld [vmem:[#allocation3 + $0x1f0] sm:$0xff]  }
 0x17a   : > { %6021 = vmatprep.subr.bf16.mxu0 %v6631_v3 }
 0x17b   : > { %1774 = vmatmul.mubr.bf16.gmra.mrb[76].mxu0 %v6961_v33 }
 0x17c   : > { %1380 = vmatmul.mubr.bf16.gmra.mrb[48].mxu1 %v7434_v48  ;;  %1781 = vmatprep.mubr.bf16.mxu0 %v7102_v7 }
 0x17d   : > { %1387 = vmatprep.mubr.bf16.mxu1 %v7440_v22  ;;  %6022 = vmatpush3.bf16.msra.mxu0 %v6631_v3  ;;  %v6654_v3 = vld [vmem:[#allocation3 + $0x1b0] sm:$0xff]  }
 0x17e   : > { %6023 = vmatprep.subr.bf16.mxu0 %v6632_v20 }
 0x181   : > { %6024 = vmatpush3.bf16.msra.mxu0 %v6632_v20  ;;  %v6655_v20 = vld [vmem:[#allocation3 + $0x1f8] sm:$0xff]  }
 0x182   : > { %6057 = vmatprep.subr.bf16.mxu0 %v6637_v45 }
 0x183   : > { %1782 = vmatmul.mubr.bf16.gmra.mrb[80].mxu0 %v7116_v39 }
 0x184   : > { %1388 = vmatmul.mubr.bf16.gmra.mrb[52].mxu1 %v7442_v21  ;;  %1789 = vmatprep.mubr.bf16.mxu0 %v7165_v36 }
 0x185   : > { %1395 = vmatprep.mubr.bf16.mxu1 %v7452_v55 }
 0x18b   : > { %1790 = vmatmul.mubr.bf16.gmra.mrb[84].mxu0 %v7195_v56 }
 0x18c   : > { %1396 = vmatmul.mubr.bf16.gmra.mrb[56].mxu1 %v7462_v19  ;;  %6025 = vmatprep.mubr.bf16.mxu0 %v895_v51  ;;  %v6648_v51 = vld [vmem:[#allocation3 + $0x1a0] sm:$0xff]  }
 0x18d   : > { %1403 = vmatprep.mubr.bf16.mxu1 %v8824_v23 }
 0x193   : > { %6026 = vmatmul.mubr.bf16.vlgmr.msra.gmra.mrb[32].mxu0 %v6978_v49  ;;  %v6636_v49 = vld [vmem:[#allocation3 + $0x188] sm:$0xff]  }
 0x194   : > { %1404 = vmatmul.mubr.bf16.gmra.mrb[60].mxu1 %v8824_v23  ;;  %6029 = vmatprep.mubr.bf16.mxu0 %v7009_v15 }
 0x195   : > { %1797 = vmatprep.mubr.bf16.mxu1 %v7244_v38  ;;  %6058 = vmatpush3.bf16.msra.mxu0 %v6637_v45  ;;  %v8885_v45 = vld [vmem:[#allocation10_spill] sm:$0xff] }
 0x196   : > { %6059 = vmatprep.subr.bf16.mxu0 %v6640_v4 }
 0x199   : > { %6060 = vmatpush3.bf16.msra.mxu0 %v6640_v4  ;;  %v8886_v4 = vld [vmem:[#allocation11_spill] sm:$0xff] }
 0x19a   : > { %6061 = vmatprep.subr.bf16.mxu0 %v6641_v60 }
 0x19b   : > { %6030 = vmatmul.mubr.bf16.gmra.mrb[36].mxu0 %v7030_v42 }
 0x19c   : > { %1798 = vmatmul.mubr.bf16.vlgmr.msra.gmra.mrb[64].mxu1 %v7261_v5  ;;  %6033 = vmatprep.mubr.bf16.mxu0 %v7058_v10 }
 0x19d   : > { %5384 = vmatpush3.bf16.msra.mxu1 %v6634_v9  ;;  %1805 = vmatprep.mubr.bf16.mxu1 %v7295_v27 }
 0x19e   : > { %5385 = vmatprep.subr.bf16.mxu1 %v6635_v59  ;;  %6062 = vmatpush3.bf16.msra.mxu0 %v6641_v60  ;;  %v6656_v60 = vld [vmem:[#allocation3 + $0x1b8] sm:$0xff]  }
 0x19f   : > { %6063 = vmatprep.subr.bf16.mxu0 %v6643_v11 }
 0x1a1   : > { %5386 = vmatpush3.bf16.msra.mxu1 %v6636_v49 }
 0x1a2   : > { %5387 = vmatprep.subr.bf16.mxu1 %v6638_v28  ;;  %6064 = vmatpush3.bf16.msra.mxu0 %v6643_v11 }
 0x1a3   : > { %6034 = vmatmul.mubr.bf16.gmra.mrb[40].mxu0 %v8881_v13  ;;  %6065 = vmatprep.subr.bf16.mxu0 %v6645_v32 }
 0x1a4   : > { %1806 = vmatmul.mubr.bf16.gmra.mrb[68].mxu1 %v7304_v1  ;;  %6037 = vmatprep.mubr.bf16.mxu0 %v8882_v47 }
 0x1a5   : > { %1813 = vmatprep.mubr.bf16.mxu1 %v7327_v25  ;;  %5388 = vmatpush3.bf16.msra.mxu1 %v6639_v8 }
 0x1a6   : > { %5389 = vmatprep.subr.bf16.mxu1 %v6642_v40  ;;  %6066 = vmatpush3.bf16.msra.mxu0 %v6645_v32 }
 0x1a7   : > { %6067 = vmatprep.subr.bf16.mxu0 %v6646_v52 }
 0x1a9   : > { %5390 = vmatpush3.bf16.msra.mxu1 %v6644_v43 }
 0x1aa   : > { %6068 = vmatpush3.bf16.msra.mxu0 %v6646_v52  ;;  %5391 = vmatprep.subr.bf16.mxu1 %v6647_v46 }
 0x1ab   : > { %6038 = vmatmul.mubr.bf16.gmra.mrb[44].mxu0 %v8883_v16  ;;  %6069 = vmatprep.subr.bf16.mxu0 %v6649_v54 }
 0x1ac   : > { %1814 = vmatmul.mubr.bf16.gmra.mrb[72].mxu1 %v7346_v31  ;;  %6041 = vmatprep.mubr.bf16.mxu0 %v8884_v17 }
 0x1ad   : > { %1821 = vmatprep.mubr.bf16.mxu1 %v7364_v35  ;;  %5392 = vmatpush3.bf16.msra.mxu1 %v6648_v51 }
 0x1ae   : > { %6070 = vmatpush3.bf16.msra.mxu0 %v6649_v54  ;;  %5393 = vmatprep.subr.bf16.mxu1 %v6651_v6 }
 0x1af   : > { %6071 = vmatprep.subr.bf16.mxu0 %v6650_v34 }
 0x1b1   : > { %5394 = vmatpush3.bf16.msra.mxu1 %v6652_v58 }
 0x1b2   : > { %6072 = vmatpush3.bf16.msra.mxu0 %v6650_v34  ;;  %5395 = vmatprep.subr.bf16.mxu1 %v6653_v0 }
 0x1b3   : > { %6042 = vmatmul.mubr.bf16.gmra.mrb[48].mxu0 %v8885_v45 }
 0x1b4   : > { %1822 = vmatmul.mubr.bf16.gmra.mrb[76].mxu1 %v7368_v57  ;;  %6045 = vmatprep.mubr.bf16.mxu0 %v8886_v4 }
 0x1b5   : > { %1829 = vmatprep.mubr.bf16.mxu1 %v7382_v41  ;;  %5396 = vmatpush3.bf16.msra.mxu1 %v6654_v3 }
 0x1b6   : > { %5397 = vmatprep.subr.bf16.mxu1 %v6655_v20 }
 0x1b9   : > { %5398 = vmatpush3.bf16.msra.mxu1 %v6656_v60 }
 0x1bb   : > { %6046 = vmatmul.mubr.bf16.gmra.mrb[52].mxu0 %v7281_v12 }
 0x1bc   : > { %1830 = vmatmul.mubr.bf16.gmra.mrb[80].mxu1 %v7386_v44  ;;  %6049 = vmatprep.mubr.bf16.mxu0 %v7311_v63 }
 0x1bd   : > { %1837 = vmatprep.mubr.bf16.mxu1 %v7400_v37 }
 0x1c3   : > { %6050 = vmatmul.mubr.bf16.gmra.mrb[56].mxu0 %v7313_v53 }
 0x1c4   : > { %1838 = vmatmul.mubr.bf16.gmra.mrb[84].mxu1 %v7404_v24  ;;  %6053 = vmatprep.mubr.bf16.mxu0 %v7338_v62 }
 0x1c5   : > { %1845 = vmatprep.mubr.bf16.mxu1 %v7414_v26 }
 0x1cb   : > { %6054 = vmatmul.mubr.bf16.gmra.mrb[60].mxu0 %v7350_v18 }
 0x1cc   : > { %1846 = vmatmul.mubr.bf16.gmra.mrb[88].mxu1 %v7418_v61  ;;  %6073 = vmatprep.mubr.bf16.mxu0 %v7009_v15 }
 0x1cd   : > { %1853 = vmatprep.mubr.bf16.mxu1 %v7430_v2 }
 0x1d3   : > { %6074 = vmatmul.mubr.bf16.vlgmr.msra.gmra.mrb[32].mxu0 %v7030_v42 }
 0x1d4   : > { %1854 = vmatmul.mubr.bf16.gmra.mrb[92].mxu1 %v7434_v48  ;;  %6077 = vmatprep.mubr.bf16.mxu0 %v7058_v10 }
 0x1d5   : > { %1861 = vmatprep.mubr.bf16.mxu1 %v7440_v22 }
 0x1db   : > { %6078 = vmatmul.mubr.bf16.gmra.mrb[36].mxu0 %v8881_v13 }
 0x1dc   : > { %1862 = vmatmul.mubr.bf16.gmra.mrb[96].mxu1 %v7442_v21  ;;  %6081 = vmatprep.mubr.bf16.mxu0 %v8882_v47 }
 0x1dd   : > { %1869 = vmatprep.mubr.bf16.mxu1 %v7452_v55 }
 0x1e3   : > { %6082 = vmatmul.mubr.bf16.gmra.mrb[40].mxu0 %v8883_v16 }
 0x1e4   : > { %1870 = vmatmul.mubr.bf16.gmra.mrb[100].mxu1 %v7462_v19  ;;  %6085 = vmatprep.mubr.bf16.mxu0 %v8884_v17 }
 0x1e5   : > { %2312 = vmatprep.mubr.bf16.mxu1 %v7007_v14 }
 0x1eb   : > { %6086 = vmatmul.mubr.bf16.gmra.mrb[44].mxu0 %v8885_v45 }
 0x1ec   : > { %2313 = vmatmul.mubr.bf16.vlgmr.msra.gmra.mrb[104].mxu1 %v7020_v29  ;;  %6089 = vmatprep.mubr.bf16.mxu0 %v8886_v4 }
 0x1ed   : > { %2320 = vmatprep.mubr.bf16.mxu1 %v7049_v30 }
 0x1ee   : > { %v5127_v15 = vpop.f32.mrb[0].mxu1 }
 0x1ef   : > { %v5128_v42 = vpop.f32.mrb[1].mxu1 }
 0x1f0   : > { %v7547_v10 = vadd.f32 %v5128_v42, %v5127_v15  ;;  %v5130_v9 = vpop.f32.mrb[2].mxu1 }
 0x1f1   : > { %v5131_v59 = vpop.f32.mrb[3].mxu1 }
 0x1f2   : > { %v7549_v11 = vadd.f32 %v5131_v59, %v5130_v9 }
 0x1f3   : > { %6090 = vmatmul.mubr.bf16.gmra.mrb[48].mxu0 %v7281_v12 }
 0x1f4   : > { %2321 = vmatmul.mubr.bf16.gmra.mrb[108].mxu1 %v6961_v33  ;;  %6093 = vmatprep.mubr.bf16.mxu0 %v7311_v63 }
 0x1f5   : > { %2328 = vmatprep.mubr.bf16.mxu1 %v7102_v7 }
 0x1f6   : > { %v5133_v14 = vpop.f32.mrb[4].mxu1 }
 0x1f7   : > { %v5134_v29 = vpop.f32.mrb[5].mxu1 }
 0x1f8   : > { %v7555_v49 = vadd.f32 %v5134_v29, %v5133_v14  ;;  %v5136_v30 = vpop.f32.mrb[6].mxu1 }
 0x1f9   : > { %v5137_v28 = vpop.f32.mrb[7].mxu1 }
 0x1fa   : > { %v7557_v8 = vadd.f32 %v5137_v28, %v5136_v30 }
 0x1fb   : > { %6094 = vmatmul.mubr.bf16.gmra.mrb[52].mxu0 %v7313_v53 }
 0x1fc   : > { %2329 = vmatmul.mubr.bf16.gmra.mrb[112].mxu1 %v7116_v39  ;;  %6097 = vmatprep.mubr.bf16.mxu0 %v7338_v62 }
 0x1fd   : > { %2336 = vmatprep.mubr.bf16.mxu1 %v7165_v36 }
 0x1fe   : > { %v5139_v33 = vpop.f32.mrb[8].mxu1 }
 0x1ff   : > { %v5140_v12 = vpop.f32.mrb[9].mxu1 }
 0x200   : > { %v7563_v63 = vadd.f32 %v5140_v12, %v5139_v33  ;;  %v5142_v7 = vpop.f32.mrb[10].mxu1 }
 0x201   : > { %v5143_v32 = vpop.f32.mrb[11].mxu1 }
 0x202   : > { %v7565_v40 = vadd.f32 %v5143_v32, %v5142_v7 }
 0x203   : > { %6098 = vmatmul.mubr.bf16.gmra.mrb[56].mxu0 %v7350_v18 }
 0x204   : > { %2337 = vmatmul.mubr.bf16.gmra.mrb[116].mxu1 %v7195_v56  ;;  %6101 = vmatprep.mubr.bf16.mxu0 %v8824_v23 }
 0x205   : > { %2344 = vmatprep.mubr.bf16.mxu1 %v7244_v38 }
 0x206   : > { %v5145_v39 = vpop.f32.mrb[12].mxu1 }
 0x207   : > { %v5146_v53 = vpop.f32.mrb[13].mxu1 }
 0x208   : > { %v7571_v62 = vadd.f32 %v5146_v53, %v5145_v39  ;;  %v5148_v36 = vpop.f32.mrb[14].mxu1 }
 0x209   : > { %v5149_v13 = vpop.f32.mrb[15].mxu1 }
 0x20a   : > { %v7573_v52 = vadd.f32 %v5149_v13, %v5148_v36 }
 0x20b   : > { %6102 = vmatmul.mubr.bf16.gmra.mrb[60].mxu0 %v8824_v23 }
 0x20c   : > { %2345 = vmatmul.mubr.bf16.gmra.mrb[120].mxu1 %v7261_v5 }
 0x20d   : > { %2352 = vmatprep.mubr.bf16.mxu1 %v7295_v27 }
 0x20e   : > { %v5151_v18 = vpop.f32.mrb[16].mxu1 }
 0x20f   : > { %v5152_v56 = vpop.f32.mrb[17].mxu1 }
 0x210   : > { %v7578_v47 = vadd.f32 %v5152_v56, %v5151_v18  ;;  %v5154_v43 = vpop.f32.mrb[18].mxu1 }
 0x211   : > { %v5155_v38 = vpop.f32.mrb[19].mxu1 }
 0x212   : > { %v7580_v46 = vadd.f32 %v5155_v38, %v5154_v43 }
 0x214   : > { %2353 = vmatmul.mubr.bf16.gmra.mrb[124].mxu1 %v7304_v1 }
 0x215   : > { %2360 = vmatprep.mubr.bf16.mxu1 %v7327_v25 }
 0x216   : > { %v5157_v51 = vpop.f32.mrb[20].mxu1 }
 0x217   : > { %v5158_v54 = vpop.f32.mrb[21].mxu1 }
 0x218   : > { %v7584_v6 = vadd.f32 %v5158_v54, %v5157_v51  ;;  %v5160_v16 = vpop.f32.mrb[22].mxu1 }
 0x219   : > { %v5161_v5 = vpop.f32.mrb[23].mxu1 }
 0x21a   : > { %v7586_v34 = vadd.f32 %v5161_v5, %v5160_v16 }
 0x21c   : > { %2361 = vmatmul.mubr.bf16.gmra.mrb[128].mxu1 %v7346_v31 }
 0x21d   : > { %2368 = vmatprep.mubr.bf16.mxu1 %v7364_v35 }
 0x21f   : > { %v5163_v27 = vpop.f32.mrb[24].mxu1 }
 0x220   : > { %v5164_v17 = vpop.f32.mrb[25].mxu1 }
 0x221   : > { %v7590_v58 = vadd.f32 %v5164_v17, %v5163_v27  ;;  %v5166_v0 = vpop.f32.mrb[26].mxu1 }
 0x222   : > { %v5167_v1 = vpop.f32.mrb[27].mxu1 }
 0x223   : > { %v7592_v3 = vadd.f32 %v5167_v1, %v5166_v0 }
 0x224   : > { %2369 = vmatmul.mubr.bf16.gmra.mrb[132].mxu1 %v7368_v57 }
 0x225   : > { %2376 = vmatprep.mubr.bf16.mxu1 %v7382_v41 }
 0x227   : > { %v5169_v25 = vpop.f32.mrb[28].mxu1 }
 0x228   : > { %v5170_v20 = vpop.f32.mrb[29].mxu1 }
 0x229   : > { %v7596_v45 = vadd.f32 %v5170_v20, %v5169_v25  ;;  %v5172_v4 = vpop.f32.mrb[30].mxu1 }
 0x22a   : > { %v5173_v31 = vpop.f32.mrb[31].mxu1 }
 0x22b   : > { %v7598_v60 = vadd.f32 %v5173_v31, %v5172_v4 }
 0x22c   : > { %2377 = vmatmul.mubr.bf16.gmra.mrb[136].mxu1 %v7386_v44 }
 0x22d   : > { %2384 = vmatprep.mubr.bf16.mxu1 %v7400_v37 }
 0x22f   : > { %v5175_v35 = vpop.f32.mrb[32].mxu1 }
 0x230   : > { %v5176_v15 = vpop.f32.mrb[33].mxu1 }
 0x231   : > { %v7602_v42 = vadd.f32 %v5176_v15, %v5175_v35  ;;  %v5178_v9 = vpop.f32.mrb[34].mxu1 }
 0x232   : > { %v5179_v57 = vpop.f32.mrb[35].mxu1 }
 0x233   : > { %v7604_v59 = vadd.f32 %v5179_v57, %v5178_v9  ;;  %v6658_v9 = vld [vmem:[%s8803_s5 + $0xc0] sm:$0xff]  }
 0x234   : > { %2385 = vmatmul.mubr.bf16.gmra.mrb[140].mxu1 %v7404_v24 }
 0x235   : > { %2392 = vmatprep.mubr.bf16.mxu1 %v7414_v26 }
 0x236   : > { %v5263_v41 = vpop.f32.mrb[64].mxu0 }
 0x237   : > { %v5181_v14 = vpop.f32.mrb[36].mxu1  ;;  %v5264_v29 = vpop.f32.mrb[65].mxu0 }
 0x238   : > { %v5182_v30 = vpop.f32.mrb[37].mxu1  ;;  %v5265_v28 = vadd.f32 %v5264_v29, %v5263_v41  ;;  %v5266_v44 = vpop.f32.mrb[66].mxu0 }
 0x239   : > { %v7608_v33 = vadd.f32 %v5182_v30, %v5181_v14  ;;  %v5184_v37 = vpop.f32.mrb[38].mxu1  ;;  %v5267_v12 = vpop.f32.mrb[67].mxu0 }
 0x23a   : > { %v5185_v7 = vpop.f32.mrb[39].mxu1  ;;  %v7611_v32 = vadd.f32 %v5265_v28, %v7547_v10  ;;  %v5268_v39 = vadd.f32 %v5267_v12, %v5266_v44  ;;  %v6660_v28 = vld [vmem:[%s8803_s5 + $0xc8] sm:$0xff]  }
 0x23b   : > { %v7613_v53 = vadd.f32 %v5185_v7, %v5184_v37 }
 0x23c   : > { %2393 = vmatmul.mubr.bf16.gmra.mrb[144].mxu1 %v7418_v61  ;;  %v7617_v24 = vadd.f32 %v5268_v39, %v7549_v11 }
 0x23d   : > { %2400 = vmatprep.mubr.bf16.mxu1 %v7430_v2 }
 0x23e   : > { %v5269_v26 = vpop.f32.mrb[68].mxu0 }
 0x23f   : > { %v5187_v36 = vpop.f32.mrb[40].mxu1  ;;  %v5270_v13 = vpop.f32.mrb[69].mxu0 }
 0x240   : > { %v5188_v18 = vpop.f32.mrb[41].mxu1  ;;  %v5271_v56 = vadd.f32 %v5270_v13, %v5269_v26  ;;  %v5272_v43 = vpop.f32.mrb[70].mxu0  ;;  %v6661_v26 = vld [vmem:[%s8803_s5 + $0x140] sm:$0xff]   ;;  %v6663_v13 = vld [vmem:[%s8803_s5 + $0xd0] sm:$0xff]  }
 0x241   : > { %v7620_v38 = vadd.f32 %v5188_v18, %v5187_v36  ;;  %v5190_v10 = vpop.f32.mrb[42].mxu1  ;;  %v5273_v51 = vpop.f32.mrb[71].mxu0  ;;  %6105 = vmatprep.subr.bf16.mxu0 %v6661_v26  ;;  %v6664_v18 = vld [vmem:[%s8803_s5 + $0x148] sm:$0xff]  }
 0x242   : > { %v5191_v54 = vpop.f32.mrb[43].mxu1  ;;  %v7623_v16 = vadd.f32 %v5271_v56, %v7555_v49  ;;  %v5274_v61 = vadd.f32 %v5273_v51, %v5272_v43  ;;  %6106 = vmatpush3.bf16.msra.mxu0 %v6661_v26 }
 0x243   : > { %v7625_v5 = vadd.f32 %v5191_v54, %v5190_v10  ;;  %6107 = vmatprep.subr.bf16.mxu0 %v6664_v18 }
 0x244   : > { %2401 = vmatmul.mubr.bf16.gmra.mrb[148].mxu1 %v7434_v48  ;;  %v7629_v2 = vadd.f32 %v5274_v61, %v7557_v8  ;;  %v6657_v8 = vld [vmem:[%s8803_s5 + $0x100] sm:$0xff]  }
 0x245   : > { %2408 = vmatprep.mubr.bf16.mxu1 %v7440_v22  ;;  %5519 = vmatprep.subr.bf16.mxu1 %v6657_v8  ;;  %v6670_v8 = vld [vmem:[%s8803_s5 + $0x158] sm:$0xff]  }
 0x246   : > { %v5275_v11 = vpop.f32.mrb[72].mxu0  ;;  %5520 = vmatpush3.bf16.msra.mxu1 %v6658_v9  ;;  %6108 = vmatpush3.bf16.msra.mxu0 %v6664_v18  ;;  %v6675_v18 = vld [vmem:[%s8803_s5 + $0xf0] sm:$0xff]  }
 0x247   : > { %v5193_v27 = vpop.f32.mrb[44].mxu1  ;;  %v5276_v17 = vpop.f32.mrb[73].mxu0 }
 0x248   : > { %v5194_v0 = vpop.f32.mrb[45].mxu1  ;;  %v5277_v1 = vadd.f32 %v5276_v17, %v5275_v11  ;;  %v5278_v25 = vpop.f32.mrb[74].mxu0 }
 0x249   : > { %v7632_v20 = vadd.f32 %v5194_v0, %v5193_v27  ;;  %v5196_v49 = vpop.f32.mrb[46].mxu1  ;;  %v5279_v4 = vpop.f32.mrb[75].mxu0  ;;  %v6666_v27 = vld [vmem:[%s8803_s5 + $0xd8] sm:$0xff]  }
 0x24a   : > { %v5197_v31 = vpop.f32.mrb[47].mxu1  ;;  %v7635_v35 = vadd.f32 %v5277_v1, %v7563_v63  ;;  %v5280_v48 = vadd.f32 %v5279_v4, %v5278_v25  ;;  %v6659_v63 = vld [vmem:[%s8803_s5 + $0x108] sm:$0xff]   ;;  %v6667_v4 = vld [vmem:[%s8803_s5 + $0x150] sm:$0xff]  }
 0x24b   : > { %v7637_v15 = vadd.f32 %v5197_v31, %v5196_v49  ;;  %5521 = vmatprep.subr.bf16.mxu1 %v6659_v63  ;;  %6109 = vmatprep.subr.bf16.mxu0 %v6667_v4 }
 0x24c   : > { %2409 = vmatmul.mubr.bf16.gmra.mrb[152].mxu1 %v7442_v21  ;;  %v7641_v22 = vadd.f32 %v5280_v48, %v7565_v40  ;;  %v6669_v48 = vld [vmem:[%s8803_s5 + $0xe0] sm:$0xff]   ;;  %6110 = vmatpush3.bf16.msra.mxu0 %v6667_v4 }
 0x24d   : > { %2416 = vmatprep.mubr.bf16.mxu1 %v7452_v55  ;;  %5522 = vmatpush3.bf16.msra.mxu1 %v6660_v28 }
 0x24e   : > { %v5281_v57 = vpop.f32.mrb[76].mxu0  ;;  %6111 = vmatprep.subr.bf16.mxu0 %v6670_v8 }
 0x24f   : > { %v5199_v41 = vpop.f32.mrb[48].mxu1  ;;  %v5282_v21 = vpop.f32.mrb[77].mxu0 }
 0x250   : > { %v5200_v40 = vpop.f32.mrb[49].mxu1  ;;  %v5283_v14 = vadd.f32 %v5282_v21, %v5281_v57  ;;  %v5284_v55 = vpop.f32.mrb[78].mxu0  ;;  %6112 = vmatpush3.bf16.msra.mxu0 %v6670_v8 }
 0x251   : > { %v7653_v29 = vadd.f32 %v5200_v40, %v5199_v41  ;;  %v5202_v30 = vpop.f32.mrb[50].mxu1  ;;  %v5285_v44 = vpop.f32.mrb[79].mxu0 }
 0x252   : > { %v5203_v37 = vpop.f32.mrb[51].mxu1  ;;  %v7659_v12 = vadd.f32 %v5283_v14, %v7571_v62  ;;  %v5286_v7 = vadd.f32 %v5285_v44, %v5284_v55  ;;  %v6662_v62 = vld [vmem:[%s8803_s5 + $0x110] sm:$0xff]  }
 0x253   : > { %v7661_v39 = vadd.f32 %v5203_v37, %v5202_v30  ;;  %5523 = vmatprep.subr.bf16.mxu1 %v6662_v62  ;;  %v6672_v30 = vld [vmem:[%s8803_s5 + $0xe8] sm:$0xff]   ;;  %v6673_v62 = vld [vmem:[%s8803_s5 + $0x160] sm:$0xff]  }
 0x254   : > { %2417 = vmatmul.mubr.bf16.gmra.mrb[156].mxu1 %v7462_v19  ;;  %v7668_v36 = vadd.f32 %v5286_v7, %v7573_v52  ;;  %v6665_v52 = vld [vmem:[%s8803_s5 + $0x118] sm:$0xff]   ;;  %6113 = vmatprep.subr.bf16.mxu0 %v6673_v62 }
 0x255   : > { %2424 = vmatprep.mubr.bf16.mxu1 %v8824_v23  ;;  %5524 = vmatpush3.bf16.msra.mxu1 %v6663_v13 }
 0x256   : > { %v5287_v19 = vpop.f32.mrb[80].mxu0  ;;  %5525 = vmatprep.subr.bf16.mxu1 %v6665_v52  ;;  %6114 = vmatpush3.bf16.msra.mxu0 %v6673_v62 }
 0x257   : > { %v5205_v56 = vpop.f32.mrb[52].mxu1  ;;  %v5288_v43 = vpop.f32.mrb[81].mxu0 }
 0x258   : > { %v5206_v10 = vpop.f32.mrb[53].mxu1  ;;  %v5289_v51 = vadd.f32 %v5288_v43, %v5287_v19  ;;  %v5290_v54 = vpop.f32.mrb[82].mxu0  ;;  %v6676_v19 = vld [vmem:[%s8803_s5 + $0x168] sm:$0xff]  }
 0x259   : > { %v7683_v61 = vadd.f32 %v5206_v10, %v5205_v56  ;;  %v5208_v11 = vpop.f32.mrb[54].mxu1  ;;  %v5291_v17 = vpop.f32.mrb[83].mxu0  ;;  %5526 = vmatpush3.bf16.msra.mxu1 %v6666_v27  ;;  %6115 = vmatprep.subr.bf16.mxu0 %v6676_v19  ;;  %v6679_v27 = vld [vmem:[%s8803_s5 + $0x170] sm:$0xff]  }
 0x25a   : > { %v5209_v0 = vpop.f32.mrb[55].mxu1  ;;  %v7689_v1 = vadd.f32 %v5289_v51, %v7578_v47  ;;  %v5292_v25 = vadd.f32 %v5291_v17, %v5290_v54  ;;  %v6668_v47 = vld [vmem:[%s8803_s5 + $0x120] sm:$0xff]   ;;  %v6678_v51 = vld [vmem:[%s8803_s5 + $0xf8] sm:$0xff]   ;;  %6116 = vmatpush3.bf16.msra.mxu0 %v6676_v19 }
 0x25b   : > { %v7691_v49 = vadd.f32 %v5209_v0, %v5208_v11  ;;  %5527 = vmatprep.subr.bf16.mxu1 %v6668_v47  ;;  %6117 = vmatprep.subr.bf16.mxu0 %v6679_v27  ;;  %v6680_v17 = vld [vmem:[%s8803_s5 + $0x178] sm:$0xff]  }
 0x25c   : > { %2425 = vmatmul.mubr.bf16.gmra.mrb[160].mxu1 %v8824_v23  ;;  %v7698_v31 = vadd.f32 %v5292_v25, %v7580_v46  ;;  %v6671_v46 = vld [vmem:[%s8803_s5 + $0x128] sm:$0xff]  }
 0x25d   : > { %2432 = vmatprep.mubr.bf16.mxu1 %v8824_v23  ;;  %5528 = vmatpush3.bf16.msra.mxu1 %v6669_v48 }
 0x25e   : > { %v5293_v9 = vpop.f32.mrb[84].mxu0  ;;  %5529 = vmatprep.subr.bf16.mxu1 %v6671_v46  ;;  %6118 = vmatpush3.bf16.msra.mxu0 %v6679_v27 }
 0x25f   : > { %v5211_v63 = vpop.f32.mrb[56].mxu1  ;;  %v5294_v57 = vpop.f32.mrb[85].mxu0  ;;  %6119 = vmatprep.subr.bf16.mxu0 %v6680_v17 }
 0x260   : > { %v5212_v41 = vpop.f32.mrb[57].mxu1  ;;  %v5295_v21 = vadd.f32 %v5294_v57, %v5293_v9  ;;  %v5296_v40 = vpop.f32.mrb[86].mxu0 }
 0x261   : > { %v7713_v14 = vadd.f32 %v5212_v41, %v5211_v63  ;;  %v5214_v55 = vpop.f32.mrb[58].mxu1  ;;  %v5297_v28 = vpop.f32.mrb[87].mxu0  ;;  %5530 = vmatpush3.bf16.msra.mxu1 %v6672_v30 }
 0x262   : > { %v5215_v44 = vpop.f32.mrb[59].mxu1  ;;  %v7719_v37 = vadd.f32 %v5295_v21, %v7584_v6  ;;  %v5298_v7 = vadd.f32 %v5297_v28, %v5296_v40  ;;  %v6674_v6 = vld [vmem:[%s8803_s5 + $0x130] sm:$0xff]   ;;  %6120 = vmatpush3.bf16.msra.mxu0 %v6680_v17 }
 0x263   : > { %v7721_v26 = vadd.f32 %v5215_v44, %v5214_v55  ;;  %5531 = vmatprep.subr.bf16.mxu1 %v6674_v6 }
 0x264   : > { %2433 = vmatmul.mubr.bf16.gmra.mrb[164].mxu1 %v8824_v23  ;;  %v7728_v13 = vadd.f32 %v5298_v7, %v7586_v34  ;;  %v6677_v34 = vld [vmem:[%s8803_s5 + $0x138] sm:$0xff]  }
 0x265   : > { %5532 = vmatpush3.bf16.msra.mxu1 %v6675_v18 }
 0x266   : > { %5533 = vmatprep.subr.bf16.mxu1 %v6677_v34 }
 0x267   : > { %v5217_v56 = vpop.f32.mrb[60].mxu1 }
 0x268   : > { %v5218_v52 = vpop.f32.mrb[61].mxu1 }
 0x269   : > { %v7742_v43 = vadd.f32 %v5218_v52, %v5217_v56  ;;  %v5220_v10 = vpop.f32.mrb[62].mxu1  ;;  %5534 = vmatpush3.bf16.msra.mxu1 %v6678_v51 }
 0x26a   : > { %v5221_v54 = vpop.f32.mrb[63].mxu1 }
 0x26b   : > { %v7747_v11 = vadd.f32 %v5221_v54, %v5220_v10 }
 0x26f   : > { %v5299_v0 = vpop.f32.mrb[64].mxu1 }
 0x270   : > { %v5300_v25 = vpop.f32.mrb[65].mxu1 }
 0x271   : > { %v5301_v4 = vadd.f32 %v5300_v25, %v5299_v0  ;;  %v5302_v47 = vpop.f32.mrb[66].mxu1 }
 0x272   : > { %v5303_v48 = vpop.f32.mrb[67].mxu1 }
 0x273   : > { %v7756_v8 = vadd.f32 %v5301_v4, %v7590_v58  ;;  %v5304_v9 = vadd.f32 %v5303_v48, %v5302_v47 }
 0x275   : > { %v7759_v63 = vadd.f32 %v5304_v9, %v7592_v3 }
 0x277   : > { %v5305_v46 = vpop.f32.mrb[68].mxu1 }
 0x278   : > { %v5306_v57 = vpop.f32.mrb[69].mxu1 }
 0x279   : > { %v5307_v41 = vadd.f32 %v5306_v57, %v5305_v46  ;;  %v5308_v21 = vpop.f32.mrb[70].mxu1 }
 0x27a   : > { %v5309_v40 = vpop.f32.mrb[71].mxu1 }
 0x27b   : > { %v7762_v55 = vadd.f32 %v5307_v41, %v7596_v45  ;;  %v5310_v30 = vadd.f32 %v5309_v40, %v5308_v21 }
 0x27d   : > { %v7765_v28 = vadd.f32 %v5310_v30, %v7598_v60 }
 0x27f   : > { %v5311_v44 = vpop.f32.mrb[72].mxu1 }
 0x280   : > { %v5312_v58 = vpop.f32.mrb[73].mxu1 }
 0x281   : > { %v5313_v7 = vadd.f32 %v5312_v58, %v5311_v44  ;;  %v5314_v62 = vpop.f32.mrb[74].mxu1 }
 0x282   : > { %v5315_v6 = vpop.f32.mrb[75].mxu1 }
 0x283   : > { %v7768_v3 = vadd.f32 %v5313_v7, %v7602_v42  ;;  %v5316_v18 = vadd.f32 %v5315_v6, %v5314_v62  ;;  %v7797_v62 = vld [vmem:[%s8803_s5 + $0x80] sm:$0xff]  }
 0x284   : > { %6153 = vmatprep.subr.bf16.mxu0 %v7797_v62 }
 0x285   : > { %v7771_v19 = vadd.f32 %v5316_v18, %v7604_v59 }
 0x287   : > { %v5317_v56 = vpop.f32.mrb[76].mxu1 }
 0x288   : > { %v5318_v34 = vpop.f32.mrb[77].mxu1 }
 0x289   : > { %v5319_v45 = vadd.f32 %v5318_v34, %v5317_v56  ;;  %v5320_v52 = vpop.f32.mrb[78].mxu1 }
 0x28a   : > { %v5321_v10 = vpop.f32.mrb[79].mxu1 }
 0x28b   : > { %v7774_v60 = vadd.f32 %v5319_v45, %v7608_v33  ;;  %v5322_v51 = vadd.f32 %v5321_v10, %v5320_v52 }
 0x28d   : > { %v7777_v54 = vadd.f32 %v5322_v51, %v7613_v53 }
 0x28f   : > { %v5323_v27 = vpop.f32.mrb[80].mxu1 }
 0x290   : > { %v5324_v17 = vpop.f32.mrb[81].mxu1 }
 0x291   : > { %v5325_v42 = vadd.f32 %v5324_v17, %v5323_v27  ;;  %v5326_v0 = vpop.f32.mrb[82].mxu1 }
 0x292   : > { %v5327_v25 = vpop.f32.mrb[83].mxu1 }
 0x293   : > { %v7780_v59 = vadd.f32 %v5325_v42, %v7620_v38  ;;  %v5328_v4 = vadd.f32 %v5327_v25, %v5326_v0 }
 0x295   : > { %v7783_v47 = vadd.f32 %v5328_v4, %v7625_v5 }
 0x297   : > { %v5329_v48 = vpop.f32.mrb[84].mxu1 }
 0x298   : > { %v5330_v9 = vpop.f32.mrb[85].mxu1 }
 0x299   : > { %v5331_v33 = vadd.f32 %v5330_v9, %v5329_v48  ;;  %v5332_v46 = vpop.f32.mrb[86].mxu1 }
 0x29a   : > { %v5333_v57 = vpop.f32.mrb[87].mxu1 }
 0x29b   : > { %v7786_v53 = vadd.f32 %v5331_v33, %v7632_v20  ;;  %v5334_v41 = vadd.f32 %v5333_v57, %v5332_v46 }
 0x29d   : > { %v7789_v21 = vadd.f32 %v5334_v41, %v7637_v15 }
 0x29f   : > { %v5335_v40 = vpop.f32.mrb[88].mxu1 }
 0x2a0   : > { %v5336_v30 = vpop.f32.mrb[89].mxu1 }
 0x2a1   : > { %v5337_v38 = vadd.f32 %v5336_v30, %v5335_v40  ;;  %v5338_v44 = vpop.f32.mrb[90].mxu1 }
 0x2a2   : > { %v5339_v58 = vpop.f32.mrb[91].mxu1 }
 0x2a3   : > { %v7792_v5 = vadd.f32 %v5337_v38, %v7653_v29  ;;  %v5340_v7 = vadd.f32 %v5339_v58, %v5338_v44 }
 0x2a5   : > { %8887 = vst [vmem:[#allocation6_spill] sm:$0xff] %v7792_v5  ;;  %v7800_v20 = vadd.f32 %v5340_v7, %v7661_v39 }
 0x2a6   : > { %v7803_v15 = vpop.f32.mrb[32].mxu0 }
 0x2a7   : > { %8888 = vst [vmem:[#allocation7_spill] sm:$0xff] %v7800_v20  ;;  %v5341_v6 = vpop.f32.mrb[92].mxu1  ;;  %v2475_v18 = vpop.f32.mrb[33].mxu0 }
 0x2a8   : > { %v5342_v56 = vpop.f32.mrb[93].mxu1  ;;  %v7805_v34 = vpop.f32.mrb[34].mxu0 }
 0x2a9   : > { %v5343_v29 = vadd.f32 %v5342_v56, %v5341_v6  ;;  %v5344_v45 = vpop.f32.mrb[94].mxu1  ;;  %v2478_v52 = vpop.f32.mrb[35].mxu0 }
 0x2aa   : > { %v5345_v10 = vpop.f32.mrb[95].mxu1 }
 0x2ab   : > { %v7808_v51 = vadd.f32 %v5343_v29, %v7683_v61  ;;  %v5346_v27 = vadd.f32 %v5345_v10, %v5344_v45 }
 0x2ad   : > { %8889 = vst [vmem:[#allocation8_spill] sm:$0xff] %v7808_v51  ;;  %v7811_v39 = vadd.f32 %v5346_v27, %v7691_v49 }
 0x2ae   : > { %v7813_v17 = vpop.f32.mrb[36].mxu0 }
 0x2af   : > { %8890 = vst [vmem:[#allocation9_spill] sm:$0xff] %v7811_v39  ;;  %v5347_v42 = vpop.f32.mrb[96].mxu1  ;;  %v7815_v0 = vpop.f32.mrb[37].mxu0 }
 0x2b0   : > { %v5348_v25 = vpop.f32.mrb[97].mxu1  ;;  %v7817_v4 = vpop.f32.mrb[38].mxu0 }
 0x2b1   : > { %v5349_v48 = vadd.f32 %v5348_v25, %v5347_v42  ;;  %v5350_v9 = vpop.f32.mrb[98].mxu1  ;;  %v7819_v33 = vpop.f32.mrb[39].mxu0 }
 0x2b2   : > { %v5351_v46 = vpop.f32.mrb[99].mxu1 }
 0x2b3   : > { %v7822_v61 = vadd.f32 %v5349_v48, %v7713_v14  ;;  %v5352_v57 = vadd.f32 %v5351_v46, %v5350_v9 }
 0x2b5   : > { %8891 = vst [vmem:[#allocation10_spill] sm:$0xff] %v7822_v61  ;;  %v7825_v49 = vadd.f32 %v5352_v57, %v7721_v26 }
 0x2b6   : > { %v7827_v41 = vpop.f32.mrb[40].mxu0 }
 0x2b7   : > { %8892 = vst [vmem:[#allocation11_spill] sm:$0xff] %v7825_v49  ;;  %v5353_v40 = vpop.f32.mrb[100].mxu1  ;;  %v7829_v30 = vpop.f32.mrb[41].mxu0 }
 0x2b8   : > { %v5354_v38 = vpop.f32.mrb[101].mxu1  ;;  %v7831_v44 = vpop.f32.mrb[42].mxu0 }
 0x2b9   : > { %v5355_v58 = vadd.f32 %v5354_v38, %v5353_v40  ;;  %v5356_v7 = vpop.f32.mrb[102].mxu1  ;;  %v7833_v6 = vpop.f32.mrb[43].mxu0 }
 0x2ba   : > { %v5357_v56 = vpop.f32.mrb[103].mxu1 }
 0x2bb   : > { %v7836_v14 = vadd.f32 %v5355_v58, %v7742_v43  ;;  %v5358_v29 = vadd.f32 %v5357_v56, %v5356_v7  ;;  %v6687_v7 = vld [vmem:[%s8803_s5 + $0x40] sm:$0xff]  }
 0x2bc   : > { %5655 = vmatprep.subr.bf16.mxu1 %v6687_v7 }
 0x2bd   : > { %8893 = vst [vmem:[#allocation12_spill] sm:$0xff] %v7836_v14  ;;  %v7839_v26 = vadd.f32 %v5358_v29, %v7747_v11  ;;  %v7853_v11 = vld [vmem:[%s8802_s4] ss:$0 sm:$0xff] }
 0x2be   : > { %v7841_v45 = vpop.f32.mrb[44].mxu0 }
 0x2bf   : > { %8894 = vst [vmem:[#allocation13_spill] sm:$0xff] %v7839_v26  ;;  %v5399_v10 = vpop.f32.mrb[104].mxu1  ;;  %v7843_v27 = vpop.f32.mrb[45].mxu0 }
 0x2c0   : > { %v5400_v42 = vpop.f32.mrb[105].mxu1  ;;  %v7845_v25 = vpop.f32.mrb[46].mxu0 }
 0x2c1   : > { %v5401_v48 = vadd.f32 %v5400_v42, %v5399_v10  ;;  %v5402_v9 = vpop.f32.mrb[106].mxu1  ;;  %v7847_v46 = vpop.f32.mrb[47].mxu0 }
 0x2c2   : > { %v5403_v57 = vpop.f32.mrb[107].mxu1 }
 0x2c3   : > { %v6269_v43 = vadd.f32 %v7611_v32, %v5401_v48  ;;  %v5404_v40 = vadd.f32 %v5403_v57, %v5402_v9 }
 0x2c5   : > { %v6270_v38 = vadd.f32 %v6269_v43, %v2475_v18  ;;  %v6275_v58 = vadd.f32 %v7617_v24, %v5404_v40 }
 0x2c6   : > { %v7860_v29 = vpop.f32.mrb[48].mxu0 }
 0x2c7   : > { %v2641_v56 = vadd.f32 %v6270_v38, %v7853_v11  ;;  %v6276_v10 = vadd.f32 %v6275_v58, %v2478_v52  ;;  %v5405_v42 = vpop.f32.mrb[108].mxu1  ;;  %v7862_v32 = vpop.f32.mrb[49].mxu0 }
 0x2c8   : > { %v5406_v48 = vpop.f32.mrb[109].mxu1  ;;  %v7865_v57 = vpop.f32.mrb[50].mxu0 }
 0x2c9   : > { %vm2673_vm8 = vcmp.ge.f32.partialorder %v2641_v56, 0.0  ;;  %v2705_v9 = vmul.f32 0.2, %v2641_v56  ;;  %v2642_v18 = vadd.f32 %v6276_v10, %v7853_v11  ;;  %v5407_v24 = vadd.f32 %v5406_v48, %v5405_v42  ;;  %v5408_v43 = vpop.f32.mrb[110].mxu1  ;;  %v7867_v40 = vpop.f32.mrb[51].mxu0 }
 0x2ca   : > { %v5409_v23 = vpop.f32.mrb[111].mxu1 }
 0x2cb   : > { %v7869_v38 = vsel %vm2673_vm8, %v2641_v56, %v2705_v9  ;;  %vm2674_vm9 = vcmp.ge.f32.partialorder %v2642_v18, 0.0  ;;  %v2706_v52 = vmul.f32 0.2, %v2642_v18  ;;  %v6266_v58 = vadd.f32 %v7623_v16, %v5407_v24 }
 0x2cc   : > { %8895 = vst [vmem:[#allocation14_spill] sm:$0xff] %v7869_v38  ;;  %v5410_v26 = vadd.f32 %v5409_v23, %v5408_v43  ;;  %v8830_v10 = vrot.slane %v7869_v38, 1  ;;  %v8827_v49 = vrot.slane %v7869_v38, 2 }
 0x2cd   : > { %v7872_v14 = vsel %vm2674_vm9, %v2642_v18, %v2706_v52  ;;  %v6267_v7 = vadd.f32 %v6266_v58, %v7803_v15 }
 0x2ce   : > { %8896 = vst [vmem:[#allocation15_spill] sm:$0xff] %v7872_v14  ;;  %v6272_v42 = vadd.f32 %v7629_v2, %v5410_v26  ;;  %v2866_v48 = vrot.slane %v7872_v14, 2  ;;  %v2786_v56 = vrot.slane %v7872_v14, 1  ;;  %v7883_v23 = vpop.f32.mrb[52].mxu0 }
 0x2cf   : > { %v2643_v16 = vadd.f32 %v6267_v7, %v7853_v11  ;;  %v5411_v18 = vpop.f32.mrb[112].mxu1  ;;  %v7885_v24 = vpop.f32.mrb[53].mxu0 }
 0x2d0   : > { %v6273_v15 = vadd.f32 %v6272_v42, %v7805_v34  ;;  %v5412_v43 = vpop.f32.mrb[113].mxu1  ;;  %v7892_v2 = vsel %vm862_vm6, %v8827_v49, %v2866_v48  ;;  %v7898_v26 = vsel %vm781_vm7, %v8830_v10, %v2786_v56  ;;  %v7900_v58 = vpop.f32.mrb[54].mxu0 }
 0x2d1   : > { %8897 = vst [vmem:[#allocation16_spill] sm:$0xff] %v7892_v2  ;;  %8898 = vst [vmem:[#allocation17_spill] sm:$0xff] %v7898_v26  ;;  %vm2675_vm10 = vcmp.ge.f32.partialorder %v2643_v16, 0.0  ;;  %v2707_v52 = vmul.f32 0.2, %v2643_v16  ;;  %v5413_v7 = vadd.f32 %v5412_v43, %v5411_v18  ;;  %v5414_v9 = vpop.f32.mrb[114].mxu1 }
 0x2d2   : > { %8899 = vst [vmem:[#allocation18_spill] sm:$0xff] %v7900_v58  ;;  %v2644_v34 = vadd.f32 %v6273_v15, %v7853_v11  ;;  %v7903_v42 = vpop.f32.mrb[55].mxu0  ;;  %v5415_v14 = vpop.f32.mrb[115].mxu1 }
 0x2d3   : > { %v2739_v61 = vsel %vm2675_vm10, %v2643_v16, %v2707_v52  ;;  %v6281_v49 = vadd.f32 %v7635_v35, %v5413_v7  ;;  %v5416_v39 = vadd.f32 %v5415_v14, %v5414_v9 }
 0x2d4   : > { %vm2676_vm11 = vcmp.ge.f32.partialorder %v2644_v34, 0.0  ;;  %v2708_v38 = vmul.f32 0.2, %v2644_v34  ;;  %v2787_v51 = vrot.slane %v2739_v61, 1  ;;  %v2867_v10 = vrot.slane %v2739_v61, 2 }
 0x2d5   : > { %v6282_v20 = vadd.f32 %v6281_v49, %v7815_v0  ;;  %v6287_v5 = vadd.f32 %v7641_v22, %v5416_v39 }
 0x2d6   : > { %v2740_v58 = vsel %vm2676_vm11, %v2644_v34, %v2708_v38  ;;  %v7910_v18 = vsel %vm862_vm6, %v2866_v48, %v2867_v10  ;;  %v7914_v15 = vsel %vm781_vm7, %v2786_v56, %v2787_v51  ;;  %v7917_v14 = vpop.f32.mrb[56].mxu0 }
 0x2d7   : > { %8900 = vst [vmem:[#allocation19_spill] sm:$0xff] %v7910_v18  ;;  %8901 = vst [vmem:[#allocation20_spill] sm:$0xff] %v7914_v15  ;;  %v2645_v35 = vadd.f32 %v6282_v20, %v7853_v11  ;;  %v6288_v9 = vadd.f32 %v6287_v5, %v7819_v33  ;;  %v5417_v16 = vpop.f32.mrb[116].mxu1  ;;  %v2788_v43 = vrot.slane %v2740_v58, 1  ;;  %v2868_v0 = vrot.slane %v2740_v58, 2  ;;  %v7920_v49 = vpop.f32.mrb[57].mxu0 }
 0x2d8   : > { %v5418_v22 = vpop.f32.mrb[117].mxu1  ;;  %v7922_v39 = vpack.c.bf16 %v2740_v58, %v2739_v61  ;;  %v7929_v52 = vpop.f32.mrb[58].mxu0 }
 0x2d9   : > { %vm2677_vm12 = vcmp.ge.f32.partialorder %v2645_v35, 0.0  ;;  %v2709_v20 = vmul.f32 0.2, %v2645_v35  ;;  %v2646_v56 = vadd.f32 %v6288_v9, %v7853_v11  ;;  %8903 = vst [vmem:[#allocation22_spill] sm:$0xff] %v7929_v52  ;;  %v5419_v5 = vadd.f32 %v5418_v22, %v5417_v16  ;;  %v5420_v33 = vpop.f32.mrb[118].mxu1  ;;  %v7931_v7 = vpop.f32.mrb[59].mxu0 }
 0x2da   : > { %8902 = vst [vmem:[#allocation21_spill] sm:$0xff] %v7922_v39  ;;  %v5421_v34 = vpop.f32.mrb[119].mxu1  ;;  %v2845_v61 = vsel %vm781_vm7, %v2787_v51, %v2788_v43  ;;  %v2925_v58 = vsel %vm862_vm6, %v2867_v10, %v2868_v0 }
 0x2db   : > { %v2741_v38 = vsel %vm2677_vm12, %v2645_v35, %v2709_v20  ;;  %vm2678_vm13 = vcmp.ge.f32.partialorder %v2646_v56, 0.0  ;;  %v2710_v48 = vmul.f32 0.2, %v2646_v56  ;;  %v6278_v26 = vadd.f32 %v7659_v12, %v5419_v5 }
 0x2dc   : > { %v5422_v15 = vadd.f32 %v5421_v34, %v5420_v33  ;;  %v2789_v9 = vrot.slane %v2741_v38, 1  ;;  %v2869_v2 = vrot.slane %v2741_v38, 2 }
 0x2dd   : > { %v2742_v18 = vsel %vm2678_vm13, %v2646_v56, %v2710_v48  ;;  %v6279_v16 = vadd.f32 %v6278_v26, %v7813_v17  ;;  %v6689_v56 = vld [vmem:[%s8803_s5 + $0x48] sm:$0xff]  }
 0x2de   : > { %v2870_v22 = vrot.slane %v2742_v18, 2  ;;  %v6284_v52 = vadd.f32 %v7668_v36, %v5422_v15  ;;  %v2844_v51 = vsel %vm781_vm7, %v2788_v43, %v2789_v9  ;;  %v2924_v10 = vsel %vm862_vm6, %v2868_v0, %v2869_v2  ;;  %v7945_v20 = vpop.f32.mrb[60].mxu0  ;;  %v6688_v36 = vld [vmem:[%s8803_s5] sm:$0xff]  }
 0x2df   : > { %v2647_v35 = vadd.f32 %v6279_v16, %v7853_v11  ;;  %v5423_v12 = vpop.f32.mrb[120].mxu1  ;;  %v7947_v5 = vpack.c.bf16 %v2844_v51, %v2845_v61  ;;  %v7949_v33 = vpack.c.bf16 %v2924_v10, %v2925_v58  ;;  %v2790_v48 = vrot.slane %v2742_v18, 1  ;;  %v7954_v17 = vpop.f32.mrb[61].mxu0 }
 0x2e0   : > { %v6285_v26 = vadd.f32 %v6284_v52, %v7817_v4  ;;  %v5424_v15 = vpop.f32.mrb[121].mxu1  ;;  %v2923_v43 = vsel %vm862_vm6, %v2869_v2, %v2870_v22  ;;  %v7959_v0 = vpack.c.bf16 %v2742_v18, %v2741_v38  ;;  %v7964_v61 = vpop.f32.mrb[62].mxu0 }
 0x2e1   : > { %8904 = vst [vmem:[#allocation23_spill] sm:$0xff] %v7947_v5  ;;  %8905 = vst [vmem:[#allocation24_spill] sm:$0xff] %v7949_v33  ;;  %vm2679_vm14 = vcmp.ge.f32.partialorder %v2647_v35, 0.0  ;;  %v2711_v34 = vmul.f32 0.2, %v2647_v35  ;;  %v5425_v58 = vadd.f32 %v5424_v15, %v5423_v12  ;;  %v5426_v16 = vpop.f32.mrb[122].mxu1  ;;  %3317 = vmatprep.mubr.bf16.mxu1 %v7947_v5  ;;  %6121 = vmatprep.mubr.bf16.mxu0 %v7949_v33 }
 0x2e2   : > { %v2843_v4 = vsel %vm781_vm7, %v2789_v9, %v2790_v48  ;;  %v2648_v2 = vadd.f32 %v6285_v26, %v7853_v11  ;;  %v7971_v18 = vpop.f32.mrb[63].mxu0  ;;  %v5427_v38 = vpop.f32.mrb[123].mxu1  ;;  %3318 = vmatmul.mubr.bf16.vlgmr.msra.gmra.mrb[168].mxu1 %v7922_v39  ;;  %v6690_v12 = vld [vmem:[%s8803_s5 + $0x8] sm:$0xff]   ;;  %v6692_v26 = vld [vmem:[%s8803_s5 + $0x50] sm:$0xff]  }
 0x2e3   : > { %v2743_v52 = vsel %vm2679_vm14, %v2647_v35, %v2711_v34  ;;  %v6293_v51 = vadd.f32 %v7689_v1, %v5425_v58  ;;  %v5428_v10 = vadd.f32 %v5427_v38, %v5426_v16  ;;  %5656 = vmatpush3.bf16.msra.mxu1 %v6688_v36 }
 0x2e4   : > { %v2871_v15 = vrot.slane %v2743_v52, 2  ;;  %vm2680_vm15 = vcmp.ge.f32.partialorder %v2648_v2, 0.0  ;;  %v2712_v5 = vmul.f32 0.2, %v2648_v2  ;;  %v2791_v9 = vrot.slane %v2743_v52, 1  ;;  %5657 = vmatprep.subr.bf16.mxu1 %v6689_v56 }
 0x2e5   : > { %v6294_v39 = vadd.f32 %v6293_v51, %v7829_v30  ;;  %v6299_v35 = vadd.f32 %v7698_v31, %v5428_v10  ;;  %v6682_v31 = vld [vmem:[%s8803_s5 + $0x88] sm:$0xff]   ;;  %v6693_v30 = vld [vmem:[%s8803_s5 + $0x10] sm:$0xff]  }
 0x2e6   : > { %v2744_v1 = vsel %vm2680_vm15, %v2648_v2, %v2712_v5  ;;  %v2842_v36 = vsel %vm781_vm7, %v2790_v48, %v2791_v9  ;;  %v2922_v34 = vsel %vm862_vm6, %v2870_v22, %v2871_v15 }
 0x2e7   : > { %v2649_v58 = vadd.f32 %v6294_v39, %v7853_v11  ;;  %v6300_v16 = vadd.f32 %v6299_v35, %v7833_v6  ;;  %v5429_v56 = vpop.f32.mrb[124].mxu1  ;;  %v7989_v38 = vpack.c.bf16 %v2842_v36, %v2843_v4  ;;  %v7991_v33 = vpack.c.bf16 %v2922_v34, %v2923_v43  ;;  %5658 = vmatpush3.bf16.msra.mxu1 %v6690_v12  ;;  %v6694_v6 = vld [vmem:[%s8803_s5 + $0x58] sm:$0xff]   ;;  %v6683_v36 = vld [vmem:[%s8803_s5 + $0x90] sm:$0xff]  }
 0x2e8   : > { %v5430_v5 = vpop.f32.mrb[125].mxu1  ;;  %v2792_v22 = vrot.slane %v2744_v1, 1  ;;  %v2872_v48 = vrot.slane %v2744_v1, 2  ;;  %v7999_v39 = vpack.c.bf16 %v2744_v1, %v2743_v52  ;;  %5659 = vmatprep.subr.bf16.mxu1 %v6692_v26 }
 0x2e9   : > { %vm2681_vm0 = vcmp.ge.f32.partialorder %v2649_v58, 0.0  ;;  %v2713_v43 = vmul.f32 0.2, %v2649_v58  ;;  %v2650_v4 = vadd.f32 %v6300_v16, %v7853_v11  ;;  %v5431_v2 = vadd.f32 %v5430_v5, %v5429_v56  ;;  %v5432_v51 = vpop.f32.mrb[126].mxu1  ;;  %3325 = vmatprep.mubr.bf16.mxu1 %v7989_v38  ;;  %6122 = vmatmul.mubr.bf16.vlgmr.msra.gmra.mrb[88].mxu0 %v7991_v33 }
 0x2ea   : > { %v5433_v10 = vpop.f32.mrb[127].mxu1  ;;  %3326 = vmatmul.mubr.bf16.gmra.mrb[172].mxu1 %v7959_v0  ;;  %v2841_v52 = vsel %vm781_vm7, %v2791_v9, %v2792_v22  ;;  %v2921_v12 = vsel %vm862_vm6, %v2871_v15, %v2872_v48  ;;  %6154 = vmatpush3.bf16.msra.mxu0 %v7797_v62  ;;  %v6695_v9 = vld [vmem:[%s8803_s5 + $0x18] sm:$0xff]   ;;  %v6697_v62 = vld [vmem:[%s8803_s5 + $0x60] sm:$0xff]  }
 0x2eb   : > { %v2745_v26 = vsel %vm2681_vm0, %v2649_v58, %v2713_v43  ;;  %vm2682_vm1 = vcmp.ge.f32.partialorder %v2650_v4, 0.0  ;;  %v2714_v35 = vmul.f32 0.2, %v2650_v4  ;;  %v6290_v1 = vadd.f32 %v7719_v37, %v5431_v2  ;;  %6155 = vmatprep.subr.bf16.mxu0 %v6682_v31  ;;  %5660 = vmatpush3.bf16.msra.mxu1 %v6693_v30 }
 0x2ec   : > { %v5434_v34 = vadd.f32 %v5433_v10, %v5432_v51  ;;  %v2793_v16 = vrot.slane %v2745_v26, 1  ;;  %v2873_v15 = vrot.slane %v2745_v26, 2  ;;  %5661 = vmatprep.subr.bf16.mxu1 %v6694_v6 }
 0x2ed   : > { %v2746_v58 = vsel %vm2682_vm1, %v2650_v4, %v2714_v35  ;;  %v6291_v37 = vadd.f32 %v6290_v1, %v7827_v41  ;;  %v6698_v41 = vld [vmem:[%s8803_s5 + $0x20] sm:$0xff]  }
 0x2ee   : > { %v6296_v56 = vadd.f32 %v7728_v13, %v5434_v34  ;;  %v2840_v30 = vsel %vm781_vm7, %v2792_v22, %v2793_v16  ;;  %v2920_v5 = vsel %vm862_vm6, %v2872_v48, %v2873_v15  ;;  %v2794_v43 = vrot.slane %v2746_v58, 1  ;;  %6156 = vmatpush3.bf16.msra.mxu0 %v6682_v31  ;;  %v6684_v13 = vld [vmem:[%s8803_s5 + $0x98] sm:$0xff]  }
 0x2ef   : > { %v2651_v2 = vadd.f32 %v6291_v37, %v7853_v11  ;;  %v5435_v6 = vpop.f32.mrb[128].mxu1  ;;  %v8030_v51 = vpack.c.bf16 %v2840_v30, %v2841_v52  ;;  %v8032_v10 = vpack.c.bf16 %v2920_v5, %v2921_v12  ;;  %v2874_v4 = vrot.slane %v2746_v58, 2  ;;  %6157 = vmatprep.subr.bf16.mxu0 %v6683_v36  ;;  %5662 = vmatpush3.bf16.msra.mxu1 %v6695_v9  ;;  %v6699_v12 = vld [vmem:[%s8803_s5 + $0x68] sm:$0xff]   ;;  %v6685_v37 = vld [vmem:[%s8803_s5 + $0xa0] sm:$0xff]  }
 0x2f0   : > { %v6297_v31 = vadd.f32 %v6296_v56, %v7831_v44  ;;  %v5436_v22 = vpop.f32.mrb[129].mxu1  ;;  %v2839_v48 = vsel %vm781_vm7, %v2793_v16, %v2794_v43  ;;  %v8043_v52 = vpack.c.bf16 %v2746_v58, %v2745_v26  ;;  %5663 = vmatprep.subr.bf16.mxu1 %v6697_v62  ;;  %v6700_v5 = vld [vmem:[%s8803_s5 + $0x28] sm:$0xff]  }
 0x2f1   : > { %vm2683_vm2 = vcmp.ge.f32.partialorder %v2651_v2, 0.0  ;;  %v2715_v35 = vmul.f32 0.2, %v2651_v2  ;;  %v5437_v1 = vadd.f32 %v5436_v22, %v5435_v6  ;;  %v5438_v9 = vpop.f32.mrb[130].mxu1  ;;  %3333 = vmatprep.mubr.bf16.mxu1 %v8030_v51  ;;  %6125 = vmatprep.mubr.bf16.mxu0 %v8032_v10  ;;  %v2919_v44 = vsel %vm862_vm6, %v2873_v15, %v2874_v4 }
 0x2f2   : > { %v2652_v34 = vadd.f32 %v6297_v31, %v7853_v11  ;;  %v5439_v26 = vpop.f32.mrb[131].mxu1  ;;  %3334 = vmatmul.mubr.bf16.gmra.mrb[176].mxu1 %v7999_v39  ;;  %6158 = vmatpush3.bf16.msra.mxu0 %v6683_v36 }
 0x2f3   : > { %v2747_v16 = vsel %vm2683_vm2, %v2651_v2, %v2715_v35  ;;  %v6305_v62 = vadd.f32 %v7756_v8, %v5437_v1  ;;  %v5440_v58 = vadd.f32 %v5439_v26, %v5438_v9  ;;  %6159 = vmatprep.subr.bf16.mxu0 %v6684_v13  ;;  %5664 = vmatpush3.bf16.msra.mxu1 %v6698_v41 }
 0x2f4   : > { %vm2684_vm3 = vcmp.ge.f32.partialorder %v2652_v34, 0.0  ;;  %v2716_v56 = vmul.f32 0.2, %v2652_v34  ;;  %v2795_v30 = vrot.slane %v2747_v16, 1  ;;  %v2875_v15 = vrot.slane %v2747_v16, 2  ;;  %5665 = vmatprep.subr.bf16.mxu1 %v6699_v12 }
 0x2f5   : > { %v6306_v36 = vadd.f32 %v6305_v62, %v7843_v27  ;;  %v6311_v8 = vadd.f32 %v7759_v63, %v5440_v58  ;;  %v6686_v63 = vld [vmem:[%s8803_s5 + $0xa8] sm:$0xff]   ;;  %v6703_v27 = vld [vmem:[%s8803_s5 + $0x70] sm:$0xff]  }
 0x2f6   : > { %v2748_v2 = vsel %vm2684_vm3, %v2652_v34, %v2716_v56  ;;  %v2838_v6 = vsel %vm781_vm7, %v2794_v43, %v2795_v30  ;;  %v2918_v41 = vsel %vm862_vm6, %v2874_v4, %v2875_v15  ;;  %6160 = vmatpush3.bf16.msra.mxu0 %v6684_v13 }
 0x2f7   : > { %v2653_v31 = vadd.f32 %v6306_v36, %v7853_v11  ;;  %v6312_v22 = vadd.f32 %v6311_v8, %v7847_v46  ;;  %v5441_v12 = vpop.f32.mrb[132].mxu1  ;;  %v8069_v35 = vpack.c.bf16 %v2838_v6, %v2839_v48  ;;  %v8071_v1 = vpack.c.bf16 %v2918_v41, %v2919_v44  ;;  %6161 = vmatprep.subr.bf16.mxu0 %v6685_v37  ;;  %v6704_v46 = vld [vmem:[%s8803_s5 + $0x30] sm:$0xff]  }
 0x2f8   : > { %v5442_v43 = vpop.f32.mrb[133].mxu1  ;;  %v2796_v4 = vrot.slane %v2748_v2, 1  ;;  %v2876_v13 = vrot.slane %v2748_v2, 2  ;;  %v8079_v9 = vpack.c.bf16 %v2748_v2, %v2747_v16  ;;  %5666 = vmatpush3.bf16.msra.mxu1 %v6700_v5  ;;  %v6705_v16 = vld [vmem:[%s8803_s5 + $0x78] sm:$0xff]   ;;  %v6691_v2 = vld [vmem:[%s8803_s5 + $0xb0] sm:$0xff]  }
 0x2f9   : > { %vm2685_vm4 = vcmp.ge.f32.partialorder %v2653_v31, 0.0  ;;  %v2717_v48 = vmul.f32 0.2, %v2653_v31  ;;  %v2654_v44 = vadd.f32 %v6312_v22, %v7853_v11  ;;  %v5443_v34 = vadd.f32 %v5442_v43, %v5441_v12  ;;  %v5444_v26 = vpop.f32.mrb[134].mxu1  ;;  %3341 = vmatprep.mubr.bf16.mxu1 %v8069_v35  ;;  %6126 = vmatmul.mubr.bf16.gmra.mrb[92].mxu0 %v8071_v1 }
 0x2fa   : > { %v5445_v62 = vpop.f32.mrb[135].mxu1  ;;  %3342 = vmatmul.mubr.bf16.gmra.mrb[180].mxu1 %v8043_v52  ;;  %v2837_v58 = vsel %vm781_vm7, %v2795_v30, %v2796_v4  ;;  %v2917_v56 = vsel %vm862_vm6, %v2875_v15, %v2876_v13  ;;  %6162 = vmatpush3.bf16.msra.mxu0 %v6685_v37  ;;  %v6706_v30 = vld [vmem:[%s8803_s5 + $0x38] sm:$0xff]  }
 0x2fb   : > { %v2749_v5 = vsel %vm2685_vm4, %v2653_v31, %v2717_v48  ;;  %vm2686_vm5 = vcmp.ge.f32.partialorder %v2654_v44, 0.0  ;;  %v2718_v36 = vmul.f32 0.2, %v2654_v44  ;;  %v6302_v8 = vadd.f32 %v7762_v55, %v5443_v34  ;;  %6163 = vmatprep.subr.bf16.mxu0 %v6686_v63  ;;  %5667 = vmatprep.subr.bf16.mxu1 %v6703_v27 }
 0x2fc   : > { %v5446_v6 = vadd.f32 %v5445_v62, %v5444_v26  ;;  %v2797_v41 = vrot.slane %v2749_v5, 1  ;;  %v2877_v22 = vrot.slane %v2749_v5, 2  ;;  %5668 = vmatpush3.bf16.msra.mxu1 %v6704_v46 }
 0x2fd   : > { %v2750_v37 = vsel %vm2686_vm5, %v2654_v44, %v2718_v36  ;;  %v6303_v15 = vadd.f32 %v6302_v8, %v7841_v45  ;;  %5669 = vmatprep.subr.bf16.mxu1 %v6705_v16 }
 0x2fe   : > { %v6308_v55 = vadd.f32 %v7765_v28, %v5446_v6  ;;  %v2836_v31 = vsel %vm781_vm7, %v2796_v4, %v2797_v41  ;;  %v2916_v12 = vsel %vm862_vm6, %v2876_v13, %v2877_v22  ;;  %v2798_v27 = vrot.slane %v2750_v37, 1  ;;  %6164 = vmatpush3.bf16.msra.mxu0 %v6686_v63  ;;  %v6696_v28 = vld [vmem:[%s8803_s5 + $0xb8] sm:$0xff]   ;;  %v6701_v6 = vld [vmem:[%s8803_s5 + $0x1c0] sm:$0xff]  }
 0x2ff   : > { %v2655_v43 = vadd.f32 %v6303_v15, %v7853_v11  ;;  %v5447_v46 = vpop.f32.mrb[136].mxu1  ;;  %v8109_v48 = vpack.c.bf16 %v2836_v31, %v2837_v58  ;;  %v8111_v34 = vpack.c.bf16 %v2916_v12, %v2917_v56  ;;  %v2878_v44 = vrot.slane %v2750_v37, 2  ;;  %6165 = vmatprep.subr.bf16.mxu0 %v6691_v2 }
 0x300   : > { %v6309_v45 = vadd.f32 %v6308_v55, %v7845_v25  ;;  %v5448_v4 = vpop.f32.mrb[137].mxu1  ;;  %v2835_v13 = vsel %vm781_vm7, %v2797_v41, %v2798_v27  ;;  %v8119_v63 = vpack.c.bf16 %v2750_v37, %v2749_v5  ;;  %5670 = vmatpush3.bf16.msra.mxu1 %v6706_v30 }
 0x301   : > { %vm2687_vm8 = vcmp.ge.f32.partialorder %v2655_v43, 0.0  ;;  %v2719_v26 = vmul.f32 0.2, %v2655_v43  ;;  %v5449_v16 = vadd.f32 %v5448_v4, %v5447_v46  ;;  %v5450_v62 = vpop.f32.mrb[138].mxu1  ;;  %3349 = vmatprep.mubr.bf16.mxu1 %v8109_v48  ;;  %6129 = vmatprep.mubr.bf16.mxu0 %v8111_v34  ;;  %v2915_v58 = vsel %vm862_vm6, %v2877_v22, %v2878_v44 }
 0x302   : > { %v2656_v25 = vadd.f32 %v6309_v45, %v7853_v11  ;;  %v5451_v56 = vpop.f32.mrb[139].mxu1  ;;  %3350 = vmatmul.mubr.bf16.gmra.mrb[184].mxu1 %v8079_v9  ;;  %6166 = vmatpush3.bf16.msra.mxu0 %v6691_v2 }
 0x303   : > { %v2751_v5 = vsel %vm2687_vm8, %v2655_v43, %v2719_v26  ;;  %v6317_v36 = vadd.f32 %v7768_v3, %v5449_v16  ;;  %v5452_v8 = vadd.f32 %v5451_v56, %v5450_v62  ;;  %6167 = vmatprep.subr.bf16.mxu0 %v6696_v28 }
 0x304   : > { %vm2688_vm9 = vcmp.ge.f32.partialorder %v2656_v25, 0.0  ;;  %v2720_v41 = vmul.f32 0.2, %v2656_v25  ;;  %v2799_v30 = vrot.slane %v2751_v5, 1  ;;  %v2879_v37 = vrot.slane %v2751_v5, 2 }
 0x305   : > { %v6318_v22 = vadd.f32 %v6317_v36, %v7862_v32  ;;  %v6323_v15 = vadd.f32 %v7771_v19, %v5452_v8 }
 0x306   : > { %v2752_v55 = vsel %vm2688_vm9, %v2656_v25, %v2720_v41  ;;  %v2834_v2 = vsel %vm781_vm7, %v2798_v27, %v2799_v30  ;;  %v2914_v3 = vsel %vm862_vm6, %v2878_v44, %v2879_v37  ;;  %6168 = vmatpush3.bf16.msra.mxu0 %v6696_v28 }
 0x307   : > { %v2657_v31 = vadd.f32 %v6318_v22, %v7853_v11  ;;  %v6324_v12 = vadd.f32 %v6323_v15, %v7867_v40  ;;  %v5453_v43 = vpop.f32.mrb[140].mxu1  ;;  %v8139_v46 = vpack.c.bf16 %v2834_v2, %v2835_v13  ;;  %v8141_v45 = vpack.c.bf16 %v2914_v3, %v2915_v58  ;;  %5791 = vmatprep.subr.bf16.mxu0 %v6701_v6 }
 0x308   : > { %v5454_v32 = vpop.f32.mrb[141].mxu1  ;;  %v2800_v19 = vrot.slane %v2752_v55, 1  ;;  %v2880_v4 = vrot.slane %v2752_v55, 2  ;;  %v8143_v26 = vpack.c.bf16 %v2752_v55, %v2751_v5 }
 0x309   : > { %vm2689_vm10 = vcmp.ge.f32.partialorder %v2657_v31, 0.0  ;;  %v2721_v27 = vmul.f32 0.2, %v2657_v31  ;;  %v2658_v44 = vadd.f32 %v6324_v12, %v7853_v11  ;;  %v5455_v28 = vadd.f32 %v5454_v32, %v5453_v43  ;;  %v5456_v16 = vpop.f32.mrb[142].mxu1  ;;  %3357 = vmatprep.mubr.bf16.mxu1 %v8139_v46  ;;  %6130 = vmatmul.mubr.bf16.gmra.mrb[96].mxu0 %v8141_v45 }
 0x30a   : > { %v5457_v40 = vpop.f32.mrb[143].mxu1  ;;  %3358 = vmatmul.mubr.bf16.gmra.mrb[188].mxu1 %v8119_v63  ;;  %v2833_v13 = vsel %vm781_vm7, %v2799_v30, %v2800_v19  ;;  %v2913_v62 = vsel %vm862_vm6, %v2879_v37, %v2880_v4 }
 0x30b   : > { %v2753_v58 = vsel %vm2689_vm10, %v2657_v31, %v2721_v27  ;;  %vm2690_vm11 = vcmp.ge.f32.partialorder %v2658_v44, 0.0  ;;  %v2722_v25 = vmul.f32 0.2, %v2658_v44  ;;  %v6314_v56 = vadd.f32 %v7774_v60, %v5455_v28 }
 0x30c   : > { %v5458_v5 = vadd.f32 %v5457_v40, %v5456_v16  ;;  %v2801_v36 = vrot.slane %v2753_v58, 1  ;;  %v2881_v8 = vrot.slane %v2753_v58, 2 }
 0x30d   : > { %v2754_v6 = vsel %vm2690_vm11, %v2658_v44, %v2722_v25  ;;  %v6315_v41 = vadd.f32 %v6314_v56, %v7860_v29 }
 0x30e   : > { %v6320_v22 = vadd.f32 %v7777_v54, %v5458_v5  ;;  %v2832_v15 = vsel %vm781_vm7, %v2800_v19, %v2801_v36  ;;  %v2912_v30 = vsel %vm862_vm6, %v2880_v4, %v2881_v8  ;;  %v2802_v37 = vrot.slane %v2754_v6, 1 }
 0x30f   : > { %v2659_v55 = vadd.f32 %v6315_v41, %v7853_v11  ;;  %v5459_v2 = vpop.f32.mrb[144].mxu1  ;;  %v8161_v3 = vpack.c.bf16 %v2832_v15, %v2833_v13  ;;  %v8163_v60 = vpack.c.bf16 %v2912_v30, %v2913_v62  ;;  %v2882_v31 = vrot.slane %v2754_v6, 2 }
 0x310   : > { %v6321_v12 = vadd.f32 %v6320_v22, %v7865_v57  ;;  %v5460_v29 = vpop.f32.mrb[145].mxu1  ;;  %v2831_v54 = vsel %vm781_vm7, %v2801_v36, %v2802_v37  ;;  %v8168_v43 = vpack.c.bf16 %v2754_v6, %v2753_v58 }
 0x311   : > { %vm2691_vm12 = vcmp.ge.f32.partialorder %v2659_v55, 0.0  ;;  %v2723_v32 = vmul.f32 0.2, %v2659_v55  ;;  %v5461_v19 = vadd.f32 %v5460_v29, %v5459_v2  ;;  %v5462_v4 = vpop.f32.mrb[146].mxu1  ;;  %3365 = vmatprep.mubr.bf16.mxu1 %v8161_v3  ;;  %6133 = vmatprep.mubr.bf16.mxu0 %v8163_v60  ;;  %v2911_v27 = vsel %vm862_vm6, %v2881_v8, %v2882_v31 }
 0x312   : > { %v2660_v44 = vadd.f32 %v6321_v12, %v7853_v11  ;;  %v5463_v57 = vpop.f32.mrb[147].mxu1  ;;  %3366 = vmatmul.mubr.bf16.gmra.mrb[192].mxu1 %v8143_v26 }
 0x313   : > { %v2755_v28 = vsel %vm2691_vm12, %v2659_v55, %v2723_v32  ;;  %v6329_v16 = vadd.f32 %v7780_v59, %v5461_v19  ;;  %v5464_v40 = vadd.f32 %v5463_v57, %v5462_v4 }
 0x314   : > { %vm2692_vm13 = vcmp.ge.f32.partialorder %v2660_v44, 0.0  ;;  %v2724_v13 = vmul.f32 0.2, %v2660_v44  ;;  %v2803_v62 = vrot.slane %v2755_v28, 1  ;;  %v2883_v58 = vrot.slane %v2755_v28, 2 }
 0x315   : > { %v6330_v25 = vadd.f32 %v6329_v16, %v7885_v24  ;;  %v6335_v56 = vadd.f32 %v7783_v47, %v5464_v40 }
 0x316   : > { %v2756_v5 = vsel %vm2692_vm13, %v2660_v44, %v2724_v13  ;;  %v2830_v36 = vsel %vm781_vm7, %v2802_v37, %v2803_v62  ;;  %v2910_v8 = vsel %vm862_vm6, %v2882_v31, %v2883_v58 }
 0x317   : > { %v2661_v6 = vadd.f32 %v6330_v25, %v7853_v11  ;;  %v6336_v59 = vadd.f32 %v6335_v56, %v7903_v42  ;;  %v5465_v41 = vpop.f32.mrb[148].mxu1  ;;  %v8185_v22 = vpack.c.bf16 %v2830_v36, %v2831_v54  ;;  %v8187_v15 = vpack.c.bf16 %v2910_v8, %v2911_v27  ;;  %v8906_v8 = vld [vmem:[#allocation18_spill] sm:$0xff] }
 0x318   : > { %v5466_v30 = vpop.f32.mrb[149].mxu1  ;;  %v2804_v24 = vrot.slane %v2756_v5, 1  ;;  %v2884_v55 = vrot.slane %v2756_v5, 2  ;;  %v8189_v47 = vpack.c.bf16 %v2756_v5, %v2755_v28 }
 0x319   : > { %vm2693_vm14 = vcmp.ge.f32.partialorder %v2661_v6, 0.0  ;;  %v2725_v2 = vmul.f32 0.2, %v2661_v6  ;;  %v2662_v37 = vadd.f32 %v6336_v59, %v7853_v11  ;;  %v5467_v12 = vadd.f32 %v5466_v30, %v5465_v41  ;;  %v5468_v31 = vpop.f32.mrb[150].mxu1  ;;  %3373 = vmatprep.mubr.bf16.mxu1 %v8185_v22  ;;  %6134 = vmatmul.mubr.bf16.gmra.mrb[100].mxu0 %v8187_v15 }
 0x31a   : > { %v5469_v42 = vpop.f32.mrb[151].mxu1  ;;  %3374 = vmatmul.mubr.bf16.gmra.mrb[196].mxu1 %v8168_v43  ;;  %v2829_v29 = vsel %vm781_vm7, %v2803_v62, %v2804_v24  ;;  %v2909_v54 = vsel %vm862_vm6, %v2883_v58, %v2884_v55 }
 0x31b   : > { %v2757_v32 = vsel %vm2693_vm14, %v2661_v6, %v2725_v2  ;;  %vm2694_vm15 = vcmp.ge.f32.partialorder %v2662_v37, 0.0  ;;  %v2726_v19 = vmul.f32 0.2, %v2662_v37  ;;  %v6326_v4 = vadd.f32 %v7786_v53, %v5467_v12 }
 0x31c   : > { %v5470_v27 = vadd.f32 %v5469_v42, %v5468_v31  ;;  %v2805_v44 = vrot.slane %v2757_v32, 1  ;;  %v2885_v57 = vrot.slane %v2757_v32, 2  ;;  %v8907_v31 = vld [vmem:[#allocation6_spill] sm:$0xff] }
 0x31d   : > { %v2758_v28 = vsel %vm2694_vm15, %v2662_v37, %v2726_v19  ;;  %v6327_v16 = vadd.f32 %v6326_v4, %v7883_v23 }
 0x31e   : > { %v6332_v40 = vadd.f32 %v7789_v21, %v5470_v27  ;;  %v2828_v13 = vsel %vm781_vm7, %v2804_v24, %v2805_v44  ;;  %v2908_v62 = vsel %vm862_vm6, %v2884_v55, %v2885_v57  ;;  %v2806_v58 = vrot.slane %v2758_v28, 1  ;;  %v8908_v27 = vld [vmem:[#allocation7_spill] sm:$0xff] }
 0x31f   : > { %v2663_v25 = vadd.f32 %v6327_v16, %v7853_v11  ;;  %v5471_v56 = vpop.f32.mrb[152].mxu1  ;;  %v8207_v5 = vpack.c.bf16 %v2828_v13, %v2829_v29  ;;  %v8209_v53 = vpack.c.bf16 %v2908_v62, %v2909_v54  ;;  %v2886_v36 = vrot.slane %v2758_v28, 2 }
 0x320   : > { %v6333_v6 = vadd.f32 %v6332_v40, %v8906_v8  ;;  %v5472_v23 = vpop.f32.mrb[153].mxu1  ;;  %v2827_v21 = vsel %vm781_vm7, %v2805_v44, %v2806_v58  ;;  %v8214_v59 = vpack.c.bf16 %v2758_v28, %v2757_v32 }
 0x321   : > { %vm2695_vm0 = vcmp.ge.f32.partialorder %v2663_v25, 0.0  ;;  %v2727_v41 = vmul.f32 0.2, %v2663_v25  ;;  %v5473_v30 = vadd.f32 %v5472_v23, %v5471_v56  ;;  %v5474_v24 = vpop.f32.mrb[154].mxu1  ;;  %3381 = vmatprep.mubr.bf16.mxu1 %v8207_v5  ;;  %6137 = vmatprep.mubr.bf16.mxu0 %v8209_v53  ;;  %v2907_v55 = vsel %vm862_vm6, %v2885_v57, %v2886_v36 }
 0x322   : > { %v2664_v2 = vadd.f32 %v6333_v6, %v7853_v11  ;;  %v5475_v37 = vpop.f32.mrb[155].mxu1  ;;  %3382 = vmatmul.mubr.bf16.gmra.mrb[200].mxu1 %v8189_v47 }
 0x323   : > { %v2759_v12 = vsel %vm2695_vm0, %v2663_v25, %v2727_v41  ;;  %v6341_v42 = vadd.f32 %v8907_v31, %v5473_v30  ;;  %v5476_v29 = vadd.f32 %v5475_v37, %v5474_v24  ;;  %v8909_v37 = vld [vmem:[#allocation8_spill] sm:$0xff] }
 0x324   : > { %vm2696_vm1 = vcmp.ge.f32.partialorder %v2664_v2, 0.0  ;;  %v2728_v54 = vmul.f32 0.2, %v2664_v2  ;;  %v2807_v32 = vrot.slane %v2759_v12, 1  ;;  %v2887_v19 = vrot.slane %v2759_v12, 2 }
 0x325   : > { %v6342_v4 = vadd.f32 %v6341_v42, %v7920_v49  ;;  %v6347_v44 = vadd.f32 %v8908_v27, %v5476_v29  ;;  %v8910_v27 = vld [vmem:[#allocation9_spill] sm:$0xff] }
 0x326   : > { %v2760_v28 = vsel %vm2696_vm1, %v2664_v2, %v2728_v54  ;;  %v2826_v57 = vsel %vm781_vm7, %v2806_v58, %v2807_v32  ;;  %v2906_v16 = vsel %vm862_vm6, %v2886_v36, %v2887_v19 }
 0x327   : > { %v2665_v40 = vadd.f32 %v6342_v4, %v7853_v11  ;;  %v6348_v13 = vadd.f32 %v6347_v44, %v7931_v7  ;;  %v5477_v62 = vpop.f32.mrb[156].mxu1  ;;  %v8231_v25 = vpack.c.bf16 %v2826_v57, %v2827_v21  ;;  %v8233_v56 = vpack.c.bf16 %v2906_v16, %v2907_v55 }
 0x328   : > { %v5478_v8 = vpop.f32.mrb[157].mxu1  ;;  %v2808_v49 = vrot.slane %v2760_v28, 1  ;;  %v2888_v6 = vrot.slane %v2760_v28, 2  ;;  %v8235_v23 = vpack.c.bf16 %v2760_v28, %v2759_v12 }
 0x329   : > { %vm2697_vm2 = vcmp.ge.f32.partialorder %v2665_v40, 0.0  ;;  %v2729_v41 = vmul.f32 0.2, %v2665_v40  ;;  %v2666_v58 = vadd.f32 %v6348_v13, %v7853_v11  ;;  %v5479_v30 = vadd.f32 %v5478_v8, %v5477_v62  ;;  %v5480_v36 = vpop.f32.mrb[158].mxu1  ;;  %3389 = vmatprep.mubr.bf16.mxu1 %v8231_v25  ;;  %6138 = vmatmul.mubr.bf16.gmra.mrb[104].mxu0 %v8233_v56  ;;  %v8911_v8 = vld [vmem:[#allocation22_spill] sm:$0xff] }
 0x32a   : > { %v5481_v7 = vpop.f32.mrb[159].mxu1  ;;  %3390 = vmatmul.mubr.bf16.gmra.mrb[204].mxu1 %v8214_v59  ;;  %v2825_v21 = vsel %vm781_vm7, %v2807_v32, %v2808_v49  ;;  %v2905_v24 = vsel %vm862_vm6, %v2887_v19, %v2888_v6 }
 0x32b   : > { %v2761_v55 = vsel %vm2697_vm2, %v2665_v40, %v2729_v41  ;;  %vm2698_vm3 = vcmp.ge.f32.partialorder %v2666_v58, 0.0  ;;  %v2730_v2 = vmul.f32 0.2, %v2666_v58  ;;  %v6338_v12 = vadd.f32 %v8909_v37, %v5479_v30  ;;  %v8912_v37 = vld [vmem:[#allocation10_spill] sm:$0xff] }
 0x32c   : > { %v5482_v31 = vadd.f32 %v5481_v7, %v5480_v36  ;;  %v2809_v42 = vrot.slane %v2761_v55, 1  ;;  %v2889_v29 = vrot.slane %v2761_v55, 2 }
 0x32d   : > { %v2762_v54 = vsel %vm2698_vm3, %v2666_v58, %v2730_v2  ;;  %v6339_v4 = vadd.f32 %v6338_v12, %v7917_v14 }
 0x32e   : > { %v6344_v44 = vadd.f32 %v8910_v27, %v5482_v31  ;;  %v2824_v28 = vsel %vm781_vm7, %v2808_v49, %v2809_v42  ;;  %v2904_v32 = vsel %vm862_vm6, %v2888_v6, %v2889_v29  ;;  %v2810_v19 = vrot.slane %v2762_v54, 1  ;;  %v8913_v27 = vld [vmem:[#allocation11_spill] sm:$0xff] }
 0x32f   : > { %v2667_v57 = vadd.f32 %v6339_v4, %v7853_v11  ;;  %v5483_v16 = vpop.f32.mrb[160].mxu1  ;;  %v8253_v40 = vpack.c.bf16 %v2824_v28, %v2825_v21  ;;  %v8255_v13 = vpack.c.bf16 %v2904_v32, %v2905_v24  ;;  %v2890_v62 = vrot.slane %v2762_v54, 2 }
 0x330   : > { %v6345_v41 = vadd.f32 %v6344_v44, %v8911_v8  ;;  %v5484_v14 = vpop.f32.mrb[161].mxu1  ;;  %v2823_v58 = vsel %vm781_vm7, %v2809_v42, %v2810_v19  ;;  %v8260_v30 = vpack.c.bf16 %v2762_v54, %v2761_v55 }
 0x331   : > { %vm2699_vm4 = vcmp.ge.f32.partialorder %v2667_v57, 0.0  ;;  %v2731_v49 = vmul.f32 0.2, %v2667_v57  ;;  %v5485_v6 = vadd.f32 %v5484_v14, %v5483_v16  ;;  %v5486_v36 = vpop.f32.mrb[162].mxu1  ;;  %3397 = vmatprep.mubr.bf16.mxu1 %v8253_v40  ;;  %6141 = vmatprep.mubr.bf16.mxu0 %v8255_v13  ;;  %v2903_v7 = vsel %vm862_vm6, %v2889_v29, %v2890_v62 }
 0x332   : > { %v2668_v21 = vadd.f32 %v6345_v41, %v7853_v11  ;;  %v5487_v24 = vpop.f32.mrb[163].mxu1  ;;  %3398 = vmatmul.mubr.bf16.gmra.mrb[208].mxu1 %v8235_v23 }
 0x333   : > { %v2763_v2 = vsel %vm2699_vm4, %v2667_v57, %v2731_v49  ;;  %v6353_v55 = vadd.f32 %v8912_v37, %v5485_v6  ;;  %v5488_v12 = vadd.f32 %v5487_v24, %v5486_v36 }
 0x334   : > { %vm2700_vm5 = vcmp.ge.f32.partialorder %v2668_v21, 0.0  ;;  %v2732_v31 = vmul.f32 0.2, %v2668_v21  ;;  %v2811_v42 = vrot.slane %v2763_v2, 1  ;;  %v2891_v54 = vrot.slane %v2763_v2, 2 }
 0x335   : > { %v6354_v4 = vadd.f32 %v6353_v55, %v7954_v17  ;;  %v6359_v44 = vadd.f32 %v8913_v27, %v5488_v12  ;;  %v8914_v55 = vld [vmem:[#allocation12_spill] sm:$0xff] }
 0x336   : > { %v2764_v28 = vsel %vm2700_vm5, %v2668_v21, %v2732_v31  ;;  %v2822_v29 = vsel %vm781_vm7, %v2810_v19, %v2811_v42  ;;  %v2902_v32 = vsel %vm862_vm6, %v2890_v62, %v2891_v54  ;;  %v6729_v19 = vld [vmem:[%s8802_s4] ss:$0 sm:$0xff] }
 0x337   : > { %v2669_v57 = vadd.f32 %v6354_v4, %v7853_v11  ;;  %v6360_v16 = vadd.f32 %v6359_v44, %v7971_v18  ;;  %v5489_v8 = vpop.f32.mrb[164].mxu1  ;;  %v8277_v41 = vpack.c.bf16 %v2822_v29, %v2823_v58  ;;  %v8279_v14 = vpack.c.bf16 %v2902_v32, %v2903_v7  ;;  %v8915_v29 = vld [vmem:[#allocation13_spill] sm:$0xff] }
 0x338   : > { %v5490_v49 = vpop.f32.mrb[165].mxu1  ;;  %v2812_v17 = vrot.slane %v2764_v28, 1  ;;  %v2892_v6 = vrot.slane %v2764_v28, 2  ;;  %v8281_v36 = vpack.c.bf16 %v2764_v28, %v2763_v2 }
 0x339   : > { %vm2701_vm8 = vcmp.ge.f32.partialorder %v2669_v57, 0.0  ;;  %v2733_v21 = vmul.f32 0.2, %v2669_v57  ;;  %v2670_v62 = vadd.f32 %v6729_v19, %v6360_v16  ;;  %v5491_v11 = vadd.f32 %v5490_v49, %v5489_v8  ;;  %v5492_v24 = vpop.f32.mrb[166].mxu1  ;;  %3405 = vmatprep.mubr.bf16.mxu1 %v8277_v41  ;;  %6142 = vmatmul.mubr.bf16.gmra.mrb[108].mxu0 %v8279_v14 }
 0x33a   : > { %v5493_v18 = vpop.f32.mrb[167].mxu1  ;;  %3406 = vmatmul.mubr.bf16.gmra.mrb[212].mxu1 %v8260_v30  ;;  %v2821_v58 = vsel %vm781_vm7, %v2811_v42, %v2812_v17  ;;  %v2901_v7 = vsel %vm862_vm6, %v2891_v54, %v2892_v6 }
 0x33b   : > { %v2765_v2 = vsel %vm2701_vm8, %v2669_v57, %v2733_v21  ;;  %vm2702_vm9 = vcmp.ge.f32.partialorder %v2670_v62, 0.0  ;;  %v2734_v37 = vmul.f32 0.2, %v2670_v62  ;;  %v6350_v12 = vadd.f32 %v8914_v55, %v5491_v11 }
 0x33c   : > { %v5494_v31 = vadd.f32 %v5493_v18, %v5492_v24  ;;  %v2813_v4 = vrot.slane %v2765_v2, 1  ;;  %v2893_v27 = vrot.slane %v2765_v2, 2 }
 0x33d   : > { %v2766_v44 = vsel %vm2702_vm9, %v2670_v62, %v2734_v37  ;;  %v6351_v28 = vadd.f32 %v6350_v12, %v7945_v20 }
 0x33e   : > { %v6356_v32 = vadd.f32 %v8915_v29, %v5494_v31  ;;  %v2820_v16 = vsel %vm781_vm7, %v2812_v17, %v2813_v4  ;;  %v2900_v42 = vsel %vm862_vm6, %v2892_v6, %v2893_v27  ;;  %v2814_v54 = vrot.slane %v2766_v44, 1 }
 0x33f   : > { %v2671_v57 = vadd.f32 %v6729_v19, %v6351_v28  ;;  %v8300_v8 = vpack.c.bf16 %v2820_v16, %v2821_v58  ;;  %v8302_v49 = vpack.c.bf16 %v2900_v42, %v2901_v7  ;;  %v2894_v21 = vrot.slane %v2766_v44, 2  ;;  %v8916_v28 = vld [vmem:[#allocation14_spill] sm:$0xff] }
 0x340   : > { %v6357_v11 = vadd.f32 %v6356_v32, %v7964_v61  ;;  %v2819_v20 = vsel %vm781_vm7, %v2813_v4, %v2814_v54  ;;  %v8307_v62 = vpack.c.bf16 %v2766_v44, %v2765_v2  ;;  %v8917_v29 = vrot.slane %v8916_v28, 1 }
 0x341   : > { %vm2703_vm10 = vcmp.ge.f32.partialorder %v2671_v57, 0.0  ;;  %v2735_v24 = vmul.f32 0.2, %v2671_v57  ;;  %3413 = vmatprep.mubr.bf16.mxu1 %v8300_v8  ;;  %6145 = vmatprep.mubr.bf16.mxu0 %v8302_v49  ;;  %v2899_v17 = vsel %vm862_vm6, %v2893_v27, %v2894_v21 }
 0x342   : > { %v2672_v6 = vadd.f32 %v6729_v19, %v6357_v11  ;;  %3414 = vmatmul.mubr.bf16.gmra.mrb[216].mxu1 %v8281_v36  ;;  %v8919_v11 = vmov 0  }
 0x343   : > { %v2767_v18 = vsel %vm2703_vm10, %v2671_v57, %v2735_v24  ;;  %v8921_v24 = vld [vmem:[#allocation16_spill] sm:$0xff] }
 0x344   : > { %vm2704_vm11 = vcmp.ge.f32.partialorder %v2672_v6, 0.0  ;;  %v2736_v61 = vmul.f32 0.2, %v2672_v6  ;;  %v2815_v58 = vrot.slane %v2767_v18, 1  ;;  %v2895_v7 = vrot.slane %v2767_v18, 2 }
 0x346   : > { %v2768_v37 = vsel %vm2704_vm11, %v2672_v6, %v2736_v61  ;;  %v2818_v2 = vsel %vm781_vm7, %v2814_v54, %v2815_v58  ;;  %v2898_v55 = vsel %vm862_vm6, %v2894_v21, %v2895_v7  ;;  %v8918_v54 = vrot.slane %v8916_v28, 2  ;;  %v6707_v6 = vld [vmem:[%s8803_s5 + $0x1c8] sm:$0xff]  }
 0x347   : > { %v8318_v12 = vpack.c.bf16 %v2818_v2, %v2819_v20  ;;  %v8320_v31 = vpack.c.bf16 %v2898_v55, %v2899_v17  ;;  %v2816_v4 = vrot.slane %v2768_v37, 1  ;;  %v2896_v19 = vrot.slane %v2768_v37, 2  ;;  %v8920_v20 = vld [vmem:[#allocation19_spill] sm:$0xff]  ;;  %v6709_v2 = vld [vmem:[%s8803_s5 + $0x1d0] sm:$0xff]  }
 0x348   : > { %v8322_v27 = vpack.c.bf16 %v2768_v37, %v2767_v18  ;;  %v8922_v17 = vpack.c.bf16 %v8920_v20, %v8921_v24  ;;  %v8923_v18 = vld [vmem:[#allocation24_spill] sm:$0xff]  ;;  %v6708_v61 = vld [vmem:[%s8803_s5 + $0x188] sm:$0xff]  }
 0x349   : > { %3419 = vmatprep.mubr.bf16.mxu1 %v8318_v12  ;;  %6146 = vmatmul.mubr.bf16.gmra.mrb[112].mxu0 %v8320_v31  ;;  %v2817_v44 = vsel %vm781_vm7, %v2815_v58, %v2816_v4  ;;  %v2848_v32 = vsel %vm781_vm7, %v2816_v4, %v8917_v29  ;;  %v2897_v16 = vsel %vm862_vm6, %v2895_v7, %v2896_v19  ;;  %v8924_v58 = vld [vmem:[#allocation20_spill] sm:$0xff]  ;;  %v8925_v7 = vld [vmem:[#allocation17_spill] sm:$0xff]  ;;  %v8929_v29 = vld [vmem:[#allocation23_spill] sm:$0xff] }
 0x34a   : > { %3420 = vmatmul.mubr.bf16.gmra.mrb[220].mxu1 %v8307_v62  ;;  %v8335_v42 = vpack.c.bf16 %v2848_v32, %v2817_v44  ;;  %v2928_v57 = vsel %vm862_vm6, %v2896_v19, %v8918_v54  ;;  %v8926_v37 = vpack.c.bf16 %v8924_v58, %v8925_v7  ;;  %v6710_v55 = vld [vmem:[%s8803_s5 + $0x190] sm:$0xff]   ;;  %v6711_v4 = vld [vmem:[%s8803_s5 + $0x1d8] sm:$0xff]   ;;  %v8927_v19 = vld [vmem:[#allocation15_spill] sm:$0xff] }
 0x34b   : > { %v8341_v21 = vpack.c.bf16 %v2928_v57, %v2897_v16  ;;  %v8928_v44 = vpack.c.bf16 %v8927_v19, %v8916_v28  ;;  %v6712_v32 = vld [vmem:[%s8803_s5 + $0x198] sm:$0xff]   ;;  %v6713_v16 = vld [vmem:[%s8803_s5 + $0x1e0] sm:$0xff]   ;;  %v6715_v54 = vld [vmem:[%s8803_s5 + $0x1e8] sm:$0xff]  }
 0x34c   : > { %3425 = vmatprep.mubr.bf16.mxu1 %v8335_v42  ;;  %v6714_v28 = vld [vmem:[%s8803_s5 + $0x1a0] sm:$0xff]   ;;  %v8930_v57 = vld [vmem:[#allocation21_spill] sm:$0xff]  ;;  %v6716_v20 = vld [vmem:[%s8803_s5 + $0x1a8] sm:$0xff]  }
 0x34d   : > { %6149 = vmatprep.mubr.bf16.mxu0 %v8341_v21  ;;  %v6717_v24 = vld [vmem:[%s8803_s5 + $0x1f0] sm:$0xff]  }
 0x34e   : > { %v6723_v58 = vld [vmem:[%s8803_s5 + $0x210] sm:$0xff]  }
 0x351   : > { %6150 = vmatmul.mubr.bf16.gmra.mrb[116].mxu0 %v8919_v11 }
 0x352   : > { %3426 = vmatmul.mubr.bf16.gmra.mrb[224].mxu1 %v8322_v27  ;;  %6169 = vmatprep.mubr.bf16.mxu0 %v8922_v17  ;;  %v6718_v17 = vld [vmem:[%s8803_s5 + $0x1b0] sm:$0xff]  }
 0x353   : > { %3431 = vmatprep.mubr.bf16.mxu1 %v8919_v11 }
 0x359   : > { %6170 = vmatmul.mubr.bf16.vlgmr.msra.gmra.mrb[88].mxu0 %v8923_v18  ;;  %v6721_v18 = vld [vmem:[%s8803_s5 + $0x200] sm:$0xff]  }
 0x35a   : > { %5792 = vmatpush3.bf16.msra.mxu0 %v6702_v50  ;;  %3432 = vmatmul.mubr.bf16.gmra.mrb[228].mxu1 %v8919_v11  ;;  %v6719_v50 = vld [vmem:[%s8803_s5 + $0x1f8] sm:$0xff]  }
 0x35b   : > { %6173 = vmatprep.mubr.bf16.mxu0 %v7991_v33  ;;  %3767 = vmatprep.mubr.bf16.mxu1 %v8926_v37 }
 0x35c   : > { %5793 = vmatprep.subr.bf16.mxu0 %v6707_v6  ;;  %v6720_v6 = vld [vmem:[%s8803_s5 + $0x1b8] sm:$0xff]  }
 0x35e   : > { %5794 = vmatpush3.bf16.msra.mxu0 %v6708_v61  ;;  %v6722_v61 = vld [vmem:[%s8803_s5 + $0x208] sm:$0xff]  }
 0x35f   : > { %5795 = vmatprep.subr.bf16.mxu0 %v6709_v2 }
 0x361   : > { %6174 = vmatmul.mubr.bf16.gmra.mrb[92].mxu0 %v8032_v10 }
 0x362   : > { %3768 = vmatmul.mubr.bf16.vlgmr.msra.gmra.mrb[232].mxu1 %v8928_v44  ;;  %6177 = vmatprep.mubr.bf16.mxu0 %v8071_v1 }
 0x363   : > { %3775 = vmatprep.mubr.bf16.mxu1 %v8929_v29  ;;  %5796 = vmatpush3.bf16.msra.mxu0 %v6710_v55 }
 0x364   : > { %5797 = vmatprep.subr.bf16.mxu0 %v6711_v4 }
 0x367   : > { %5798 = vmatpush3.bf16.msra.mxu0 %v6712_v32 }
 0x368   : > { %5799 = vmatprep.subr.bf16.mxu0 %v6713_v16 }
 0x369   : > { %6178 = vmatmul.mubr.bf16.gmra.mrb[96].mxu0 %v8111_v34 }
 0x36a   : > { %3776 = vmatmul.mubr.bf16.gmra.mrb[236].mxu1 %v8930_v57  ;;  %6181 = vmatprep.mubr.bf16.mxu0 %v8141_v45 }
 0x36b   : > { %3783 = vmatprep.mubr.bf16.mxu1 %v7989_v38  ;;  %5800 = vmatpush3.bf16.msra.mxu0 %v6714_v28 }
 0x36c   : > { %5801 = vmatprep.subr.bf16.mxu0 %v6715_v54 }
 0x36f   : > { %5802 = vmatpush3.bf16.msra.mxu0 %v6716_v20 }
 0x370   : > { %5803 = vmatprep.subr.bf16.mxu0 %v6717_v24 }
 0x371   : > { %6182 = vmatmul.mubr.bf16.gmra.mrb[100].mxu0 %v8163_v60 }
 0x372   : > { %3784 = vmatmul.mubr.bf16.gmra.mrb[240].mxu1 %v7959_v0  ;;  %6185 = vmatprep.mubr.bf16.mxu0 %v8187_v15 }
 0x373   : > { %3791 = vmatprep.mubr.bf16.mxu1 %v8030_v51  ;;  %5804 = vmatpush3.bf16.msra.mxu0 %v6718_v17 }
 0x374   : > { %5805 = vmatprep.subr.bf16.mxu0 %v6719_v50 }
 0x377   : > { %5806 = vmatpush3.bf16.msra.mxu0 %v6720_v6 }
 0x378   : > { %6201 = vmatprep.subr.bf16.mxu0 %v6721_v18 }
 0x379   : > { %6186 = vmatmul.mubr.bf16.gmra.mrb[104].mxu0 %v8209_v53 }
 0x37a   : > { %3792 = vmatmul.mubr.bf16.gmra.mrb[244].mxu1 %v7999_v39  ;;  %6189 = vmatprep.mubr.bf16.mxu0 %v8233_v56 }
 0x37b   : > { %3799 = vmatprep.mubr.bf16.mxu1 %v8069_v35 }
 0x381   : > { %6190 = vmatmul.mubr.bf16.gmra.mrb[108].mxu0 %v8255_v13 }
 0x382   : > { %3800 = vmatmul.mubr.bf16.gmra.mrb[248].mxu1 %v8043_v52  ;;  %6193 = vmatprep.mubr.bf16.mxu0 %v8279_v14 }
 0x383   : > { %3807 = vmatprep.mubr.bf16.mxu1 %v8109_v48 }
 0x389   : > { %6194 = vmatmul.mubr.bf16.gmra.mrb[120].mxu0 %v8302_v49 }
 0x38a   : > { %3808 = vmatmul.mubr.bf16.gmra.mrb[252].mxu1 %v8079_v9  ;;  %6197 = vmatprep.mubr.bf16.mxu0 %v8320_v31 }
 0x38b   : > { %3815 = vmatprep.mubr.bf16.mxu1 %v8139_v46 }
 0x391   : > { %6198 = vmatmul.mubr.bf16.gmra.mrb[124].mxu0 %v8341_v21 }
 0x392   : > { %3816 = vmatmul.mubr.bf16.gmra.mrb[0].mxu1 %v8119_v63  ;;  %4314 = vmatprep.mubr.bf16.mxu0 %v7989_v38  ;;  %v6724_v38 = vld [vmem:[%s8803_s5 + $0x218] sm:$0xff]  }
 0x393   : > { %3823 = vmatprep.mubr.bf16.mxu1 %v8161_v3 }
 0x399   : > { %4315 = vmatmul.mubr.bf16.vlgmr.msra.gmra.mrb[128].mxu0 %v7959_v0  ;;  %v6725_v0 = vld [vmem:[%s8803_s5 + $0x220] sm:$0xff]  }
 0x39a   : > { %6202 = vmatpush3.bf16.msra.mxu0 %v6721_v18  ;;  %3824 = vmatmul.mubr.bf16.gmra.mrb[4].mxu1 %v8143_v26 }
 0x39b   : > { %4322 = vmatprep.mubr.bf16.mxu0 %v8030_v51  ;;  %3831 = vmatprep.mubr.bf16.mxu1 %v8185_v22  ;;  %v6726_v51 = vld [vmem:[%s8803_s5 + $0x228] sm:$0xff]  }
 0x39c   : > { %6203 = vmatprep.subr.bf16.mxu0 %v6722_v61 }
 0x39e   : > { %6204 = vmatpush3.bf16.msra.mxu0 %v6722_v61 }
 0x39f   : > { %6205 = vmatprep.subr.bf16.mxu0 %v6723_v58 }
 0x3a1   : > { %4323 = vmatmul.mubr.bf16.gmra.mrb[132].mxu0 %v7999_v39  ;;  %v6727_v39 = vld [vmem:[%s8803_s5 + $0x230] sm:$0xff]  }
 0x3a2   : > { %3832 = vmatmul.mubr.bf16.gmra.mrb[8].mxu1 %v8168_v43  ;;  %4330 = vmatprep.mubr.bf16.mxu0 %v8069_v35  ;;  %v6728_v35 = vld [vmem:[%s8803_s5 + $0x238] sm:$0xff]  }
 0x3a3   : > { %3839 = vmatprep.mubr.bf16.mxu1 %v8207_v5  ;;  %6206 = vmatpush3.bf16.msra.mxu0 %v6723_v58 }
 0x3a4   : > { %6207 = vmatprep.subr.bf16.mxu0 %v6724_v38 }
 0x3a7   : > { %6208 = vmatpush3.bf16.msra.mxu0 %v6724_v38 }
 0x3a8   : > { %6209 = vmatprep.subr.bf16.mxu0 %v6725_v0 }
 0x3a9   : > { %4331 = vmatmul.mubr.bf16.gmra.mrb[136].mxu0 %v8043_v52 }
 0x3aa   : > { %3840 = vmatmul.mubr.bf16.gmra.mrb[12].mxu1 %v8189_v47  ;;  %4338 = vmatprep.mubr.bf16.mxu0 %v8109_v48 }
 0x3ab   : > { %3847 = vmatprep.mubr.bf16.mxu1 %v8231_v25  ;;  %6210 = vmatpush3.bf16.msra.mxu0 %v6725_v0 }
 0x3ac   : > { %6211 = vmatprep.subr.bf16.mxu0 %v6726_v51 }
 0x3af   : > { %6212 = vmatpush3.bf16.msra.mxu0 %v6726_v51 }
 0x3b0   : > { %6213 = vmatprep.subr.bf16.mxu0 %v6727_v39 }
 0x3b1   : > { %4339 = vmatmul.mubr.bf16.gmra.mrb[140].mxu0 %v8079_v9 }
 0x3b2   : > { %3848 = vmatmul.mubr.bf16.gmra.mrb[16].mxu1 %v8214_v59  ;;  %4346 = vmatprep.mubr.bf16.mxu0 %v8139_v46 }
 0x3b3   : > { %3855 = vmatprep.mubr.bf16.mxu1 %v8253_v40  ;;  %6214 = vmatpush3.bf16.msra.mxu0 %v6727_v39 }
 0x3b4   : > { %6215 = vmatprep.subr.bf16.mxu0 %v6728_v35 }
 0x3b5   : > { %v5535_v52 = vpop.f32.mrb[168].mxu1 }
 0x3b6   : > { %v5536_v48 = vpop.f32.mrb[169].mxu1 }
 0x3b7   : > { %v8472_v7 = vadd.f32 %v5536_v48, %v5535_v52  ;;  %v5538_v37 = vpop.f32.mrb[170].mxu1  ;;  %6216 = vmatpush3.bf16.msra.mxu0 %v6728_v35 }
 0x3b8   : > { %v5539_v2 = vpop.f32.mrb[171].mxu1 }
 0x3b9   : > { %v8474_v55 = vadd.f32 %v5539_v2, %v5538_v37  ;;  %4347 = vmatmul.mubr.bf16.gmra.mrb[144].mxu0 %v8119_v63 }
 0x3ba   : > { %3856 = vmatmul.mubr.bf16.gmra.mrb[20].mxu1 %v8235_v23  ;;  %4354 = vmatprep.mubr.bf16.mxu0 %v8161_v3 }
 0x3bb   : > { %3863 = vmatprep.mubr.bf16.mxu1 %v8277_v41 }
 0x3bd   : > { %v5541_v9 = vpop.f32.mrb[172].mxu1 }
 0x3be   : > { %v5542_v46 = vpop.f32.mrb[173].mxu1 }
 0x3bf   : > { %v8480_v4 = vadd.f32 %v5542_v46, %v5541_v9  ;;  %v5544_v19 = vpop.f32.mrb[174].mxu1 }
 0x3c0   : > { %v5545_v44 = vpop.f32.mrb[175].mxu1 }
 0x3c1   : > { %v8482_v29 = vadd.f32 %v5545_v44, %v5544_v19  ;;  %4355 = vmatmul.mubr.bf16.gmra.mrb[148].mxu0 %v8143_v26 }
 0x3c2   : > { %3864 = vmatmul.mubr.bf16.gmra.mrb[24].mxu1 %v8260_v30  ;;  %4362 = vmatprep.mubr.bf16.mxu0 %v8185_v22 }
 0x3c3   : > { %3869 = vmatprep.mubr.bf16.mxu1 %v8300_v8 }
 0x3c5   : > { %v5547_v63 = vpop.f32.mrb[176].mxu1 }
 0x3c6   : > { %v5548_v3 = vpop.f32.mrb[177].mxu1 }
 0x3c7   : > { %v8488_v32 = vadd.f32 %v5548_v3, %v5547_v63  ;;  %v5550_v16 = vpop.f32.mrb[178].mxu1 }
 0x3c8   : > { %v5551_v28 = vpop.f32.mrb[179].mxu1 }
 0x3c9   : > { %v8490_v54 = vadd.f32 %v5551_v28, %v5550_v16  ;;  %4363 = vmatmul.mubr.bf16.gmra.mrb[152].mxu0 %v8168_v43 }
 0x3ca   : > { %3870 = vmatmul.mubr.bf16.gmra.mrb[28].mxu1 %v8281_v36  ;;  %4370 = vmatprep.mubr.bf16.mxu0 %v8207_v5 }
 0x3cb   : > { %3875 = vmatprep.mubr.bf16.mxu1 %v8318_v12 }
 0x3cd   : > { %v5553_v26 = vpop.f32.mrb[180].mxu1 }
 0x3ce   : > { %v5554_v22 = vpop.f32.mrb[181].mxu1 }
 0x3cf   : > { %v8496_v57 = vadd.f32 %v5554_v22, %v5553_v26  ;;  %v5556_v20 = vpop.f32.mrb[182].mxu1 }
 0x3d0   : > { %v5557_v24 = vpop.f32.mrb[183].mxu1 }
 0x3d1   : > { %v8498_v17 = vadd.f32 %v5557_v24, %v5556_v20  ;;  %4371 = vmatmul.mubr.bf16.gmra.mrb[156].mxu0 %v8189_v47 }
 0x3d2   : > { %3876 = vmatmul.mubr.bf16.gmra.mrb[32].mxu1 %v8307_v62  ;;  %4378 = vmatprep.mubr.bf16.mxu0 %v8231_v25 }
 0x3d3   : > { %3881 = vmatprep.mubr.bf16.mxu1 %v8335_v42 }
 0x3d5   : > { %v5559_v43 = vpop.f32.mrb[184].mxu1 }
 0x3d6   : > { %v5560_v5 = vpop.f32.mrb[185].mxu1 }
 0x3d7   : > { %v8504_v50 = vadd.f32 %v5560_v5, %v5559_v43  ;;  %v5562_v6 = vpop.f32.mrb[186].mxu1 }
 0x3d8   : > { %v5563_v18 = vpop.f32.mrb[187].mxu1 }
 0x3d9   : > { %v8506_v61 = vadd.f32 %v5563_v18, %v5562_v6  ;;  %4379 = vmatmul.mubr.bf16.gmra.mrb[160].mxu0 %v8214_v59 }
 0x3da   : > { %3882 = vmatmul.mubr.bf16.gmra.mrb[36].mxu1 %v8322_v27  ;;  %4386 = vmatprep.mubr.bf16.mxu0 %v8253_v40 }
 0x3dd   : > { %v5565_v47 = vpop.f32.mrb[188].mxu1 }
 0x3de   : > { %v5566_v58 = vpop.f32.mrb[189].mxu1 }
 0x3df   : > { %v8511_v38 = vadd.f32 %v5566_v58, %v5565_v47  ;;  %v5568_v25 = vpop.f32.mrb[190].mxu1 }
 0x3e0   : > { %v5569_v0 = vpop.f32.mrb[191].mxu1 }
 0x3e1   : > { %v8513_v51 = vadd.f32 %v5569_v0, %v5568_v25  ;;  %4387 = vmatmul.mubr.bf16.gmra.mrb[164].mxu0 %v8235_v23 }
 0x3e2   : > { %4394 = vmatprep.mubr.bf16.mxu0 %v8277_v41 }
 0x3e5   : > { %v5571_v39 = vpop.f32.mrb[192].mxu1 }
 0x3e6   : > { %v5572_v35 = vpop.f32.mrb[193].mxu1 }
 0x3e7   : > { %v8517_v52 = vadd.f32 %v5572_v35, %v5571_v39  ;;  %v5574_v59 = vpop.f32.mrb[194].mxu1 }
 0x3e8   : > { %v5575_v48 = vpop.f32.mrb[195].mxu1 }
 0x3e9   : > { %v8519_v37 = vadd.f32 %v5575_v48, %v5574_v59  ;;  %4395 = vmatmul.mubr.bf16.gmra.mrb[168].mxu0 %v8260_v30 }
 0x3ea   : > { %4402 = vmatprep.mubr.bf16.mxu0 %v8300_v8 }
 0x3ed   : > { %v5577_v40 = vpop.f32.mrb[196].mxu1 }
 0x3ee   : > { %v5578_v2 = vpop.f32.mrb[197].mxu1 }
 0x3ef   : > { %v8523_v9 = vadd.f32 %v5578_v2, %v5577_v40  ;;  %v5580_v46 = vpop.f32.mrb[198].mxu1 }
 0x3f0   : > { %v5581_v23 = vpop.f32.mrb[199].mxu1 }
 0x3f1   : > { %v8525_v19 = vadd.f32 %v5581_v23, %v5580_v46  ;;  %4403 = vmatmul.mubr.bf16.gmra.mrb[172].mxu0 %v8281_v36 }
 0x3f2   : > { %4410 = vmatprep.mubr.bf16.mxu0 %v8318_v12 }
 0x3f5   : > { %v5583_v41 = vpop.f32.mrb[200].mxu1 }
 0x3f6   : > { %v5584_v44 = vpop.f32.mrb[201].mxu1 }
 0x3f7   : > { %v8529_v63 = vadd.f32 %v5584_v44, %v5583_v41  ;;  %v5586_v3 = vpop.f32.mrb[202].mxu1 }
 0x3f8   : > { %v5587_v30 = vpop.f32.mrb[203].mxu1 }
 0x3f9   : > { %v8531_v16 = vadd.f32 %v5587_v30, %v5586_v3  ;;  %4411 = vmatmul.mubr.bf16.gmra.mrb[176].mxu0 %v8307_v62 }
 0x3fa   : > { %4416 = vmatprep.mubr.bf16.mxu0 %v8335_v42 }
 0x3fd   : > { %v5589_v8 = vpop.f32.mrb[204].mxu1 }
 0x3fe   : > { %v5590_v28 = vpop.f32.mrb[205].mxu1 }
 0x3ff   : > { %v8535_v26 = vadd.f32 %v5590_v28, %v5589_v8  ;;  %v5592_v22 = vpop.f32.mrb[206].mxu1 }
 0x400   : > { %v5593_v36 = vpop.f32.mrb[207].mxu1 }
 0x401   : > { %v8537_v20 = vadd.f32 %v5593_v36, %v5592_v22  ;;  %4417 = vmatmul.mubr.bf16.gmra.mrb[180].mxu0 %v8322_v27 }
 0x402   : > { %4422 = vmatprep.mubr.bf16.mxu0 %v8919_v11 }
 0x405   : > { %v5595_v12 = vpop.f32.mrb[208].mxu1 }
 0x406   : > { %v5596_v24 = vpop.f32.mrb[209].mxu1 }
 0x407   : > { %v8541_v43 = vadd.f32 %v5596_v24, %v5595_v12  ;;  %v5598_v5 = vpop.f32.mrb[210].mxu1 }
 0x408   : > { %v5599_v62 = vpop.f32.mrb[211].mxu1 }
 0x409   : > { %v8543_v6 = vadd.f32 %v5599_v62, %v5598_v5  ;;  %4423 = vmatmul.mubr.bf16.gmra.mrb[184].mxu0 %v8919_v11 }
 0x40a   : > { %4428 = vmatprep.mubr.bf16.mxu0 %v8919_v11 }
 0x40d   : > { %v5601_v42 = vpop.f32.mrb[212].mxu1 }
 0x40e   : > { %v5602_v18 = vpop.f32.mrb[213].mxu1 }
 0x40f   : > { %v8547_v47 = vadd.f32 %v5602_v18, %v5601_v42  ;;  %v5604_v58 = vpop.f32.mrb[214].mxu1 }
 0x410   : > { %v5605_v27 = vpop.f32.mrb[215].mxu1 }
 0x411   : > { %v8549_v25 = vadd.f32 %v5605_v27, %v5604_v58  ;;  %4429 = vmatmul.mubr.bf16.gmra.mrb[188].mxu0 %v8919_v11 }
 0x412   : > { %6217 = vmatprep.mubr.bf16.mxu0 %v7991_v33 }
 0x415   : > { %v5607_v0 = vpop.f32.mrb[216].mxu1 }
 0x416   : > { %v5608_v39 = vpop.f32.mrb[217].mxu1 }
 0x417   : > { %v5610_v35 = vpop.f32.mrb[218].mxu1 }
 0x418   : > { %v5611_v59 = vpop.f32.mrb[219].mxu1 }
 0x419   : > { %6218 = vmatmul.mubr.bf16.vlgmr.msra.gmra.mrb[88].mxu0 %v8032_v10 }
 0x41a   : > { %6221 = vmatprep.mubr.bf16.mxu0 %v8071_v1 }
 0x41c   : > { %v6147_v48 = vpop.f32.mrb[112].mxu0 }
 0x41d   : > { %v5613_v40 = vpop.f32.mrb[220].mxu1  ;;  %v3568_v2 = vpop.f32.mrb[113].mxu0 }
 0x41e   : > { %v5614_v46 = vpop.f32.mrb[221].mxu1  ;;  %v6148_v23 = vpop.f32.mrb[114].mxu0 }
 0x41f   : > { %v5616_v41 = vpop.f32.mrb[222].mxu1  ;;  %v3570_v44 = vpop.f32.mrb[115].mxu0 }
 0x420   : > { %v5617_v3 = vpop.f32.mrb[223].mxu1 }
 0x421   : > { %6222 = vmatmul.mubr.bf16.gmra.mrb[92].mxu0 %v8111_v34 }
 0x422   : > { %6225 = vmatprep.mubr.bf16.mxu0 %v8141_v45 }
 0x424   : > { %v6151_v33 = vpop.f32.mrb[116].mxu0 }
 0x425   : > { %v5619_v30 = vpop.f32.mrb[224].mxu1  ;;  %v3580_v8 = vpop.f32.mrb[117].mxu0 }
 0x426   : > { %v5620_v28 = vpop.f32.mrb[225].mxu1  ;;  %v6152_v22 = vpop.f32.mrb[118].mxu0 }
 0x427   : > { %v5622_v10 = vpop.f32.mrb[226].mxu1  ;;  %v3582_v36 = vpop.f32.mrb[119].mxu0 }
 0x428   : > { %v5623_v1 = vpop.f32.mrb[227].mxu1 }
 0x429   : > { %6226 = vmatmul.mubr.bf16.gmra.mrb[96].mxu0 %v8163_v60 }
 0x42a   : > { %6229 = vmatprep.mubr.bf16.mxu0 %v8187_v15 }
 0x42d   : > { %v5625_v12 = vpop.f32.mrb[228].mxu1 }
 0x42e   : > { %v5626_v24 = vpop.f32.mrb[229].mxu1 }
 0x42f   : > { %v5628_v5 = vpop.f32.mrb[230].mxu1 }
 0x430   : > { %v5629_v62 = vpop.f32.mrb[231].mxu1 }
 0x431   : > { %6230 = vmatmul.mubr.bf16.gmra.mrb[100].mxu0 %v8209_v53 }
 0x432   : > { %6233 = vmatprep.mubr.bf16.mxu0 %v8233_v56 }
 0x435   : > { %v5671_v34 = vpop.f32.mrb[232].mxu1 }
 0x436   : > { %v5672_v45 = vpop.f32.mrb[233].mxu1 }
 0x437   : > { %v5673_v42 = vadd.f32 %v5672_v45, %v5671_v34  ;;  %v5674_v18 = vpop.f32.mrb[234].mxu1 }
 0x438   : > { %v5675_v58 = vpop.f32.mrb[235].mxu1 }
 0x439   : > { %v8562_v27 = vadd.f32 %v5673_v42, %v8472_v7  ;;  %v5676_v0 = vadd.f32 %v5675_v58, %v5674_v18  ;;  %6234 = vmatmul.mubr.bf16.gmra.mrb[104].mxu0 %v8255_v13 }
 0x43a   : > { %6237 = vmatprep.mubr.bf16.mxu0 %v8279_v14 }
 0x43b   : > { %v8567_v60 = vadd.f32 %v5676_v0, %v8474_v55 }
 0x43d   : > { %v5677_v15 = vpop.f32.mrb[236].mxu1 }
 0x43e   : > { %v5678_v53 = vpop.f32.mrb[237].mxu1 }
 0x43f   : > { %v5679_v39 = vadd.f32 %v5678_v53, %v5677_v15  ;;  %v5680_v56 = vpop.f32.mrb[238].mxu1 }
 0x440   : > { %v5681_v35 = vpop.f32.mrb[239].mxu1 }
 0x441   : > { %v8570_v59 = vadd.f32 %v5679_v39, %v8480_v4  ;;  %v5682_v48 = vadd.f32 %v5681_v35, %v5680_v56  ;;  %6238 = vmatmul.mubr.bf16.gmra.mrb[108].mxu0 %v8302_v49 }
 0x442   : > { %6241 = vmatprep.mubr.bf16.mxu0 %v8320_v31 }
 0x443   : > { %v8575_v13 = vadd.f32 %v5682_v48, %v8482_v29 }
 0x445   : > { %v5683_v14 = vpop.f32.mrb[240].mxu1 }
 0x446   : > { %v5684_v7 = vpop.f32.mrb[241].mxu1 }
 0x447   : > { %v5685_v55 = vadd.f32 %v5684_v7, %v5683_v14  ;;  %v5686_v40 = vpop.f32.mrb[242].mxu1 }
 0x448   : > { %v5687_v2 = vpop.f32.mrb[243].mxu1 }
 0x449   : > { %v8578_v46 = vadd.f32 %v5685_v55, %v8488_v32  ;;  %v5688_v23 = vadd.f32 %v5687_v2, %v5686_v40  ;;  %6242 = vmatmul.mubr.bf16.gmra.mrb[192].mxu0 %v8341_v21 }
 0x44a   : > { %6245 = vmatprep.mubr.bf16.mxu0 %v8919_v11 }
 0x44b   : > { %v8583_v49 = vadd.f32 %v5688_v23, %v8490_v54 }
 0x44d   : > { %v5689_v31 = vpop.f32.mrb[244].mxu1 }
 0x44e   : > { %v5690_v4 = vpop.f32.mrb[245].mxu1 }
 0x44f   : > { %v5691_v29 = vadd.f32 %v5690_v4, %v5689_v31  ;;  %v5692_v41 = vpop.f32.mrb[246].mxu1 }
 0x450   : > { %v5693_v44 = vpop.f32.mrb[247].mxu1 }
 0x451   : > { %v8586_v3 = vadd.f32 %v5691_v29, %v8496_v57  ;;  %v5694_v33 = vadd.f32 %v5693_v44, %v5692_v41  ;;  %6246 = vmatmul.mubr.bf16.gmra.mrb[196].mxu0 %v8919_v11 }
 0x453   : > { %v8590_v32 = vadd.f32 %v5694_v33, %v8498_v17 }
 0x455   : > { %v5695_v21 = vpop.f32.mrb[248].mxu1 }
 0x456   : > { %v5696_v30 = vpop.f32.mrb[249].mxu1 }
 0x457   : > { %v5697_v8 = vadd.f32 %v5696_v30, %v5695_v21  ;;  %v5698_v28 = vpop.f32.mrb[250].mxu1 }
 0x458   : > { %v5699_v54 = vpop.f32.mrb[251].mxu1 }
 0x459   : > { %v8593_v22 = vadd.f32 %v5697_v8, %v8504_v50  ;;  %v5700_v10 = vadd.f32 %v5699_v54, %v5698_v28 }
 0x45b   : > { %v8596_v36 = vadd.f32 %v5700_v10, %v8506_v61 }
 0x45c   : > { %v6195_v57 = vpop.f32.mrb[120].mxu0 }
 0x45d   : > { %v5701_v1 = vpop.f32.mrb[252].mxu1  ;;  %v4018_v12 = vpop.f32.mrb[121].mxu0 }
 0x45e   : > { %v5702_v24 = vpop.f32.mrb[253].mxu1  ;;  %v6196_v11 = vpop.f32.mrb[122].mxu0 }
 0x45f   : > { %v5703_v5 = vadd.f32 %v5702_v24, %v5701_v1  ;;  %v5704_v17 = vpop.f32.mrb[254].mxu1  ;;  %v4020_v62 = vpop.f32.mrb[123].mxu0 }
 0x460   : > { %v5705_v34 = vpop.f32.mrb[255].mxu1 }
 0x461   : > { %v8599_v45 = vadd.f32 %v5703_v5, %v8511_v38  ;;  %v5706_v42 = vadd.f32 %v5705_v34, %v5704_v17 }
 0x463   : > { %v8602_v50 = vadd.f32 %v5706_v42, %v8513_v51 }
 0x464   : > { %v6199_v18 = vpop.f32.mrb[124].mxu0 }
 0x465   : > { %v5707_v58 = vpop.f32.mrb[0].mxu1  ;;  %v4030_v61 = vpop.f32.mrb[125].mxu0 }
 0x466   : > { %v5708_v0 = vpop.f32.mrb[1].mxu1  ;;  %v6200_v15 = vpop.f32.mrb[126].mxu0 }
 0x467   : > { %v5709_v53 = vadd.f32 %v5708_v0, %v5707_v58  ;;  %v5710_v39 = vpop.f32.mrb[2].mxu1  ;;  %v4032_v56 = vpop.f32.mrb[127].mxu0 }
 0x468   : > { %v5711_v35 = vpop.f32.mrb[3].mxu1 }
 0x469   : > { %v8605_v48 = vadd.f32 %v5709_v53, %v8517_v52  ;;  %v5712_v14 = vadd.f32 %v5711_v35, %v5710_v39 }
 0x46b   : > { %v8608_v38 = vadd.f32 %v5712_v14, %v8519_v37 }
 0x46c   : > { %v5807_v7 = vpop.f32.mrb[128].mxu0 }
 0x46d   : > { %v5713_v55 = vpop.f32.mrb[4].mxu1  ;;  %v5808_v51 = vpop.f32.mrb[129].mxu0 }
 0x46e   : > { %v5809_v40 = vadd.f32 %v5808_v51, %v5807_v7  ;;  %v5714_v2 = vpop.f32.mrb[5].mxu1  ;;  %v5810_v23 = vpop.f32.mrb[130].mxu0 }
 0x46f   : > { %v5715_v31 = vadd.f32 %v5714_v2, %v5713_v55  ;;  %v5716_v4 = vpop.f32.mrb[6].mxu1  ;;  %v5811_v29 = vpop.f32.mrb[131].mxu0 }
 0x470   : > { %v5812_v41 = vadd.f32 %v5811_v29, %v5810_v23  ;;  %v5717_v44 = vpop.f32.mrb[7].mxu1  ;;  %v8611_v33 = vadd.f32 %v8562_v27, %v5809_v40 }
 0x471   : > { %v8614_v52 = vadd.f32 %v5715_v31, %v8523_v9  ;;  %v5718_v21 = vadd.f32 %v5717_v44, %v5716_v4 }
 0x472   : > { %v8617_v37 = vadd.f32 %v8567_v60, %v5812_v41 }
 0x473   : > { %v8620_v30 = vadd.f32 %v5718_v21, %v8525_v19 }
 0x474   : > { %v5813_v8 = vpop.f32.mrb[132].mxu0 }
 0x475   : > { %v5719_v28 = vpop.f32.mrb[8].mxu1  ;;  %v5814_v54 = vpop.f32.mrb[133].mxu0 }
 0x476   : > { %v5815_v10 = vadd.f32 %v5814_v54, %v5813_v8  ;;  %v5720_v57 = vpop.f32.mrb[9].mxu1  ;;  %v5816_v1 = vpop.f32.mrb[134].mxu0 }
 0x477   : > { %v5721_v12 = vadd.f32 %v5720_v57, %v5719_v28  ;;  %v5722_v24 = vpop.f32.mrb[10].mxu1  ;;  %v5817_v27 = vpop.f32.mrb[135].mxu0 }
 0x478   : > { %v5818_v11 = vadd.f32 %v5817_v27, %v5816_v1  ;;  %v5723_v5 = vpop.f32.mrb[11].mxu1  ;;  %v8623_v9 = vadd.f32 %v8570_v59, %v5815_v10 }
 0x479   : > { %v8626_v60 = vadd.f32 %v5721_v12, %v8529_v63  ;;  %v5724_v17 = vadd.f32 %v5723_v5, %v5722_v24 }
 0x47a   : > { %v8629_v19 = vadd.f32 %v8575_v13, %v5818_v11 }
 0x47b   : > { %v8632_v62 = vadd.f32 %v5724_v17, %v8531_v16 }
 0x47c   : > { %v5819_v34 = vpop.f32.mrb[136].mxu0 }
 0x47d   : > { %v5725_v42 = vpop.f32.mrb[12].mxu1  ;;  %v5820_v18 = vpop.f32.mrb[137].mxu0 }
 0x47e   : > { %v5821_v58 = vadd.f32 %v5820_v18, %v5819_v34  ;;  %v5726_v61 = vpop.f32.mrb[13].mxu1  ;;  %v5822_v0 = vpop.f32.mrb[138].mxu0 }
 0x47f   : > { %v5727_v15 = vadd.f32 %v5726_v61, %v5725_v42  ;;  %v5728_v53 = vpop.f32.mrb[14].mxu1  ;;  %v5823_v59 = vpop.f32.mrb[139].mxu0 }
 0x480   : > { %v5824_v39 = vadd.f32 %v5823_v59, %v5822_v0  ;;  %v5729_v56 = vpop.f32.mrb[15].mxu1  ;;  %v8635_v63 = vadd.f32 %v8578_v46, %v5821_v58 }
 0x481   : > { %v8638_v13 = vadd.f32 %v5727_v15, %v8535_v26  ;;  %v5730_v35 = vadd.f32 %v5729_v56, %v5728_v53 }
 0x482   : > { %v8641_v16 = vadd.f32 %v8583_v49, %v5824_v39 }
 0x483   : > { %v8644_v14 = vadd.f32 %v5730_v35, %v8537_v20 }
 0x484   : > { %v5825_v7 = vpop.f32.mrb[140].mxu0 }
 0x485   : > { %v5731_v55 = vpop.f32.mrb[16].mxu1  ;;  %v5826_v51 = vpop.f32.mrb[141].mxu0 }
 0x486   : > { %v5827_v40 = vadd.f32 %v5826_v51, %v5825_v7  ;;  %v5732_v2 = vpop.f32.mrb[17].mxu1  ;;  %v5828_v23 = vpop.f32.mrb[142].mxu0 }
 0x487   : > { %v5733_v31 = vadd.f32 %v5732_v2, %v5731_v55  ;;  %v5734_v4 = vpop.f32.mrb[18].mxu1  ;;  %v5829_v46 = vpop.f32.mrb[143].mxu0 }
 0x488   : > { %v5830_v29 = vadd.f32 %v5829_v46, %v5828_v23  ;;  %v5735_v41 = vpop.f32.mrb[19].mxu1  ;;  %v8647_v26 = vadd.f32 %v8586_v3, %v5827_v40 }
 0x489   : > { %v8650_v49 = vadd.f32 %v5733_v31, %v8541_v43  ;;  %v5736_v44 = vadd.f32 %v5735_v41, %v5734_v4 }
 0x48a   : > { %v8653_v20 = vadd.f32 %v8590_v32, %v5830_v29 }
 0x48b   : > { %v8656_v21 = vadd.f32 %v5736_v44, %v8543_v6 }
 0x48c   : > { %v5831_v8 = vpop.f32.mrb[144].mxu0 }
 0x48d   : > { %v5737_v28 = vpop.f32.mrb[20].mxu1  ;;  %v5832_v54 = vpop.f32.mrb[145].mxu0 }
 0x48e   : > { %v5833_v10 = vadd.f32 %v5832_v54, %v5831_v8  ;;  %v5738_v57 = vpop.f32.mrb[21].mxu1  ;;  %v5834_v1 = vpop.f32.mrb[146].mxu0 }
 0x48f   : > { %v5739_v12 = vadd.f32 %v5738_v57, %v5737_v28  ;;  %v5740_v24 = vpop.f32.mrb[22].mxu1  ;;  %v5835_v3 = vpop.f32.mrb[147].mxu0 }
 0x490   : > { %v5836_v27 = vadd.f32 %v5835_v3, %v5834_v1  ;;  %v5741_v11 = vpop.f32.mrb[23].mxu1  ;;  %v8659_v43 = vadd.f32 %v8593_v22, %v5833_v10 }
 0x491   : > { %v8662_v32 = vadd.f32 %v5739_v12, %v8547_v47  ;;  %v5742_v5 = vadd.f32 %v5741_v11, %v5740_v24 }
 0x492   : > { %v8665_v6 = vadd.f32 %v8596_v36, %v5836_v27 }
 0x493   : > { %v8668_v17 = vadd.f32 %v5742_v5, %v8549_v25 }
 0x494   : > { %v5837_v34 = vpop.f32.mrb[148].mxu0 }
 0x495   : > { %v5743_v42 = vpop.f32.mrb[24].mxu1  ;;  %v5838_v18 = vpop.f32.mrb[149].mxu0 }
 0x496   : > { %v5839_v58 = vadd.f32 %v5838_v18, %v5837_v34  ;;  %v5744_v61 = vpop.f32.mrb[25].mxu1  ;;  %v5840_v0 = vpop.f32.mrb[150].mxu0 }
 0x497   : > { %v5746_v15 = vpop.f32.mrb[26].mxu1  ;;  %v5841_v53 = vpop.f32.mrb[151].mxu0 }
 0x498   : > { %v5842_v22 = vadd.f32 %v5841_v53, %v5840_v0  ;;  %v5747_v59 = vpop.f32.mrb[27].mxu1  ;;  %v8671_v47 = vadd.f32 %v8599_v45, %v5839_v58 }
 0x49a   : > { %v8674_v39 = vadd.f32 %v8602_v50, %v5842_v22 }
 0x49c   : > { %v5843_v36 = vpop.f32.mrb[152].mxu0 }
 0x49d   : > { %v5749_v56 = vpop.f32.mrb[28].mxu1  ;;  %v5844_v25 = vpop.f32.mrb[153].mxu0 }
 0x49e   : > { %v5845_v35 = vadd.f32 %v5844_v25, %v5843_v36  ;;  %v5750_v7 = vpop.f32.mrb[29].mxu1  ;;  %v5846_v55 = vpop.f32.mrb[154].mxu0 }
 0x49f   : > { %v5752_v51 = vpop.f32.mrb[30].mxu1  ;;  %v5847_v40 = vpop.f32.mrb[155].mxu0 }
 0x4a0   : > { %v5848_v2 = vadd.f32 %v5847_v40, %v5846_v55  ;;  %v5753_v23 = vpop.f32.mrb[31].mxu1  ;;  %v8677_v31 = vadd.f32 %v8605_v48, %v5845_v35 }
 0x4a2   : > { %v8680_v4 = vadd.f32 %v8608_v38, %v5848_v2 }
 0x4a4   : > { %v5849_v45 = vpop.f32.mrb[156].mxu0 }
 0x4a5   : > { %v5755_v46 = vpop.f32.mrb[32].mxu1  ;;  %v5850_v50 = vpop.f32.mrb[157].mxu0 }
 0x4a6   : > { %v5851_v29 = vadd.f32 %v5850_v50, %v5849_v45  ;;  %v5756_v41 = vpop.f32.mrb[33].mxu1  ;;  %v5852_v44 = vpop.f32.mrb[158].mxu0 }
 0x4a7   : > { %v5758_v8 = vpop.f32.mrb[34].mxu1  ;;  %v5853_v28 = vpop.f32.mrb[159].mxu0 }
 0x4a8   : > { %v5854_v54 = vadd.f32 %v5853_v28, %v5852_v44  ;;  %v5759_v10 = vpop.f32.mrb[35].mxu1  ;;  %v8683_v57 = vadd.f32 %v8614_v52, %v5851_v29 }
 0x4aa   : > { %v8686_v1 = vadd.f32 %v8620_v30, %v5854_v54 }
 0x4ac   : > { %v5855_v48 = vpop.f32.mrb[160].mxu0 }
 0x4ad   : > { %v5761_v12 = vpop.f32.mrb[36].mxu1  ;;  %v5856_v38 = vpop.f32.mrb[161].mxu0 }
 0x4ae   : > { %v5857_v24 = vadd.f32 %v5856_v38, %v5855_v48  ;;  %v5762_v3 = vpop.f32.mrb[37].mxu1  ;;  %v5858_v27 = vpop.f32.mrb[162].mxu0 }
 0x4af   : > { %v5764_v11 = vpop.f32.mrb[38].mxu1  ;;  %v5859_v5 = vpop.f32.mrb[163].mxu0 }
 0x4b0   : > { %v5860_v34 = vadd.f32 %v5859_v5, %v5858_v27  ;;  %v5765_v42 = vpop.f32.mrb[39].mxu1  ;;  %v8689_v18 = vadd.f32 %v8626_v60, %v5857_v24 }
 0x4b2   : > { %v8692_v58 = vadd.f32 %v8632_v62, %v5860_v34 }
 0x4b4   : > { %v5861_v52 = vpop.f32.mrb[164].mxu0 }
 0x4b5   : > { %v5862_v61 = vpop.f32.mrb[165].mxu0 }
 0x4b6   : > { %v5863_v30 = vadd.f32 %v5862_v61, %v5861_v52  ;;  %v5864_v0 = vpop.f32.mrb[166].mxu0 }
 0x4b7   : > { %v5865_v15 = vpop.f32.mrb[167].mxu0 }
 0x4b8   : > { %v5866_v53 = vadd.f32 %v5865_v15, %v5864_v0  ;;  %v8695_v22 = vadd.f32 %v8638_v13, %v5863_v30 }
 0x4ba   : > { %v8698_v59 = vadd.f32 %v8644_v14, %v5866_v53 }
 0x4bc   : > { %v5867_v36 = vpop.f32.mrb[168].mxu0 }
 0x4bd   : > { %v5868_v56 = vpop.f32.mrb[169].mxu0 }
 0x4be   : > { %v5869_v25 = vadd.f32 %v5868_v56, %v5867_v36  ;;  %v5870_v60 = vpop.f32.mrb[170].mxu0 }
 0x4bf   : > { %v5871_v35 = vpop.f32.mrb[171].mxu0 }
 0x4c0   : > { %v5872_v7 = vadd.f32 %v5871_v35, %v5870_v60  ;;  %v8701_v62 = vadd.f32 %v8650_v49, %v5869_v25 }
 0x4c2   : > { %v8704_v55 = vadd.f32 %v8656_v21, %v5872_v7 }
 0x4c4   : > { %v5873_v51 = vpop.f32.mrb[172].mxu0 }
 0x4c5   : > { %v5874_v40 = vpop.f32.mrb[173].mxu0 }
 0x4c6   : > { %v5875_v2 = vadd.f32 %v5874_v40, %v5873_v51  ;;  %v5876_v13 = vpop.f32.mrb[174].mxu0 }
 0x4c7   : > { %v5877_v23 = vpop.f32.mrb[175].mxu0 }
 0x4c8   : > { %v5878_v45 = vadd.f32 %v5877_v23, %v5876_v13  ;;  %v8707_v14 = vadd.f32 %v8662_v32, %v5875_v2 }
 0x4ca   : > { %v8710_v46 = vadd.f32 %v8668_v17, %v5878_v45  ;;  %v8715_v17 = vld [vmem:[%s8804_s6] ss:$0 sm:$0xff] }
 0x4cc   : > { %v5879_v50 = vpop.f32.mrb[176].mxu0 }
 0x4cd   : > { %v5880_v29 = vpop.f32.mrb[177].mxu0 }
 0x4ce   : > { %v5882_v41 = vpop.f32.mrb[178].mxu0 }
 0x4cf   : > { %v5883_v49 = vpop.f32.mrb[179].mxu0 }
 0x4d4   : > { %v5885_v44 = vpop.f32.mrb[180].mxu0 }
 0x4d5   : > { %v5886_v21 = vpop.f32.mrb[181].mxu0 }
 0x4d6   : > { %v5888_v8 = vpop.f32.mrb[182].mxu0 }
 0x4d7   : > { %v5889_v28 = vpop.f32.mrb[183].mxu0 }
 0x4dc   : > { %v5891_v54 = vpop.f32.mrb[184].mxu0 }
 0x4dd   : > { %v5892_v10 = vpop.f32.mrb[185].mxu0 }
 0x4de   : > { %v5894_v48 = vpop.f32.mrb[186].mxu0 }
 0x4df   : > { %v5895_v12 = vpop.f32.mrb[187].mxu0 }
 0x4e4   : > { %v5897_v38 = vpop.f32.mrb[188].mxu0 }
 0x4e5   : > { %v5898_v24 = vpop.f32.mrb[189].mxu0 }
 0x4e6   : > { %v5900_v32 = vpop.f32.mrb[190].mxu0 }
 0x4e7   : > { %v5901_v3 = vpop.f32.mrb[191].mxu0 }
 0x4ec   : > { %v6219_v27 = vpop.f32.mrb[88].mxu0 }
 0x4ed   : > { %v6363_v11 = vadd.f32 %v8623_v9, %v6219_v27  ;;  %v4469_v5 = vpop.f32.mrb[89].mxu0 }
 0x4ee   : > { %v6366_v34 = vadd.f32 %v8611_v33, %v4469_v5  ;;  %v6220_v42 = vpop.f32.mrb[90].mxu0 }
 0x4ef   : > { %v4621_v52 = vadd.f32 %v6363_v11, %v8715_v17  ;;  %v6369_v61 = vadd.f32 %v8629_v19, %v6220_v42  ;;  %v4472_v30 = vpop.f32.mrb[91].mxu0 }
 0x4f0   : > { %v4619_v0 = vadd.f32 %v6366_v34, %v8715_v17  ;;  %v6372_v15 = vadd.f32 %v8617_v37, %v4472_v30 }
 0x4f1   : > { %vm4645_vm6 = vcmp.ge.f32.partialorder %v4621_v52, 0.0  ;;  %v4669_v9 = vmul.f32 0.2, %v4621_v52  ;;  %v4622_v33 = vadd.f32 %v6369_v61, %v8715_v17 }
 0x4f2   : > { %vm4643_vm7 = vcmp.ge.f32.partialorder %v4619_v0, 0.0  ;;  %v4667_v53 = vmul.f32 0.2, %v4619_v0  ;;  %v4620_v19 = vadd.f32 %v6372_v15, %v8715_v17 }
 0x4f3   : > { %v4693_v36 = vsel %vm4645_vm6, %v4621_v52, %v4669_v9  ;;  %vm4646_vm12 = vcmp.ge.f32.partialorder %v4622_v33, 0.0  ;;  %v4670_v37 = vmul.f32 0.2, %v4622_v33 }
 0x4f4   : > { %4717 = vst [vmem:[%s8727_s12 + $0x10] sm:$0xff] %v4693_v36  ;;  %v4691_v56 = vsel %vm4643_vm7, %v4619_v0, %v4667_v53  ;;  %vm4644_vm13 = vcmp.ge.f32.partialorder %v4620_v19, 0.0  ;;  %v4668_v25 = vmul.f32 0.2, %v4620_v19  ;;  %v6223_v60 = vpop.f32.mrb[92].mxu0 }
 0x4f5   : > { %4715 = vst [vmem:[%s8727_s12] sm:$0xff] %v4691_v56  ;;  %v4694_v35 = vsel %vm4646_vm12, %v4622_v33, %v4670_v37  ;;  %v6375_v7 = vadd.f32 %v8647_v26, %v6223_v60  ;;  %v4485_v51 = vpop.f32.mrb[93].mxu0 }
 0x4f6   : > { %4718 = vst [vmem:[%s8727_s12 + $0x18] sm:$0xff] %v4694_v35  ;;  %v4692_v40 = vsel %vm4644_vm13, %v4620_v19, %v4668_v25  ;;  %v6378_v2 = vadd.f32 %v8635_v63, %v4485_v51  ;;  %v6224_v13 = vpop.f32.mrb[94].mxu0 }
 0x4f7   : > { %4716 = vst [vmem:[%s8727_s12 + $0x8] sm:$0xff] %v4692_v40  ;;  %v4625_v23 = vadd.f32 %v6375_v7, %v8715_v17  ;;  %v6381_v45 = vadd.f32 %v8653_v20, %v6224_v13  ;;  %v4488_v50 = vpop.f32.mrb[95].mxu0 }
 0x4f8   : > { %v4623_v29 = vadd.f32 %v6378_v2, %v8715_v17  ;;  %v6384_v41 = vadd.f32 %v8641_v16, %v4488_v50 }
 0x4f9   : > { %vm4649_vm14 = vcmp.ge.f32.partialorder %v4625_v23, 0.0  ;;  %v4673_v26 = vmul.f32 0.2, %v4625_v23  ;;  %v4626_v49 = vadd.f32 %v6381_v45, %v8715_v17 }
 0x4fa   : > { %vm4647_vm15 = vcmp.ge.f32.partialorder %v4623_v29, 0.0  ;;  %v4671_v63 = vmul.f32 0.2, %v4623_v29  ;;  %v4624_v44 = vadd.f32 %v6384_v41, %v8715_v17 }
 0x4fb   : > { %v4697_v21 = vsel %vm4649_vm14, %v4625_v23, %v4673_v26  ;;  %vm4650_vm0 = vcmp.ge.f32.partialorder %v4626_v49, 0.0  ;;  %v4674_v8 = vmul.f32 0.2, %v4626_v49 }
 0x4fc   : > { %4721 = vst [vmem:[%s8727_s12 + $0x30] sm:$0xff] %v4697_v21  ;;  %v4695_v20 = vsel %vm4647_vm15, %v4623_v29, %v4671_v63  ;;  %vm4648_vm1 = vcmp.ge.f32.partialorder %v4624_v44, 0.0  ;;  %v4672_v28 = vmul.f32 0.2, %v4624_v44  ;;  %v6227_v54 = vpop.f32.mrb[96].mxu0 }
 0x4fd   : > { %4719 = vst [vmem:[%s8727_s12 + $0x20] sm:$0xff] %v4695_v20  ;;  %v4698_v16 = vsel %vm4650_vm0, %v4626_v49, %v4674_v8  ;;  %v6387_v10 = vadd.f32 %v8671_v47, %v6227_v54  ;;  %v4501_v48 = vpop.f32.mrb[97].mxu0 }
 0x4fe   : > { %4722 = vst [vmem:[%s8727_s12 + $0x38] sm:$0xff] %v4698_v16  ;;  %v4696_v12 = vsel %vm4648_vm1, %v4624_v44, %v4672_v28  ;;  %v6390_v38 = vadd.f32 %v8659_v43, %v4501_v48  ;;  %v6228_v24 = vpop.f32.mrb[98].mxu0 }
 0x4ff   : > { %4720 = vst [vmem:[%s8727_s12 + $0x28] sm:$0xff] %v4696_v12  ;;  %v4629_v32 = vadd.f32 %v6387_v10, %v8715_v17  ;;  %v6393_v3 = vadd.f32 %v8674_v39, %v6228_v24  ;;  %v4504_v27 = vpop.f32.mrb[99].mxu0 }
 0x500   : > { %v4627_v11 = vadd.f32 %v6390_v38, %v8715_v17  ;;  %v6396_v5 = vadd.f32 %v8665_v6, %v4504_v27 }
 0x501   : > { %vm4653_vm2 = vcmp.ge.f32.partialorder %v4629_v32, 0.0  ;;  %v4677_v47 = vmul.f32 0.2, %v4629_v32  ;;  %v4630_v34 = vadd.f32 %v6393_v3, %v8715_v17 }
 0x502   : > { %vm4651_vm3 = vcmp.ge.f32.partialorder %v4627_v11, 0.0  ;;  %v4675_v43 = vmul.f32 0.2, %v4627_v11  ;;  %v4628_v42 = vadd.f32 %v6396_v5, %v8715_v17 }
 0x503   : > { %v4701_v52 = vsel %vm4653_vm2, %v4629_v32, %v4677_v47  ;;  %vm4654_vm4 = vcmp.ge.f32.partialorder %v4630_v34, 0.0  ;;  %v4678_v61 = vmul.f32 0.2, %v4630_v34 }
 0x504   : > { %4725 = vst [vmem:[%s8727_s12 + $0x50] sm:$0xff] %v4701_v52  ;;  %v4699_v39 = vsel %vm4651_vm3, %v4627_v11, %v4675_v43  ;;  %vm4652_vm5 = vcmp.ge.f32.partialorder %v4628_v42, 0.0  ;;  %v4676_v30 = vmul.f32 0.2, %v4628_v42  ;;  %v6231_v0 = vpop.f32.mrb[100].mxu0 }
 0x505   : > { %4723 = vst [vmem:[%s8727_s12 + $0x40] sm:$0xff] %v4699_v39  ;;  %v4702_v6 = vsel %vm4654_vm4, %v4630_v34, %v4678_v61  ;;  %v6399_v15 = vadd.f32 %v8683_v57, %v6231_v0  ;;  %v4517_v9 = vpop.f32.mrb[101].mxu0 }
 0x506   : > { %4726 = vst [vmem:[%s8727_s12 + $0x58] sm:$0xff] %v4702_v6  ;;  %v4700_v33 = vsel %vm4652_vm5, %v4628_v42, %v4676_v30  ;;  %v6402_v53 = vadd.f32 %v8677_v31, %v4517_v9  ;;  %v6232_v19 = vpop.f32.mrb[102].mxu0 }
 0x507   : > { %4724 = vst [vmem:[%s8727_s12 + $0x48] sm:$0xff] %v4700_v33  ;;  %v4633_v36 = vadd.f32 %v6399_v15, %v8715_v17  ;;  %v6405_v37 = vadd.f32 %v8686_v1, %v6232_v19  ;;  %v4520_v56 = vpop.f32.mrb[103].mxu0 }
 0x508   : > { %v4631_v25 = vadd.f32 %v6402_v53, %v8715_v17  ;;  %v6408_v60 = vadd.f32 %v8680_v4, %v4520_v56 }
 0x509   : > { %vm4657_vm8 = vcmp.ge.f32.partialorder %v4633_v36, 0.0  ;;  %v4681_v57 = vmul.f32 0.2, %v4633_v36  ;;  %v4634_v35 = vadd.f32 %v6405_v37, %v8715_v17 }
 0x50a   : > { %vm4655_vm9 = vcmp.ge.f32.partialorder %v4631_v25, 0.0  ;;  %v4679_v31 = vmul.f32 0.2, %v4631_v25  ;;  %v4632_v7 = vadd.f32 %v6408_v60, %v8715_v17 }
 0x50b   : > { %v4705_v51 = vsel %vm4657_vm8, %v4633_v36, %v4681_v57  ;;  %vm4658_vm10 = vcmp.ge.f32.partialorder %v4634_v35, 0.0  ;;  %v4682_v40 = vmul.f32 0.2, %v4634_v35 }
 0x50c   : > { %4729 = vst [vmem:[%s8727_s12 + $0x70] sm:$0xff] %v4705_v51  ;;  %v4703_v1 = vsel %vm4655_vm9, %v4631_v25, %v4679_v31  ;;  %vm4656_vm11 = vcmp.ge.f32.partialorder %v4632_v7, 0.0  ;;  %v4680_v2 = vmul.f32 0.2, %v4632_v7  ;;  %v6235_v13 = vpop.f32.mrb[104].mxu0 }
 0x50d   : > { %4727 = vst [vmem:[%s8727_s12 + $0x60] sm:$0xff] %v4703_v1  ;;  %v4706_v4 = vsel %vm4658_vm10, %v4634_v35, %v4682_v40  ;;  %v6411_v23 = vadd.f32 %v8695_v22, %v6235_v13  ;;  %v4533_v45 = vpop.f32.mrb[105].mxu0 }
 0x50e   : > { %4730 = vst [vmem:[%s8727_s12 + $0x78] sm:$0xff] %v4706_v4  ;;  %v4704_v50 = vsel %vm4656_vm11, %v4632_v7, %v4680_v2  ;;  %v6414_v29 = vadd.f32 %v8689_v18, %v4533_v45  ;;  %v6236_v41 = vpop.f32.mrb[106].mxu0 }
 0x50f   : > { %4728 = vst [vmem:[%s8727_s12 + $0x68] sm:$0xff] %v4704_v50  ;;  %v4637_v26 = vadd.f32 %v6411_v23, %v8715_v17  ;;  %v6417_v49 = vadd.f32 %v8698_v59, %v6236_v41  ;;  %v4536_v63 = vpop.f32.mrb[107].mxu0 }
 0x510   : > { %v4635_v44 = vadd.f32 %v6414_v29, %v8715_v17  ;;  %v6420_v21 = vadd.f32 %v8692_v58, %v4536_v63 }
 0x511   : > { %vm4661_vm6 = vcmp.ge.f32.partialorder %v4637_v26, 0.0  ;;  %v4685_v22 = vmul.f32 0.2, %v4637_v26  ;;  %v4638_v8 = vadd.f32 %v6417_v49, %v8715_v17 }
 0x512   : > { %vm4659_vm7 = vcmp.ge.f32.partialorder %v4635_v44, 0.0  ;;  %v4683_v18 = vmul.f32 0.2, %v4635_v44  ;;  %v4636_v20 = vadd.f32 %v6420_v21, %v8715_v17 }
 0x513   : > { %v4709_v28 = vsel %vm4661_vm6, %v4637_v26, %v4685_v22  ;;  %vm4662_vm12 = vcmp.ge.f32.partialorder %v4638_v8, 0.0  ;;  %v4686_v54 = vmul.f32 0.2, %v4638_v8 }
 0x514   : > { %4733 = vst [vmem:[%s8727_s12 + $0x90] sm:$0xff] %v4709_v28  ;;  %v4707_v59 = vsel %vm4659_vm7, %v4635_v44, %v4683_v18  ;;  %vm4660_vm13 = vcmp.ge.f32.partialorder %v4636_v20, 0.0  ;;  %v4684_v16 = vmul.f32 0.2, %v4636_v20  ;;  %v6239_v10 = vpop.f32.mrb[108].mxu0 }
 0x515   : > { %4731 = vst [vmem:[%s8727_s12 + $0x80] sm:$0xff] %v4707_v59  ;;  %v4710_v58 = vsel %vm4662_vm12, %v4638_v8, %v4686_v54  ;;  %v6423_v48 = vadd.f32 %v8707_v14, %v6239_v10  ;;  %v4549_v12 = vpop.f32.mrb[109].mxu0 }
 0x516   : > { %4734 = vst [vmem:[%s8727_s12 + $0x98] sm:$0xff] %v4710_v58  ;;  %v4708_v38 = vsel %vm4660_vm13, %v4636_v20, %v4684_v16  ;;  %v6426_v24 = vadd.f32 %v8701_v62, %v4549_v12  ;;  %v6240_v32 = vpop.f32.mrb[110].mxu0 }
 0x517   : > { %4732 = vst [vmem:[%s8727_s12 + $0x88] sm:$0xff] %v4708_v38  ;;  %v4641_v3 = vadd.f32 %v6423_v48, %v8715_v17  ;;  %v6429_v27 = vadd.f32 %v8710_v46, %v6240_v32  ;;  %v4552_v11 = vpop.f32.mrb[111].mxu0 }
 0x518   : > { %v4639_v5 = vadd.f32 %v6426_v24, %v8715_v17  ;;  %v6432_v47 = vadd.f32 %v8704_v55, %v4552_v11 }
 0x519   : > { %vm4665_vm14 = vcmp.ge.f32.partialorder %v4641_v3, 0.0  ;;  %v4689_v14 = vmul.f32 0.2, %v4641_v3  ;;  %v4642_v34 = vadd.f32 %v6429_v27, %v8715_v17 }
 0x51a   : > { %vm4663_vm15 = vcmp.ge.f32.partialorder %v4639_v5, 0.0  ;;  %v4687_v62 = vmul.f32 0.2, %v4639_v5  ;;  %v4640_v43 = vadd.f32 %v6432_v47, %v8715_v17 }
 0x51b   : > { %v4713_v42 = vsel %vm4665_vm14, %v4641_v3, %v4689_v14  ;;  %vm4666_vm0 = vcmp.ge.f32.partialorder %v4642_v34, 0.0  ;;  %v4690_v52 = vmul.f32 0.2, %v4642_v34 }
 0x51c   : > { %4737 = vst [vmem:[%s8727_s12 + $0xb0] sm:$0xff] %v4713_v42  ;;  %v4711_v46 = vsel %vm4663_vm15, %v4639_v5, %v4687_v62  ;;  %vm4664_vm1 = vcmp.ge.f32.partialorder %v4640_v43, 0.0  ;;  %v4688_v61 = vmul.f32 0.2, %v4640_v43  ;;  %v6243_v39 = vpop.f32.mrb[192].mxu0 }
 0x51d   : > { %4735 = vst [vmem:[%s8727_s12 + $0xa0] sm:$0xff] %v4711_v46  ;;  %v4714_v55 = vsel %vm4666_vm0, %v4642_v34, %v4690_v52  ;;  %v4565_v30 = vpop.f32.mrb[193].mxu0 }
 0x51e   : > { %4738 = vst [vmem:[%s8727_s12 + $0xb8] sm:$0xff] %v4714_v55  ;;  %v4712_v0 = vsel %vm4664_vm1, %v4640_v43, %v4688_v61  ;;  %v6244_v6 = vpop.f32.mrb[194].mxu0 }
 0x51f   : > { %4736 = vst [vmem:[%s8727_s12 + $0xa8] sm:$0xff] %v4712_v0  ;;  %v4567_v15 = vpop.f32.mrb[195].mxu0 }
 0x524   : > { %v6247_v9 = vpop.f32.mrb[196].mxu0 }
 0x525   : > { %v4577_v33 = vpop.f32.mrb[197].mxu0 }
 0x526   : > { %v6248_v53 = vpop.f32.mrb[198].mxu0 }
 0x527   : > { %v4579_v17 = vpop.f32.mrb[199].mxu0 }
 0x528 PF: > { %s18_s24 = sadd.s32 1, %s6768_s24  }
 0x529   : > { %p15_p3 = scmp.ge.s32.totalorder %s18_s24, 4  }
 0x52b   :  { %17 = sbr.rel (!%p15_p3) target bundleno = 1 (0x1), region = 87 }
 0x532   :  { %4760 = vsyncpa [#allocation4], 1 }
 0x533   :  { %4762 = vsyncpa [#allocation4 + $0x1], 1 }

</bundles_post_ra>
